<compile_context>
chip_gen: v6e
topology: v6e:2x2x1
jax: 0.10.0
libtpu: 0.0.40
codegen_flags: <defaults>
</compile_context>

<pallas_src>
import functools

import jax
import jax.numpy as jnp
import numpy as np
from jax.experimental import pallas as pl
from jax.experimental.pallas import tpu as pltpu

_MXU_DTYPE = jnp.bfloat16   # conv matmul input dtype (accumulation stays f32)


# ----------------------------------------------------------------------------
# Fused ResidualGroup kernel (one grid step == one batch image)
# ----------------------------------------------------------------------------
def _residual_group_kernel(x_ref, conv_w_ref, conv_b_ref,
                           ca_w1_ref, ca_b1_ref, ca_w2t_ref, ca_b2_ref,
                           o_ref, pad_ref, patch_ref,
                           *, H, W, C, Cr, n_resblocks, pad0):
    HW = H * W

    # Zero ONLY the halo columns; the interior is fully overwritten by every
    # conv's staging store.
    pad_ref[:, :pad0] = jnp.zeros((C, pad0), pad_ref.dtype)
    pad_ref[:, pad0 + HW:pad0 + HW + pad0] = jnp.zeros((C, pad0), pad_ref.dtype)

    # Static per-lane masks for the horizontal (x) halo of the flattened image
    # (hoisted: built once per grid step, reused by every conv).
    x_idx = jax.lax.broadcasted_iota(jnp.int32, (C, HW), 1) % W
    mask_left = x_idx >= 1           # tap reads x-1: invalid at x == 0
    mask_right = x_idx < (W - 1)     # tap reads x+1: invalid at x == W-1
    zero_tap = jnp.zeros((C, HW), pad_ref.dtype)

    def stage(img_f32):
        """Place a conv input into pad_ref's interior window (bf16)."""
        pad_ref[:, pad0:pad0 + HW] = img_f32.astype(pad_ref.dtype)

    def conv_from_pad(conv_idx):
        """3x3 'same' conv of whatever is currently staged in pad_ref."""
        # im2col: write the 9 (masked) taps straight into the bf16 patch
        # scratch -- no f32 concat temporary.
        t = 0
        for dy in range(3):
            for dx in range(3):
                start = pad0 + (dy - 1) * W + (dx - 1)
                tap = pad_ref[:, start:start + HW]
                # Vertical out-of-bounds falls into the zero halo; only the
                # horizontal row-wraparound needs masking.
                if dx == 0:
                    tap = jnp.where(mask_left, tap, zero_tap)
                elif dx == 2:
                    tap = jnp.where(mask_right, tap, zero_tap)
                patch_ref[t * C:(t + 1) * C, :] = tap
                t += 1
        acc = jnp.dot(conv_w_ref[conv_idx],              # (C, 9C)  bf16
                      patch_ref[...],                    # (9C, HW) bf16
                      preferred_element_type=jnp.float32)  # (C, HW) f32
        return acc + conv_b_ref[conv_idx]                # f32 bias (C, 1)

    x = x_ref[0].astype(jnp.float32)                     # (C, HW)
    res = x
    for rb in range(n_resblocks):
        stage(res)
        h = jnp.maximum(conv_from_pad(2 * rb), 0.0)      # conv1 + ReLU
        stage(h)                                         # conv2 input -> pad_ref
        h = conv_from_pad(2 * rb + 1)                    # conv2
        # ---- channel attention (squeeze-excite), VPU/XLU only, all f32 ----
        pooled = jnp.mean(h, axis=1, keepdims=True)      # (C, 1)   lane reduce
        z = jnp.sum(ca_w1_ref[rb] * pooled,              # (C, Cr)*(C, 1)
                    axis=0, keepdims=True)               # (1, Cr)  sublane reduce
        z = jnp.maximum(z + ca_b1_ref[rb], 0.0)
        s = jnp.sum(ca_w2t_ref[rb] * z,                  # (C, Cr)*(1, Cr)
                    axis=1, keepdims=True)               # (C, 1)   lane reduce
        s = jax.nn.sigmoid(s + ca_b2_ref[rb])
        res = h * s + res                                # RCAB skip
    stage(res)
    out = conv_from_pad(2 * n_resblocks) + x             # tail conv + group skip
    o_ref[...] = out.reshape(1, C, HW).astype(o_ref.dtype)


# ----------------------------------------------------------------------------
# Wrapper: pack weights (conv weights pre-cast to bf16), call the fused kernel
# ----------------------------------------------------------------------------
def _pack_params(params, C):
    rcabs = params["rcabs"]
    conv_ws, conv_bs = [], []
    for p in rcabs:
        for wk, bk in (("w1", "b1"), ("w2", "b2")):
            # (9, Cin, Cout) -> (Cout, 9*Cin) so conv = W @ im2col_patch
            conv_ws.append(jnp.transpose(p[wk], (2, 0, 1)).reshape(C, 9 * C))
            conv_bs.append(p[bk].reshape(C, 1))
    conv_ws.append(jnp.transpose(params["tail_w"], (2, 0, 1)).reshape(C, 9 * C))
    conv_bs.append(params["tail_b"].reshape(C, 1))
    conv_w = jnp.stack(conv_ws).astype(_MXU_DTYPE)                  # (2R+1, C, 9C) bf16
    conv_b = jnp.stack(conv_bs)                                     # (2R+1, C, 1)  f32
    ca_w1 = jnp.stack([p["ca_w1"] for p in rcabs])                  # (R, C, Cr)    f32
    ca_b1 = jnp.stack([p["ca_b1"].reshape(1, -1) for p in rcabs])   # (R, 1, Cr)    f32
    ca_w2t = jnp.stack([p["ca_w2"].T for p in rcabs])               # (R, C, Cr)    f32
    ca_b2 = jnp.stack([p["ca_b2"].reshape(-1, 1) for p in rcabs])   # (R, C, 1)     f32
    return conv_w, conv_b, ca_w1, ca_b1, ca_w2t, ca_b2


def residual_group_forward(x_nchw, params):
    N, C, H, W = x_nchw.shape
    HW = H * W
    n_rb = len(params["rcabs"])
    Cr = params["rcabs"][0]["ca_w1"].shape[1]
    conv_w, conv_b, ca_w1, ca_b1, ca_w2t, ca_b2 = _pack_params(params, C)

    pad0 = ((W + 1 + 127) // 128) * 128          # lane-aligned interior offset
    pad_width = HW + 2 * pad0

    kernel = functools.partial(
        _residual_group_kernel, H=H, W=W, C=C, Cr=Cr,
        n_resblocks=n_rb, pad0=pad0)

    # NCHW -> (N, C, H*W): lane-dense, no transpose needed.
    x_flat = x_nchw.reshape(N, C, HW)
    const = lambda n: (0, 0, 0)

    out_flat = pl.pallas_call(
        kernel,
        out_shape=jax.ShapeDtypeStruct((N, C, HW), x_nchw.dtype),
        grid_spec=pltpu.PrefetchScalarGridSpec(
            num_scalar_prefetch=0,
            grid=(N,),
            in_specs=[
                pl.BlockSpec((1, C, HW), lambda n: (n, 0, 0)),
                pl.BlockSpec(conv_w.shape, const),
                pl.BlockSpec(conv_b.shape, const),
                pl.BlockSpec(ca_w1.shape, const),
                pl.BlockSpec(ca_b1.shape, const),
                pl.BlockSpec(ca_w2t.shape, const),
                pl.BlockSpec(ca_b2.shape, const),
            ],
            out_specs=pl.BlockSpec((1, C, HW), lambda n: (n, 0, 0)),
            scratch_shapes=[
                pltpu.VMEM((C, pad_width), _MXU_DTYPE),   # zero-padded halo image
                pltpu.VMEM((9 * C, HW), _MXU_DTYPE),      # im2col patch (MXU input)
            ],
        ),
        # Batch axis across v7x's 2 TensorCores; sequential loop on v5e/v6e.
        # For realistic RCAN sizes (n_feat=64, large H*W) add an H-tile grid
        # axis and set pltpu.CompilerParams(vmem_limit_bytes=...) -- not
        # needed at these shapes.
        compiler_params=pltpu.CompilerParams(
            dimension_semantics=("parallel",)),
    )(x_flat, conv_w, conv_b, ca_w1, ca_b1, ca_w2t, ca_b2)
    return out_flat.reshape(N, C, H, W)


# ----------------------------------------------------------------------------
# Deterministic parameter init (shapes from the PyTorch module __init__)
# ----------------------------------------------------------------------------
def init_params(key, n_feat, reduction, n_resblocks):
    C, Cr = n_feat, n_feat // reduction
    params = {"rcabs": []}
    for _ in range(n_resblocks):
        key, *ks = jax.random.split(key, 9)
        params["rcabs"].append({
            "w1": jax.random.normal(ks[0], (9, C, C), jnp.float32) * 0.05,
            "b1": jax.random.normal(ks[1], (C,), jnp.float32) * 0.01,
            "w2": jax.random.normal(ks[2], (9, C, C), jnp.float32) * 0.05,
            "b2": jax.random.normal(ks[3], (C,), jnp.float32) * 0.01,
            "ca_w1": jax.random.normal(ks[4], (C, Cr), jnp.float32) * 0.1,
            "ca_b1": jax.random.normal(ks[5], (Cr,), jnp.float32) * 0.01,
            "ca_w2": jax.random.normal(ks[6], (Cr, C), jnp.float32) * 0.1,
            "ca_b2": jax.random.normal(ks[7], (C,), jnp.float32) * 0.01,
        })
    key, k1, k2 = jax.random.split(key, 3)
    params["tail_w"] = jax.random.normal(k1, (9, C, C), jnp.float32) * 0.05
    params["tail_b"] = jax.random.normal(k2, (C,), jnp.float32) * 0.01
    return params


# ----------------------------------------------------------------------------
# Pure-JAX f32 reference (for correctness check only)
# ----------------------------------------------------------------------------
def _ref_conv(x_nhwc, w9, b):
    C = x_nhwc.shape[-1]
    w = w9.reshape(3, 3, C, C)                       # (kh, kw, Cin, Cout)
    return jax.lax.conv_general_dilated(
        x_nhwc, w, (1, 1), "SAME",
        dimension_numbers=("NHWC", "HWIO", "NHWC")) + b


def residual_group_reference(x_nchw, params):
    x = jnp.transpose(x_nchw, (0, 2, 3, 1))
    res = x
    for p in params["rcabs"]:
        h = jax.nn.relu(_ref_conv(res, p["w1"], p["b1"]))
        h = _ref_conv(h, p["w2"], p["b2"])
        y = jnp.mean(h, axis=(1, 2))                                 # (N, C)
        z = jax.nn.relu(y @ p["ca_w1"] + p["ca_b1"])
        s = jax.nn.sigmoid(z @ p["ca_w2"] + p["ca_b2"])
        res = h * s[:, None, None, :] + res
    out = _ref_conv(res, params["tail_w"], params["tail_b"]) + x
    return jnp.transpose(out, (0, 3, 1, 2))


if __name__ == "__main__":
    # ResidualGroup(conv=default_conv, n_feat=16, kernel_size=3,
    #               reduction=4, act=ReLU, res_scale=1, n_resblocks=2)
    N, C, H, W = 2, 16, 16, 16
    reduction, n_resblocks = 4, 2

    key = jax.random.PRNGKey(0)
    kx, kp = jax.random.split(key)
    x = jax.random.normal(kx, (N, C, H, W), jnp.float32)     # NCHW like PyTorch
    params = init_params(kp, C, reduction, n_resblocks)

    fwd = jax.jit(residual_group_forward)
    out = jax.block_until_ready(fwd(x, params))
    ref = jax.block_until_ready(residual_group_reference(x, params))

    assert out.shape == (N, C, H, W)
    # bf16 MXU inputs with f32 accumulation -> loosened tolerance vs f32 ref.
    np.testing.assert_allclose(np.asarray(out), np.asarray(ref),
                               rtol=2e-2, atol=2e-2)
    print("KERNEL_OK")
</pallas_src>

<mosaic_0001>
module attributes {stable_mosaic.version = 11 : i64} {
  func.func @_residual_group_kernel(%arg0: i32, %arg1: memref<1x16x256xf32, #tpu.memory_space<vmem>>, %arg2: memref<5x16x144xbf16, #tpu.memory_space<vmem>>, %arg3: memref<5x16x1xf32, #tpu.memory_space<vmem>>, %arg4: memref<2x16x4xf32, #tpu.memory_space<vmem>>, %arg5: memref<2x1x4xf32, #tpu.memory_space<vmem>>, %arg6: memref<2x16x4xf32, #tpu.memory_space<vmem>>, %arg7: memref<2x16x1xf32, #tpu.memory_space<vmem>>, %arg8: memref<1x16x256xf32, #tpu.memory_space<vmem>>, %arg9: memref<16x512xbf16, #tpu.memory_space<vmem>>, %arg10: memref<144x256xbf16, #tpu.memory_space<vmem>>) attributes {dimension_semantics = [#tpu.dimension_semantics<parallel>], iteration_bounds = array<i64: 2>, scalar_prefetch = 0 : i64, scratch_operands = 2 : i64, tpu.core_type = #tpu.core_type<tc>, window_params = [{transform_indices = @transform_0, window_bounds = array<i64: 1, 16, 256>}, {pipeline_mode = #tpu.pipeline_mode<synchronous>, transform_indices = @transform_1, window_bounds = array<i64: 5, 16, 144>}, {pipeline_mode = #tpu.pipeline_mode<synchronous>, transform_indices = @transform_2, window_bounds = array<i64: 5, 16, 1>}, {pipeline_mode = #tpu.pipeline_mode<synchronous>, transform_indices = @transform_3, window_bounds = array<i64: 2, 16, 4>}, {pipeline_mode = #tpu.pipeline_mode<synchronous>, transform_indices = @transform_4, window_bounds = array<i64: 2, 1, 4>}, {pipeline_mode = #tpu.pipeline_mode<synchronous>, transform_indices = @transform_5, window_bounds = array<i64: 2, 16, 4>}, {pipeline_mode = #tpu.pipeline_mode<synchronous>, transform_indices = @transform_6, window_bounds = array<i64: 2, 16, 1>}, {transform_indices = @transform_7, window_bounds = array<i64: 1, 16, 256>}]} {
    %cst = arith.constant 0.000000e+00 : bf16
    %0 = vector.broadcast %cst : bf16 to vector<16x128xbf16>
    %c0 = arith.constant 0 : index
    %c0_0 = arith.constant 0 : index
    %1 = vector.load %arg9[%c0, %c0_0] : memref<16x512xbf16, #tpu.memory_space<vmem>>, vector<16x128xbf16>
    tpu.vector_store %arg9[%c0, %c0_0], %0 {strides = array<i32>} : memref<16x512xbf16, #tpu.memory_space<vmem>>, vector<16x128xbf16>,
    %cst_1 = arith.constant 0.000000e+00 : bf16
    %2 = vector.broadcast %cst_1 : bf16 to vector<16x128xbf16>
    %c0_2 = arith.constant 0 : index
    %c384 = arith.constant 384 : index
    %3 = vector.load %arg9[%c0_2, %c384] : memref<16x512xbf16, #tpu.memory_space<vmem>>, vector<16x128xbf16>
    tpu.vector_store %arg9[%c0_2, %c384], %2 {strides = array<i32>} : memref<16x512xbf16, #tpu.memory_space<vmem>>, vector<16x128xbf16>,
    %4 = tpu.iota {dimensions = array<i32: 1>} : vector<16x256xi32>
    %c16_i32 = arith.constant 16 : i32
    %c0_i32 = arith.constant 0 : i32
    %5 = arith.cmpi eq, %c16_i32, %c0_i32 : i32
    %c1_i32 = arith.constant 1 : i32
    %6 = arith.select %5, %c1_i32, %c16_i32 : i32
    %7 = vector.broadcast %6 : i32 to vector<16x256xi32>
    %8 = arith.remsi %4, %7 : vector<16x256xi32>
    %c0_i32_3 = arith.constant 0 : i32
    %9 = vector.broadcast %c0_i32_3 : i32 to vector<16x256xi32>
    %10 = arith.cmpi ne, %8, %9 : vector<16x256xi32>
    %c0_i32_4 = arith.constant 0 : i32
    %11 = vector.broadcast %c0_i32_4 : i32 to vector<16x256xi32>
    %12 = arith.cmpi slt, %8, %11 : vector<16x256xi32>
    %c0_i32_5 = arith.constant 0 : i32
    %13 = arith.cmpi slt, %6, %c0_i32_5 : i32
    %14 = vector.broadcast %13 : i1 to vector<16x256xi1>
    %15 = vector.broadcast %14 : vector<16x256xi1> to vector<16x256xi1>
    %16 = arith.xori %12, %15 : vector<16x256xi1>
    %17 = arith.andi %16, %10 : vector<16x256xi1>
    %18 = vector.broadcast %6 : i32 to vector<16x256xi32>
    %19 = arith.addi %8, %18 : vector<16x256xi32>
    %20 = arith.select %17, %19, %8 : vector<16x256xi1>, vector<16x256xi32>
    %c1_i32_6 = arith.constant 1 : i32
    %21 = vector.broadcast %c1_i32_6 : i32 to vector<16x256xi32>
    %22 = arith.cmpi sge, %20, %21 : vector<16x256xi32>
    %c15_i32 = arith.constant 15 : i32
    %23 = vector.broadcast %c15_i32 : i32 to vector<16x256xi32>
    %24 = arith.cmpi slt, %20, %23 : vector<16x256xi32>
    %cst_7 = arith.constant 0.000000e+00 : bf16
    %25 = vector.broadcast %cst_7 : bf16 to vector<16x256xbf16>
    %c0_8 = arith.constant 0 : index
    %c0_9 = arith.constant 0 : index
    %c0_10 = arith.constant 0 : index
    %26 = vector.load %arg1[%c0_8, %c0_9, %c0_10] : memref<1x16x256xf32, #tpu.memory_space<vmem>>, vector<1x16x256xf32>
    %27 = vector.shape_cast %26 : vector<1x16x256xf32> to vector<16x256xf32>
    %28 = arith.truncf %27 : vector<16x256xf32> to vector<16x256xbf16>
    %c0_11 = arith.constant 0 : index
    %c128 = arith.constant 128 : index
    %29 = vector.load %arg9[%c0_11, %c128] : memref<16x512xbf16, #tpu.memory_space<vmem>>, vector<16x256xbf16>
    tpu.vector_store %arg9[%c0_11, %c128], %28 {strides = array<i32>} : memref<16x512xbf16, #tpu.memory_space<vmem>>, vector<16x256xbf16>,
    %c0_12 = arith.constant 0 : index
    %c111 = arith.constant 111 : index
    %30 = vector.load %arg9[%c0_12, %c111] : memref<16x512xbf16, #tpu.memory_space<vmem>>, vector<16x256xbf16>
    %31 = arith.select %22, %30, %25 : vector<16x256xi1>, vector<16x256xbf16>
    %c0_13 = arith.constant 0 : index
    %c0_14 = arith.constant 0 : index
    %32 = vector.load %arg10[%c0_13, %c0_14] : memref<144x256xbf16, #tpu.memory_space<vmem>>, vector<16x256xbf16>
    tpu.vector_store %arg10[%c0_13, %c0_14], %31 {strides = array<i32>} : memref<144x256xbf16, #tpu.memory_space<vmem>>, vector<16x256xbf16>,
    %c0_15 = arith.constant 0 : index
    %c112 = arith.constant 112 : index
    %33 = vector.load %arg9[%c0_15, %c112] : memref<16x512xbf16, #tpu.memory_space<vmem>>, vector<16x256xbf16>
    %c16 = arith.constant 16 : index
    %c0_16 = arith.constant 0 : index
    %34 = vector.load %arg10[%c16, %c0_16] : memref<144x256xbf16, #tpu.memory_space<vmem>>, vector<16x256xbf16>
    tpu.vector_store %arg10[%c16, %c0_16], %33 {strides = array<i32>} : memref<144x256xbf16, #tpu.memory_space<vmem>>, vector<16x256xbf16>,
    %c0_17 = arith.constant 0 : index
    %c113 = arith.constant 113 : index
    %35 = vector.load %arg9[%c0_17, %c113] : memref<16x512xbf16, #tpu.memory_space<vmem>>, vector<16x256xbf16>
    %36 = arith.select %24, %35, %25 : vector<16x256xi1>, vector<16x256xbf16>
    %c32 = arith.constant 32 : index
    %c0_18 = arith.constant 0 : index
    %37 = vector.load %arg10[%c32, %c0_18] : memref<144x256xbf16, #tpu.memory_space<vmem>>, vector<16x256xbf16>
    tpu.vector_store %arg10[%c32, %c0_18], %36 {strides = array<i32>} : memref<144x256xbf16, #tpu.memory_space<vmem>>, vector<16x256xbf16>,
    %c0_19 = arith.constant 0 : index
    %c127 = arith.constant 127 : index
    %38 = vector.load %arg9[%c0_19, %c127] : memref<16x512xbf16, #tpu.memory_space<vmem>>, vector<16x256xbf16>
    %39 = arith.select %22, %38, %25 : vector<16x256xi1>, vector<16x256xbf16>
    %c48 = arith.constant 48 : index
    %c0_20 = arith.constant 0 : index
    %40 = vector.load %arg10[%c48, %c0_20] : memref<144x256xbf16, #tpu.memory_space<vmem>>, vector<16x256xbf16>
    tpu.vector_store %arg10[%c48, %c0_20], %39 {strides = array<i32>} : memref<144x256xbf16, #tpu.memory_space<vmem>>, vector<16x256xbf16>,
    %c0_21 = arith.constant 0 : index
    %c128_22 = arith.constant 128 : index
    %41 = vector.load %arg9[%c0_21, %c128_22] : memref<16x512xbf16, #tpu.memory_space<vmem>>, vector<16x256xbf16>
    %c64 = arith.constant 64 : index
    %c0_23 = arith.constant 0 : index
    %42 = vector.load %arg10[%c64, %c0_23] : memref<144x256xbf16, #tpu.memory_space<vmem>>, vector<16x256xbf16>
    tpu.vector_store %arg10[%c64, %c0_23], %41 {strides = array<i32>} : memref<144x256xbf16, #tpu.memory_space<vmem>>, vector<16x256xbf16>,
    %c0_24 = arith.constant 0 : index
    %c129 = arith.constant 129 : index
    %43 = vector.load %arg9[%c0_24, %c129] : memref<16x512xbf16, #tpu.memory_space<vmem>>, vector<16x256xbf16>
    %44 = arith.select %24, %43, %25 : vector<16x256xi1>, vector<16x256xbf16>
    %c80 = arith.constant 80 : index
    %c0_25 = arith.constant 0 : index
    %45 = vector.load %arg10[%c80, %c0_25] : memref<144x256xbf16, #tpu.memory_space<vmem>>, vector<16x256xbf16>
    tpu.vector_store %arg10[%c80, %c0_25], %44 {strides = array<i32>} : memref<144x256xbf16, #tpu.memory_space<vmem>>, vector<16x256xbf16>,
    %c0_26 = arith.constant 0 : index
    %c143 = arith.constant 143 : index
    %46 = vector.load %arg9[%c0_26, %c143] : memref<16x512xbf16, #tpu.memory_space<vmem>>, vector<16x256xbf16>
    %47 = arith.select %22, %46, %25 : vector<16x256xi1>, vector<16x256xbf16>
    %c96 = arith.constant 96 : index
    %c0_27 = arith.constant 0 : index
    %48 = vector.load %arg10[%c96, %c0_27] : memref<144x256xbf16, #tpu.memory_space<vmem>>, vector<16x256xbf16>
    tpu.vector_store %arg10[%c96, %c0_27], %47 {strides = array<i32>} : memref<144x256xbf16, #tpu.memory_space<vmem>>, vector<16x256xbf16>,
    %c0_28 = arith.constant 0 : index
    %c144 = arith.constant 144 : index
    %49 = vector.load %arg9[%c0_28, %c144] : memref<16x512xbf16, #tpu.memory_space<vmem>>, vector<16x256xbf16>
    %c112_29 = arith.constant 112 : index
    %c0_30 = arith.constant 0 : index
    %50 = vector.load %arg10[%c112_29, %c0_30] : memref<144x256xbf16, #tpu.memory_space<vmem>>, vector<16x256xbf16>
    tpu.vector_store %arg10[%c112_29, %c0_30], %49 {strides = array<i32>} : memref<144x256xbf16, #tpu.memory_space<vmem>>, vector<16x256xbf16>,
    %c0_31 = arith.constant 0 : index
    %c145 = arith.constant 145 : index
    %51 = vector.load %arg9[%c0_31, %c145] : memref<16x512xbf16, #tpu.memory_space<vmem>>, vector<16x256xbf16>
    %52 = arith.select %24, %51, %25 : vector<16x256xi1>, vector<16x256xbf16>
    %c128_32 = arith.constant 128 : index
    %c0_33 = arith.constant 0 : index
    %53 = vector.load %arg10[%c128_32, %c0_33] : memref<144x256xbf16, #tpu.memory_space<vmem>>, vector<16x256xbf16>
    tpu.vector_store %arg10[%c128_32, %c0_33], %52 {strides = array<i32>} : memref<144x256xbf16, #tpu.memory_space<vmem>>, vector<16x256xbf16>,
    %c0_34 = arith.constant 0 : index
    %c0_35 = arith.constant 0 : index
    %c0_36 = arith.constant 0 : index
    %54 = vector.load %arg2[%c0_34, %c0_35, %c0_36] : memref<5x16x144xbf16, #tpu.memory_space<vmem>>, vector<1x16x144xbf16>
    %55 = vector.shape_cast %54 : vector<1x16x144xbf16> to vector<16x144xbf16>
    %c0_37 = arith.constant 0 : index
    %c0_38 = arith.constant 0 : index
    %56 = vector.load %arg10[%c0_37, %c0_38] : memref<144x256xbf16, #tpu.memory_space<vmem>>, vector<144x256xbf16>
    %cst_39 = arith.constant dense<0.000000e+00> : vector<16x256xf32>
    %57 = tpu.matmul %55, %56, %cst_39 {dimension_numbers = #tpu.dot_dimension_numbers<[1], [0], [0], [1], [0, 0, 1, 1], [], []>} : vector<16x144xbf16>, vector<144x256xbf16>, vector<16x256xf32> -> vector<16x256xf32>
    %c0_40 = arith.constant 0 : index
    %c0_41 = arith.constant 0 : index
    %c0_42 = arith.constant 0 : index
    %58 = vector.load %arg3[%c0_40, %c0_41, %c0_42] : memref<5x16x1xf32, #tpu.memory_space<vmem>>, vector<1x16x1xf32>
    %59 = vector.shape_cast %58 : vector<1x16x1xf32> to vector<16x1xf32>
    %60 = vector.broadcast %59 : vector<16x1xf32> to vector<16x256xf32>
    %61 = arith.addf %57, %60 : vector<16x256xf32>
    %cst_43 = arith.constant 0.000000e+00 : f32
    %62 = vector.broadcast %cst_43 : f32 to vector<16x256xf32>
    %63 = arith.maximumf %61, %62 : vector<16x256xf32>
    %64 = arith.truncf %63 : vector<16x256xf32> to vector<16x256xbf16>
    %c0_44 = arith.constant 0 : index
    %c128_45 = arith.constant 128 : index
    %65 = vector.load %arg9[%c0_44, %c128_45] : memref<16x512xbf16, #tpu.memory_space<vmem>>, vector<16x256xbf16>
    tpu.vector_store %arg9[%c0_44, %c128_45], %64 {strides = array<i32>} : memref<16x512xbf16, #tpu.memory_space<vmem>>, vector<16x256xbf16>,
    %c0_46 = arith.constant 0 : index
    %c111_47 = arith.constant 111 : index
    %66 = vector.load %arg9[%c0_46, %c111_47] : memref<16x512xbf16, #tpu.memory_space<vmem>>, vector<16x256xbf16>
    %67 = arith.select %22, %66, %25 : vector<16x256xi1>, vector<16x256xbf16>
    %c0_48 = arith.constant 0 : index
    %c0_49 = arith.constant 0 : index
    %68 = vector.load %arg10[%c0_48, %c0_49] : memref<144x256xbf16, #tpu.memory_space<vmem>>, vector<16x256xbf16>
    tpu.vector_store %arg10[%c0_48, %c0_49], %67 {strides = array<i32>} : memref<144x256xbf16, #tpu.memory_space<vmem>>, vector<16x256xbf16>,
    %c0_50 = arith.constant 0 : index
    %c112_51 = arith.constant 112 : index
    %69 = vector.load %arg9[%c0_50, %c112_51] : memref<16x512xbf16, #tpu.memory_space<vmem>>, vector<16x256xbf16>
    %c16_52 = arith.constant 16 : index
    %c0_53 = arith.constant 0 : index
    %70 = vector.load %arg10[%c16_52, %c0_53] : memref<144x256xbf16, #tpu.memory_space<vmem>>, vector<16x256xbf16>
    tpu.vector_store %arg10[%c16_52, %c0_53], %69 {strides = array<i32>} : memref<144x256xbf16, #tpu.memory_space<vmem>>, vector<16x256xbf16>,
    %c0_54 = arith.constant 0 : index
    %c113_55 = arith.constant 113 : index
    %71 = vector.load %arg9[%c0_54, %c113_55] : memref<16x512xbf16, #tpu.memory_space<vmem>>, vector<16x256xbf16>
    %72 = arith.select %24, %71, %25 : vector<16x256xi1>, vector<16x256xbf16>
    %c32_56 = arith.constant 32 : index
    %c0_57 = arith.constant 0 : index
    %73 = vector.load %arg10[%c32_56, %c0_57] : memref<144x256xbf16, #tpu.memory_space<vmem>>, vector<16x256xbf16>
    tpu.vector_store %arg10[%c32_56, %c0_57], %72 {strides = array<i32>} : memref<144x256xbf16, #tpu.memory_space<vmem>>, vector<16x256xbf16>,
    %c0_58 = arith.constant 0 : index
    %c127_59 = arith.constant 127 : index
    %74 = vector.load %arg9[%c0_58, %c127_59] : memref<16x512xbf16, #tpu.memory_space<vmem>>, vector<16x256xbf16>
    %75 = arith.select %22, %74, %25 : vector<16x256xi1>, vector<16x256xbf16>
    %c48_60 = arith.constant 48 : index
    %c0_61 = arith.constant 0 : index
    %76 = vector.load %arg10[%c48_60, %c0_61] : memref<144x256xbf16, #tpu.memory_space<vmem>>, vector<16x256xbf16>
    tpu.vector_store %arg10[%c48_60, %c0_61], %75 {strides = array<i32>} : memref<144x256xbf16, #tpu.memory_space<vmem>>, vector<16x256xbf16>,
    %c0_62 = arith.constant 0 : index
    %c128_63 = arith.constant 128 : index
    %77 = vector.load %arg9[%c0_62, %c128_63] : memref<16x512xbf16, #tpu.memory_space<vmem>>, vector<16x256xbf16>
    %c64_64 = arith.constant 64 : index
    %c0_65 = arith.constant 0 : index
    %78 = vector.load %arg10[%c64_64, %c0_65] : memref<144x256xbf16, #tpu.memory_space<vmem>>, vector<16x256xbf16>
    tpu.vector_store %arg10[%c64_64, %c0_65], %77 {strides = array<i32>} : memref<144x256xbf16, #tpu.memory_space<vmem>>, vector<16x256xbf16>,
    %c0_66 = arith.constant 0 : index
    %c129_67 = arith.constant 129 : index
    %79 = vector.load %arg9[%c0_66, %c129_67] : memref<16x512xbf16, #tpu.memory_space<vmem>>, vector<16x256xbf16>
    %80 = arith.select %24, %79, %25 : vector<16x256xi1>, vector<16x256xbf16>
    %c80_68 = arith.constant 80 : index
    %c0_69 = arith.constant 0 : index
    %81 = vector.load %arg10[%c80_68, %c0_69] : memref<144x256xbf16, #tpu.memory_space<vmem>>, vector<16x256xbf16>
    tpu.vector_store %arg10[%c80_68, %c0_69], %80 {strides = array<i32>} : memref<144x256xbf16, #tpu.memory_space<vmem>>, vector<16x256xbf16>,
    %c0_70 = arith.constant 0 : index
    %c143_71 = arith.constant 143 : index
    %82 = vector.load %arg9[%c0_70, %c143_71] : memref<16x512xbf16, #tpu.memory_space<vmem>>, vector<16x256xbf16>
    %83 = arith.select %22, %82, %25 : vector<16x256xi1>, vector<16x256xbf16>
    %c96_72 = arith.constant 96 : index
    %c0_73 = arith.constant 0 : index
    %84 = vector.load %arg10[%c96_72, %c0_73] : memref<144x256xbf16, #tpu.memory_space<vmem>>, vector<16x256xbf16>
    tpu.vector_store %arg10[%c96_72, %c0_73], %83 {strides = array<i32>} : memref<144x256xbf16, #tpu.memory_space<vmem>>, vector<16x256xbf16>,
    %c0_74 = arith.constant 0 : index
    %c144_75 = arith.constant 144 : index
    %85 = vector.load %arg9[%c0_74, %c144_75] : memref<16x512xbf16, #tpu.memory_space<vmem>>, vector<16x256xbf16>
    %c112_76 = arith.constant 112 : index
    %c0_77 = arith.constant 0 : index
    %86 = vector.load %arg10[%c112_76, %c0_77] : memref<144x256xbf16, #tpu.memory_space<vmem>>, vector<16x256xbf16>
    tpu.vector_store %arg10[%c112_76, %c0_77], %85 {strides = array<i32>} : memref<144x256xbf16, #tpu.memory_space<vmem>>, vector<16x256xbf16>,
    %c0_78 = arith.constant 0 : index
    %c145_79 = arith.constant 145 : index
    %87 = vector.load %arg9[%c0_78, %c145_79] : memref<16x512xbf16, #tpu.memory_space<vmem>>, vector<16x256xbf16>
    %88 = arith.select %24, %87, %25 : vector<16x256xi1>, vector<16x256xbf16>
    %c128_80 = arith.constant 128 : index
    %c0_81 = arith.constant 0 : index
    %89 = vector.load %arg10[%c128_80, %c0_81] : memref<144x256xbf16, #tpu.memory_space<vmem>>, vector<16x256xbf16>
    tpu.vector_store %arg10[%c128_80, %c0_81], %88 {strides = array<i32>} : memref<144x256xbf16, #tpu.memory_space<vmem>>, vector<16x256xbf16>,
    %c1 = arith.constant 1 : index
    %c0_82 = arith.constant 0 : index
    %c0_83 = arith.constant 0 : index
    %90 = vector.load %arg2[%c1, %c0_82, %c0_83] : memref<5x16x144xbf16, #tpu.memory_space<vmem>>, vector<1x16x144xbf16>
    %91 = vector.shape_cast %90 : vector<1x16x144xbf16> to vector<16x144xbf16>
    %c0_84 = arith.constant 0 : index
    %c0_85 = arith.constant 0 : index
    %92 = vector.load %arg10[%c0_84, %c0_85] : memref<144x256xbf16, #tpu.memory_space<vmem>>, vector<144x256xbf16>
    %cst_86 = arith.constant dense<0.000000e+00> : vector<16x256xf32>
    %93 = tpu.matmul %91, %92, %cst_86 {dimension_numbers = #tpu.dot_dimension_numbers<[1], [0], [0], [1], [0, 0, 1, 1], [], []>} : vector<16x144xbf16>, vector<144x256xbf16>, vector<16x256xf32> -> vector<16x256xf32>
    %c1_87 = arith.constant 1 : index
    %c0_88 = arith.constant 0 : index
    %c0_89 = arith.constant 0 : index
    %94 = vector.load %arg3[%c1_87, %c0_88, %c0_89] : memref<5x16x1xf32, #tpu.memory_space<vmem>>, vector<1x16x1xf32>
    %95 = vector.shape_cast %94 : vector<1x16x1xf32> to vector<16x1xf32>
    %96 = vector.broadcast %95 : vector<16x1xf32> to vector<16x256xf32>
    %97 = arith.addf %93, %96 : vector<16x256xf32>
    %cst_90 = arith.constant dense<0.000000e+00> : vector<16xf32>
    %98 = vector.multi_reduction <add>, %97, %cst_90 [1] : vector<16x256xf32> to vector<16xf32>
    %99 = vector.shape_cast %98 : vector<16xf32> to vector<16x1xf32>
    %cst_91 = arith.constant 2.560000e+02 : f32
    %100 = vector.broadcast %cst_91 : f32 to vector<16x1xf32>
    %101 = arith.divf %99, %100 : vector<16x1xf32>
    %c0_92 = arith.constant 0 : index
    %c0_93 = arith.constant 0 : index
    %c0_94 = arith.constant 0 : index
    %102 = vector.load %arg4[%c0_92, %c0_93, %c0_94] : memref<2x16x4xf32, #tpu.memory_space<vmem>>, vector<1x16x4xf32>
    %103 = vector.shape_cast %102 : vector<1x16x4xf32> to vector<16x4xf32>
    %104 = vector.broadcast %101 : vector<16x1xf32> to vector<16x4xf32>
    %105 = arith.mulf %103, %104 : vector<16x4xf32>
    %cst_95 = arith.constant dense<0.000000e+00> : vector<4xf32>
    %106 = vector.multi_reduction <add>, %105, %cst_95 [0] : vector<16x4xf32> to vector<4xf32>
    %107 = vector.shape_cast %106 : vector<4xf32> to vector<1x4xf32>
    %c0_96 = arith.constant 0 : index
    %c0_97 = arith.constant 0 : index
    %c0_98 = arith.constant 0 : index
    %108 = vector.load %arg5[%c0_96, %c0_97, %c0_98] : memref<2x1x4xf32, #tpu.memory_space<vmem>>, vector<1x1x4xf32>
    %109 = vector.shape_cast %108 : vector<1x1x4xf32> to vector<1x4xf32>
    %110 = arith.addf %107, %109 : vector<1x4xf32>
    %cst_99 = arith.constant 0.000000e+00 : f32
    %111 = vector.broadcast %cst_99 : f32 to vector<1x4xf32>
    %112 = arith.maximumf %110, %111 : vector<1x4xf32>
    %c0_100 = arith.constant 0 : index
    %c0_101 = arith.constant 0 : index
    %c0_102 = arith.constant 0 : index
    %113 = vector.load %arg6[%c0_100, %c0_101, %c0_102] : memref<2x16x4xf32, #tpu.memory_space<vmem>>, vector<1x16x4xf32>
    %114 = vector.shape_cast %113 : vector<1x16x4xf32> to vector<16x4xf32>
    %115 = vector.broadcast %112 : vector<1x4xf32> to vector<16x4xf32>
    %116 = arith.mulf %114, %115 : vector<16x4xf32>
    %cst_103 = arith.constant dense<0.000000e+00> : vector<16xf32>
    %117 = vector.multi_reduction <add>, %116, %cst_103 [1] : vector<16x4xf32> to vector<16xf32>
    %118 = vector.shape_cast %117 : vector<16xf32> to vector<16x1xf32>
    %c0_104 = arith.constant 0 : index
    %c0_105 = arith.constant 0 : index
    %c0_106 = arith.constant 0 : index
    %119 = vector.load %arg7[%c0_104, %c0_105, %c0_106] : memref<2x16x1xf32, #tpu.memory_space<vmem>>, vector<1x16x1xf32>
    %120 = vector.shape_cast %119 : vector<1x16x1xf32> to vector<16x1xf32>
    %121 = arith.addf %118, %120 : vector<16x1xf32>
    %122 = arith.negf %121 : vector<16x1xf32>
    %123 = math.exp %122 : vector<16x1xf32>
    %cst_107 = arith.constant 1.000000e+00 : f32
    %124 = vector.broadcast %cst_107 : f32 to vector<16x1xf32>
    %125 = arith.addf %124, %123 : vector<16x1xf32>
    %126 = arith.divf %124, %125 : vector<16x1xf32>
    %127 = vector.broadcast %126 : vector<16x1xf32> to vector<16x256xf32>
    %128 = arith.mulf %97, %127 : vector<16x256xf32>
    %129 = arith.addf %128, %27 : vector<16x256xf32>
    %130 = arith.truncf %129 : vector<16x256xf32> to vector<16x256xbf16>
    %c0_108 = arith.constant 0 : index
    %c128_109 = arith.constant 128 : index
    %131 = vector.load %arg9[%c0_108, %c128_109] : memref<16x512xbf16, #tpu.memory_space<vmem>>, vector<16x256xbf16>
    tpu.vector_store %arg9[%c0_108, %c128_109], %130 {strides = array<i32>} : memref<16x512xbf16, #tpu.memory_space<vmem>>, vector<16x256xbf16>,
    %c0_110 = arith.constant 0 : index
    %c111_111 = arith.constant 111 : index
    %132 = vector.load %arg9[%c0_110, %c111_111] : memref<16x512xbf16, #tpu.memory_space<vmem>>, vector<16x256xbf16>
    %133 = arith.select %22, %132, %25 : vector<16x256xi1>, vector<16x256xbf16>
    %c0_112 = arith.constant 0 : index
    %c0_113 = arith.constant 0 : index
    %134 = vector.load %arg10[%c0_112, %c0_113] : memref<144x256xbf16, #tpu.memory_space<vmem>>, vector<16x256xbf16>
    tpu.vector_store %arg10[%c0_112, %c0_113], %133 {strides = array<i32>} : memref<144x256xbf16, #tpu.memory_space<vmem>>, vector<16x256xbf16>,
    %c0_114 = arith.constant 0 : index
    %c112_115 = arith.constant 112 : index
    %135 = vector.load %arg9[%c0_114, %c112_115] : memref<16x512xbf16, #tpu.memory_space<vmem>>, vector<16x256xbf16>
    %c16_116 = arith.constant 16 : index
    %c0_117 = arith.constant 0 : index
    %136 = vector.load %arg10[%c16_116, %c0_117] : memref<144x256xbf16, #tpu.memory_space<vmem>>, vector<16x256xbf16>
    tpu.vector_store %arg10[%c16_116, %c0_117], %135 {strides = array<i32>} : memref<144x256xbf16, #tpu.memory_space<vmem>>, vector<16x256xbf16>,
    %c0_118 = arith.constant 0 : index
    %c113_119 = arith.constant 113 : index
    %137 = vector.load %arg9[%c0_118, %c113_119] : memref<16x512xbf16, #tpu.memory_space<vmem>>, vector<16x256xbf16>
    %138 = arith.select %24, %137, %25 : vector<16x256xi1>, vector<16x256xbf16>
    %c32_120 = arith.constant 32 : index
    %c0_121 = arith.constant 0 : index
    %139 = vector.load %arg10[%c32_120, %c0_121] : memref<144x256xbf16, #tpu.memory_space<vmem>>, vector<16x256xbf16>
    tpu.vector_store %arg10[%c32_120, %c0_121], %138 {strides = array<i32>} : memref<144x256xbf16, #tpu.memory_space<vmem>>, vector<16x256xbf16>,
    %c0_122 = arith.constant 0 : index
    %c127_123 = arith.constant 127 : index
    %140 = vector.load %arg9[%c0_122, %c127_123] : memref<16x512xbf16, #tpu.memory_space<vmem>>, vector<16x256xbf16>
    %141 = arith.select %22, %140, %25 : vector<16x256xi1>, vector<16x256xbf16>
    %c48_124 = arith.constant 48 : index
    %c0_125 = arith.constant 0 : index
    %142 = vector.load %arg10[%c48_124, %c0_125] : memref<144x256xbf16, #tpu.memory_space<vmem>>, vector<16x256xbf16>
    tpu.vector_store %arg10[%c48_124, %c0_125], %141 {strides = array<i32>} : memref<144x256xbf16, #tpu.memory_space<vmem>>, vector<16x256xbf16>,
    %c0_126 = arith.constant 0 : index
    %c128_127 = arith.constant 128 : index
    %143 = vector.load %arg9[%c0_126, %c128_127] : memref<16x512xbf16, #tpu.memory_space<vmem>>, vector<16x256xbf16>
    %c64_128 = arith.constant 64 : index
    %c0_129 = arith.constant 0 : index
    %144 = vector.load %arg10[%c64_128, %c0_129] : memref<144x256xbf16, #tpu.memory_space<vmem>>, vector<16x256xbf16>
    tpu.vector_store %arg10[%c64_128, %c0_129], %143 {strides = array<i32>} : memref<144x256xbf16, #tpu.memory_space<vmem>>, vector<16x256xbf16>,
    %c0_130 = arith.constant 0 : index
    %c129_131 = arith.constant 129 : index
    %145 = vector.load %arg9[%c0_130, %c129_131] : memref<16x512xbf16, #tpu.memory_space<vmem>>, vector<16x256xbf16>
    %146 = arith.select %24, %145, %25 : vector<16x256xi1>, vector<16x256xbf16>
    %c80_132 = arith.constant 80 : index
    %c0_133 = arith.constant 0 : index
    %147 = vector.load %arg10[%c80_132, %c0_133] : memref<144x256xbf16, #tpu.memory_space<vmem>>, vector<16x256xbf16>
    tpu.vector_store %arg10[%c80_132, %c0_133], %146 {strides = array<i32>} : memref<144x256xbf16, #tpu.memory_space<vmem>>, vector<16x256xbf16>,
    %c0_134 = arith.constant 0 : index
    %c143_135 = arith.constant 143 : index
    %148 = vector.load %arg9[%c0_134, %c143_135] : memref<16x512xbf16, #tpu.memory_space<vmem>>, vector<16x256xbf16>
    %149 = arith.select %22, %148, %25 : vector<16x256xi1>, vector<16x256xbf16>
    %c96_136 = arith.constant 96 : index
    %c0_137 = arith.constant 0 : index
    %150 = vector.load %arg10[%c96_136, %c0_137] : memref<144x256xbf16, #tpu.memory_space<vmem>>, vector<16x256xbf16>
    tpu.vector_store %arg10[%c96_136, %c0_137], %149 {strides = array<i32>} : memref<144x256xbf16, #tpu.memory_space<vmem>>, vector<16x256xbf16>,
    %c0_138 = arith.constant 0 : index
    %c144_139 = arith.constant 144 : index
    %151 = vector.load %arg9[%c0_138, %c144_139] : memref<16x512xbf16, #tpu.memory_space<vmem>>, vector<16x256xbf16>
    %c112_140 = arith.constant 112 : index
    %c0_141 = arith.constant 0 : index
    %152 = vector.load %arg10[%c112_140, %c0_141] : memref<144x256xbf16, #tpu.memory_space<vmem>>, vector<16x256xbf16>
    tpu.vector_store %arg10[%c112_140, %c0_141], %151 {strides = array<i32>} : memref<144x256xbf16, #tpu.memory_space<vmem>>, vector<16x256xbf16>,
    %c0_142 = arith.constant 0 : index
    %c145_143 = arith.constant 145 : index
    %153 = vector.load %arg9[%c0_142, %c145_143] : memref<16x512xbf16, #tpu.memory_space<vmem>>, vector<16x256xbf16>
    %154 = arith.select %24, %153, %25 : vector<16x256xi1>, vector<16x256xbf16>
    %c128_144 = arith.constant 128 : index
    %c0_145 = arith.constant 0 : index
    %155 = vector.load %arg10[%c128_144, %c0_145] : memref<144x256xbf16, #tpu.memory_space<vmem>>, vector<16x256xbf16>
    tpu.vector_store %arg10[%c128_144, %c0_145], %154 {strides = array<i32>} : memref<144x256xbf16, #tpu.memory_space<vmem>>, vector<16x256xbf16>,
    %c2 = arith.constant 2 : index
    %c0_146 = arith.constant 0 : index
    %c0_147 = arith.constant 0 : index
    %156 = vector.load %arg2[%c2, %c0_146, %c0_147] : memref<5x16x144xbf16, #tpu.memory_space<vmem>>, vector<1x16x144xbf16>
    %157 = vector.shape_cast %156 : vector<1x16x144xbf16> to vector<16x144xbf16>
    %c0_148 = arith.constant 0 : index
    %c0_149 = arith.constant 0 : index
    %158 = vector.load %arg10[%c0_148, %c0_149] : memref<144x256xbf16, #tpu.memory_space<vmem>>, vector<144x256xbf16>
    %cst_150 = arith.constant dense<0.000000e+00> : vector<16x256xf32>
    %159 = tpu.matmul %157, %158, %cst_150 {dimension_numbers = #tpu.dot_dimension_numbers<[1], [0], [0], [1], [0, 0, 1, 1], [], []>} : vector<16x144xbf16>, vector<144x256xbf16>, vector<16x256xf32> -> vector<16x256xf32>
    %c2_151 = arith.constant 2 : index
    %c0_152 = arith.constant 0 : index
    %c0_153 = arith.constant 0 : index
    %160 = vector.load %arg3[%c2_151, %c0_152, %c0_153] : memref<5x16x1xf32, #tpu.memory_space<vmem>>, vector<1x16x1xf32>
    %161 = vector.shape_cast %160 : vector<1x16x1xf32> to vector<16x1xf32>
    %162 = vector.broadcast %161 : vector<16x1xf32> to vector<16x256xf32>
    %163 = arith.addf %159, %162 : vector<16x256xf32>
    %cst_154 = arith.constant 0.000000e+00 : f32
    %164 = vector.broadcast %cst_154 : f32 to vector<16x256xf32>
    %165 = arith.maximumf %163, %164 : vector<16x256xf32>
    %166 = arith.truncf %165 : vector<16x256xf32> to vector<16x256xbf16>
    %c0_155 = arith.constant 0 : index
    %c128_156 = arith.constant 128 : index
    %167 = vector.load %arg9[%c0_155, %c128_156] : memref<16x512xbf16, #tpu.memory_space<vmem>>, vector<16x256xbf16>
    tpu.vector_store %arg9[%c0_155, %c128_156], %166 {strides = array<i32>} : memref<16x512xbf16, #tpu.memory_space<vmem>>, vector<16x256xbf16>,
    %c0_157 = arith.constant 0 : index
    %c111_158 = arith.constant 111 : index
    %168 = vector.load %arg9[%c0_157, %c111_158] : memref<16x512xbf16, #tpu.memory_space<vmem>>, vector<16x256xbf16>
    %169 = arith.select %22, %168, %25 : vector<16x256xi1>, vector<16x256xbf16>
    %c0_159 = arith.constant 0 : index
    %c0_160 = arith.constant 0 : index
    %170 = vector.load %arg10[%c0_159, %c0_160] : memref<144x256xbf16, #tpu.memory_space<vmem>>, vector<16x256xbf16>
    tpu.vector_store %arg10[%c0_159, %c0_160], %169 {strides = array<i32>} : memref<144x256xbf16, #tpu.memory_space<vmem>>, vector<16x256xbf16>,
    %c0_161 = arith.constant 0 : index
    %c112_162 = arith.constant 112 : index
    %171 = vector.load %arg9[%c0_161, %c112_162] : memref<16x512xbf16, #tpu.memory_space<vmem>>, vector<16x256xbf16>
    %c16_163 = arith.constant 16 : index
    %c0_164 = arith.constant 0 : index
    %172 = vector.load %arg10[%c16_163, %c0_164] : memref<144x256xbf16, #tpu.memory_space<vmem>>, vector<16x256xbf16>
    tpu.vector_store %arg10[%c16_163, %c0_164], %171 {strides = array<i32>} : memref<144x256xbf16, #tpu.memory_space<vmem>>, vector<16x256xbf16>,
    %c0_165 = arith.constant 0 : index
    %c113_166 = arith.constant 113 : index
    %173 = vector.load %arg9[%c0_165, %c113_166] : memref<16x512xbf16, #tpu.memory_space<vmem>>, vector<16x256xbf16>
    %174 = arith.select %24, %173, %25 : vector<16x256xi1>, vector<16x256xbf16>
    %c32_167 = arith.constant 32 : index
    %c0_168 = arith.constant 0 : index
    %175 = vector.load %arg10[%c32_167, %c0_168] : memref<144x256xbf16, #tpu.memory_space<vmem>>, vector<16x256xbf16>
    tpu.vector_store %arg10[%c32_167, %c0_168], %174 {strides = array<i32>} : memref<144x256xbf16, #tpu.memory_space<vmem>>, vector<16x256xbf16>,
    %c0_169 = arith.constant 0 : index
    %c127_170 = arith.constant 127 : index
    %176 = vector.load %arg9[%c0_169, %c127_170] : memref<16x512xbf16, #tpu.memory_space<vmem>>, vector<16x256xbf16>
    %177 = arith.select %22, %176, %25 : vector<16x256xi1>, vector<16x256xbf16>
    %c48_171 = arith.constant 48 : index
    %c0_172 = arith.constant 0 : index
    %178 = vector.load %arg10[%c48_171, %c0_172] : memref<144x256xbf16, #tpu.memory_space<vmem>>, vector<16x256xbf16>
    tpu.vector_store %arg10[%c48_171, %c0_172], %177 {strides = array<i32>} : memref<144x256xbf16, #tpu.memory_space<vmem>>, vector<16x256xbf16>,
    %c0_173 = arith.constant 0 : index
    %c128_174 = arith.constant 128 : index
    %179 = vector.load %arg9[%c0_173, %c128_174] : memref<16x512xbf16, #tpu.memory_space<vmem>>, vector<16x256xbf16>
    %c64_175 = arith.constant 64 : index
    %c0_176 = arith.constant 0 : index
    %180 = vector.load %arg10[%c64_175, %c0_176] : memref<144x256xbf16, #tpu.memory_space<vmem>>, vector<16x256xbf16>
    tpu.vector_store %arg10[%c64_175, %c0_176], %179 {strides = array<i32>} : memref<144x256xbf16, #tpu.memory_space<vmem>>, vector<16x256xbf16>,
    %c0_177 = arith.constant 0 : index
    %c129_178 = arith.constant 129 : index
    %181 = vector.load %arg9[%c0_177, %c129_178] : memref<16x512xbf16, #tpu.memory_space<vmem>>, vector<16x256xbf16>
    %182 = arith.select %24, %181, %25 : vector<16x256xi1>, vector<16x256xbf16>
    %c80_179 = arith.constant 80 : index
    %c0_180 = arith.constant 0 : index
    %183 = vector.load %arg10[%c80_179, %c0_180] : memref<144x256xbf16, #tpu.memory_space<vmem>>, vector<16x256xbf16>
    tpu.vector_store %arg10[%c80_179, %c0_180], %182 {strides = array<i32>} : memref<144x256xbf16, #tpu.memory_space<vmem>>, vector<16x256xbf16>,
    %c0_181 = arith.constant 0 : index
    %c143_182 = arith.constant 143 : index
    %184 = vector.load %arg9[%c0_181, %c143_182] : memref<16x512xbf16, #tpu.memory_space<vmem>>, vector<16x256xbf16>
    %185 = arith.select %22, %184, %25 : vector<16x256xi1>, vector<16x256xbf16>
    %c96_183 = arith.constant 96 : index
    %c0_184 = arith.constant 0 : index
    %186 = vector.load %arg10[%c96_183, %c0_184] : memref<144x256xbf16, #tpu.memory_space<vmem>>, vector<16x256xbf16>
    tpu.vector_store %arg10[%c96_183, %c0_184], %185 {strides = array<i32>} : memref<144x256xbf16, #tpu.memory_space<vmem>>, vector<16x256xbf16>,
    %c0_185 = arith.constant 0 : index
    %c144_186 = arith.constant 144 : index
    %187 = vector.load %arg9[%c0_185, %c144_186] : memref<16x512xbf16, #tpu.memory_space<vmem>>, vector<16x256xbf16>
    %c112_187 = arith.constant 112 : index
    %c0_188 = arith.constant 0 : index
    %188 = vector.load %arg10[%c112_187, %c0_188] : memref<144x256xbf16, #tpu.memory_space<vmem>>, vector<16x256xbf16>
    tpu.vector_store %arg10[%c112_187, %c0_188], %187 {strides = array<i32>} : memref<144x256xbf16, #tpu.memory_space<vmem>>, vector<16x256xbf16>,
    %c0_189 = arith.constant 0 : index
    %c145_190 = arith.constant 145 : index
    %189 = vector.load %arg9[%c0_189, %c145_190] : memref<16x512xbf16, #tpu.memory_space<vmem>>, vector<16x256xbf16>
    %190 = arith.select %24, %189, %25 : vector<16x256xi1>, vector<16x256xbf16>
    %c128_191 = arith.constant 128 : index
    %c0_192 = arith.constant 0 : index
    %191 = vector.load %arg10[%c128_191, %c0_192] : memref<144x256xbf16, #tpu.memory_space<vmem>>, vector<16x256xbf16>
    tpu.vector_store %arg10[%c128_191, %c0_192], %190 {strides = array<i32>} : memref<144x256xbf16, #tpu.memory_space<vmem>>, vector<16x256xbf16>,
    %c3 = arith.constant 3 : index
    %c0_193 = arith.constant 0 : index
    %c0_194 = arith.constant 0 : index
    %192 = vector.load %arg2[%c3, %c0_193, %c0_194] : memref<5x16x144xbf16, #tpu.memory_space<vmem>>, vector<1x16x144xbf16>
    %193 = vector.shape_cast %192 : vector<1x16x144xbf16> to vector<16x144xbf16>
    %c0_195 = arith.constant 0 : index
    %c0_196 = arith.constant 0 : index
    %194 = vector.load %arg10[%c0_195, %c0_196] : memref<144x256xbf16, #tpu.memory_space<vmem>>, vector<144x256xbf16>
    %cst_197 = arith.constant dense<0.000000e+00> : vector<16x256xf32>
    %195 = tpu.matmul %193, %194, %cst_197 {dimension_numbers = #tpu.dot_dimension_numbers<[1], [0], [0], [1], [0, 0, 1, 1], [], []>} : vector<16x144xbf16>, vector<144x256xbf16>, vector<16x256xf32> -> vector<16x256xf32>
    %c3_198 = arith.constant 3 : index
    %c0_199 = arith.constant 0 : index
    %c0_200 = arith.constant 0 : index
    %196 = vector.load %arg3[%c3_198, %c0_199, %c0_200] : memref<5x16x1xf32, #tpu.memory_space<vmem>>, vector<1x16x1xf32>
    %197 = vector.shape_cast %196 : vector<1x16x1xf32> to vector<16x1xf32>
    %198 = vector.broadcast %197 : vector<16x1xf32> to vector<16x256xf32>
    %199 = arith.addf %195, %198 : vector<16x256xf32>
    %cst_201 = arith.constant dense<0.000000e+00> : vector<16xf32>
    %200 = vector.multi_reduction <add>, %199, %cst_201 [1] : vector<16x256xf32> to vector<16xf32>
    %201 = vector.shape_cast %200 : vector<16xf32> to vector<16x1xf32>
    %cst_202 = arith.constant 2.560000e+02 : f32
    %202 = vector.broadcast %cst_202 : f32 to vector<16x1xf32>
    %203 = arith.divf %201, %202 : vector<16x1xf32>
    %c1_203 = arith.constant 1 : index
    %c0_204 = arith.constant 0 : index
    %c0_205 = arith.constant 0 : index
    %204 = vector.load %arg4[%c1_203, %c0_204, %c0_205] : memref<2x16x4xf32, #tpu.memory_space<vmem>>, vector<1x16x4xf32>
    %205 = vector.shape_cast %204 : vector<1x16x4xf32> to vector<16x4xf32>
    %206 = vector.broadcast %203 : vector<16x1xf32> to vector<16x4xf32>
    %207 = arith.mulf %205, %206 : vector<16x4xf32>
    %cst_206 = arith.constant dense<0.000000e+00> : vector<4xf32>
    %208 = vector.multi_reduction <add>, %207, %cst_206 [0] : vector<16x4xf32> to vector<4xf32>
    %209 = vector.shape_cast %208 : vector<4xf32> to vector<1x4xf32>
    %c1_207 = arith.constant 1 : index
    %c0_208 = arith.constant 0 : index
    %c0_209 = arith.constant 0 : index
    %210 = vector.load %arg5[%c1_207, %c0_208, %c0_209] : memref<2x1x4xf32, #tpu.memory_space<vmem>>, vector<1x1x4xf32>
    %211 = vector.shape_cast %210 : vector<1x1x4xf32> to vector<1x4xf32>
    %212 = arith.addf %209, %211 : vector<1x4xf32>
    %cst_210 = arith.constant 0.000000e+00 : f32
    %213 = vector.broadcast %cst_210 : f32 to vector<1x4xf32>
    %214 = arith.maximumf %212, %213 : vector<1x4xf32>
    %c1_211 = arith.constant 1 : index
    %c0_212 = arith.constant 0 : index
    %c0_213 = arith.constant 0 : index
    %215 = vector.load %arg6[%c1_211, %c0_212, %c0_213] : memref<2x16x4xf32, #tpu.memory_space<vmem>>, vector<1x16x4xf32>
    %216 = vector.shape_cast %215 : vector<1x16x4xf32> to vector<16x4xf32>
    %217 = vector.broadcast %214 : vector<1x4xf32> to vector<16x4xf32>
    %218 = arith.mulf %216, %217 : vector<16x4xf32>
    %cst_214 = arith.constant dense<0.000000e+00> : vector<16xf32>
    %219 = vector.multi_reduction <add>, %218, %cst_214 [1] : vector<16x4xf32> to vector<16xf32>
    %220 = vector.shape_cast %219 : vector<16xf32> to vector<16x1xf32>
    %c1_215 = arith.constant 1 : index
    %c0_216 = arith.constant 0 : index
    %c0_217 = arith.constant 0 : index
    %221 = vector.load %arg7[%c1_215, %c0_216, %c0_217] : memref<2x16x1xf32, #tpu.memory_space<vmem>>, vector<1x16x1xf32>
    %222 = vector.shape_cast %221 : vector<1x16x1xf32> to vector<16x1xf32>
    %223 = arith.addf %220, %222 : vector<16x1xf32>
    %224 = arith.negf %223 : vector<16x1xf32>
    %225 = math.exp %224 : vector<16x1xf32>
    %cst_218 = arith.constant 1.000000e+00 : f32
    %226 = vector.broadcast %cst_218 : f32 to vector<16x1xf32>
    %227 = arith.addf %226, %225 : vector<16x1xf32>
    %228 = arith.divf %226, %227 : vector<16x1xf32>
    %229 = vector.broadcast %228 : vector<16x1xf32> to vector<16x256xf32>
    %230 = arith.mulf %199, %229 : vector<16x256xf32>
    %231 = arith.addf %230, %129 : vector<16x256xf32>
    %232 = arith.truncf %231 : vector<16x256xf32> to vector<16x256xbf16>
    %c0_219 = arith.constant 0 : index
    %c128_220 = arith.constant 128 : index
    %233 = vector.load %arg9[%c0_219, %c128_220] : memref<16x512xbf16, #tpu.memory_space<vmem>>, vector<16x256xbf16>
    tpu.vector_store %arg9[%c0_219, %c128_220], %232 {strides = array<i32>} : memref<16x512xbf16, #tpu.memory_space<vmem>>, vector<16x256xbf16>,
    %c0_221 = arith.constant 0 : index
    %c111_222 = arith.constant 111 : index
    %234 = vector.load %arg9[%c0_221, %c111_222] : memref<16x512xbf16, #tpu.memory_space<vmem>>, vector<16x256xbf16>
    %235 = arith.select %22, %234, %25 : vector<16x256xi1>, vector<16x256xbf16>
    %c0_223 = arith.constant 0 : index
    %c0_224 = arith.constant 0 : index
    %236 = vector.load %arg10[%c0_223, %c0_224] : memref<144x256xbf16, #tpu.memory_space<vmem>>, vector<16x256xbf16>
    tpu.vector_store %arg10[%c0_223, %c0_224], %235 {strides = array<i32>} : memref<144x256xbf16, #tpu.memory_space<vmem>>, vector<16x256xbf16>,
    %c0_225 = arith.constant 0 : index
    %c112_226 = arith.constant 112 : index
    %237 = vector.load %arg9[%c0_225, %c112_226] : memref<16x512xbf16, #tpu.memory_space<vmem>>, vector<16x256xbf16>
    %c16_227 = arith.constant 16 : index
    %c0_228 = arith.constant 0 : index
    %238 = vector.load %arg10[%c16_227, %c0_228] : memref<144x256xbf16, #tpu.memory_space<vmem>>, vector<16x256xbf16>
    tpu.vector_store %arg10[%c16_227, %c0_228], %237 {strides = array<i32>} : memref<144x256xbf16, #tpu.memory_space<vmem>>, vector<16x256xbf16>,
    %c0_229 = arith.constant 0 : index
    %c113_230 = arith.constant 113 : index
    %239 = vector.load %arg9[%c0_229, %c113_230] : memref<16x512xbf16, #tpu.memory_space<vmem>>, vector<16x256xbf16>
    %240 = arith.select %24, %239, %25 : vector<16x256xi1>, vector<16x256xbf16>
    %c32_231 = arith.constant 32 : index
    %c0_232 = arith.constant 0 : index
    %241 = vector.load %arg10[%c32_231, %c0_232] : memref<144x256xbf16, #tpu.memory_space<vmem>>, vector<16x256xbf16>
    tpu.vector_store %arg10[%c32_231, %c0_232], %240 {strides = array<i32>} : memref<144x256xbf16, #tpu.memory_space<vmem>>, vector<16x256xbf16>,
    %c0_233 = arith.constant 0 : index
    %c127_234 = arith.constant 127 : index
    %242 = vector.load %arg9[%c0_233, %c127_234] : memref<16x512xbf16, #tpu.memory_space<vmem>>, vector<16x256xbf16>
    %243 = arith.select %22, %242, %25 : vector<16x256xi1>, vector<16x256xbf16>
    %c48_235 = arith.constant 48 : index
    %c0_236 = arith.constant 0 : index
    %244 = vector.load %arg10[%c48_235, %c0_236] : memref<144x256xbf16, #tpu.memory_space<vmem>>, vector<16x256xbf16>
    tpu.vector_store %arg10[%c48_235, %c0_236], %243 {strides = array<i32>} : memref<144x256xbf16, #tpu.memory_space<vmem>>, vector<16x256xbf16>,
    %c0_237 = arith.constant 0 : index
    %c128_238 = arith.constant 128 : index
    %245 = vector.load %arg9[%c0_237, %c128_238] : memref<16x512xbf16, #tpu.memory_space<vmem>>, vector<16x256xbf16>
    %c64_239 = arith.constant 64 : index
    %c0_240 = arith.constant 0 : index
    %246 = vector.load %arg10[%c64_239, %c0_240] : memref<144x256xbf16, #tpu.memory_space<vmem>>, vector<16x256xbf16>
    tpu.vector_store %arg10[%c64_239, %c0_240], %245 {strides = array<i32>} : memref<144x256xbf16, #tpu.memory_space<vmem>>, vector<16x256xbf16>,
    %c0_241 = arith.constant 0 : index
    %c129_242 = arith.constant 129 : index
    %247 = vector.load %arg9[%c0_241, %c129_242] : memref<16x512xbf16, #tpu.memory_space<vmem>>, vector<16x256xbf16>
    %248 = arith.select %24, %247, %25 : vector<16x256xi1>, vector<16x256xbf16>
    %c80_243 = arith.constant 80 : index
    %c0_244 = arith.constant 0 : index
    %249 = vector.load %arg10[%c80_243, %c0_244] : memref<144x256xbf16, #tpu.memory_space<vmem>>, vector<16x256xbf16>
    tpu.vector_store %arg10[%c80_243, %c0_244], %248 {strides = array<i32>} : memref<144x256xbf16, #tpu.memory_space<vmem>>, vector<16x256xbf16>,
    %c0_245 = arith.constant 0 : index
    %c143_246 = arith.constant 143 : index
    %250 = vector.load %arg9[%c0_245, %c143_246] : memref<16x512xbf16, #tpu.memory_space<vmem>>, vector<16x256xbf16>
    %251 = arith.select %22, %250, %25 : vector<16x256xi1>, vector<16x256xbf16>
    %c96_247 = arith.constant 96 : index
    %c0_248 = arith.constant 0 : index
    %252 = vector.load %arg10[%c96_247, %c0_248] : memref<144x256xbf16, #tpu.memory_space<vmem>>, vector<16x256xbf16>
    tpu.vector_store %arg10[%c96_247, %c0_248], %251 {strides = array<i32>} : memref<144x256xbf16, #tpu.memory_space<vmem>>, vector<16x256xbf16>,
    %c0_249 = arith.constant 0 : index
    %c144_250 = arith.constant 144 : index
    %253 = vector.load %arg9[%c0_249, %c144_250] : memref<16x512xbf16, #tpu.memory_space<vmem>>, vector<16x256xbf16>
    %c112_251 = arith.constant 112 : index
    %c0_252 = arith.constant 0 : index
    %254 = vector.load %arg10[%c112_251, %c0_252] : memref<144x256xbf16, #tpu.memory_space<vmem>>, vector<16x256xbf16>
    tpu.vector_store %arg10[%c112_251, %c0_252], %253 {strides = array<i32>} : memref<144x256xbf16, #tpu.memory_space<vmem>>, vector<16x256xbf16>,
    %c0_253 = arith.constant 0 : index
    %c145_254 = arith.constant 145 : index
    %255 = vector.load %arg9[%c0_253, %c145_254] : memref<16x512xbf16, #tpu.memory_space<vmem>>, vector<16x256xbf16>
    %256 = arith.select %24, %255, %25 : vector<16x256xi1>, vector<16x256xbf16>
    %c128_255 = arith.constant 128 : index
    %c0_256 = arith.constant 0 : index
    %257 = vector.load %arg10[%c128_255, %c0_256] : memref<144x256xbf16, #tpu.memory_space<vmem>>, vector<16x256xbf16>
    tpu.vector_store %arg10[%c128_255, %c0_256], %256 {strides = array<i32>} : memref<144x256xbf16, #tpu.memory_space<vmem>>, vector<16x256xbf16>,
    %c4 = arith.constant 4 : index
    %c0_257 = arith.constant 0 : index
    %c0_258 = arith.constant 0 : index
    %258 = vector.load %arg2[%c4, %c0_257, %c0_258] : memref<5x16x144xbf16, #tpu.memory_space<vmem>>, vector<1x16x144xbf16>
    %259 = vector.shape_cast %258 : vector<1x16x144xbf16> to vector<16x144xbf16>
    %c0_259 = arith.constant 0 : index
    %c0_260 = arith.constant 0 : index
    %260 = vector.load %arg10[%c0_259, %c0_260] : memref<144x256xbf16, #tpu.memory_space<vmem>>, vector<144x256xbf16>
    %cst_261 = arith.constant dense<0.000000e+00> : vector<16x256xf32>
    %261 = tpu.matmul %259, %260, %cst_261 {dimension_numbers = #tpu.dot_dimension_numbers<[1], [0], [0], [1], [0, 0, 1, 1], [], []>} : vector<16x144xbf16>, vector<144x256xbf16>, vector<16x256xf32> -> vector<16x256xf32>
    %c4_262 = arith.constant 4 : index
    %c0_263 = arith.constant 0 : index
    %c0_264 = arith.constant 0 : index
    %262 = vector.load %arg3[%c4_262, %c0_263, %c0_264] : memref<5x16x1xf32, #tpu.memory_space<vmem>>, vector<1x16x1xf32>
    %263 = vector.shape_cast %262 : vector<1x16x1xf32> to vector<16x1xf32>
    %264 = vector.broadcast %263 : vector<16x1xf32> to vector<16x256xf32>
    %265 = arith.addf %261, %264 : vector<16x256xf32>
    %266 = arith.addf %265, %27 : vector<16x256xf32>
    %267 = vector.shape_cast %266 : vector<16x256xf32> to vector<1x16x256xf32>
    %c0_265 = arith.constant 0 : index
    %c0_266 = arith.constant 0 : index
    %c0_267 = arith.constant 0 : index
    %268 = vector.load %arg8[%c0_265, %c0_266, %c0_267] : memref<1x16x256xf32, #tpu.memory_space<vmem>>, vector<1x16x256xf32>
    tpu.vector_store %arg8[%c0_265, %c0_266, %c0_267], %267 {strides = array<i32>} : memref<1x16x256xf32, #tpu.memory_space<vmem>>, vector<1x16x256xf32>,
    return
  }
  func.func @transform_0(%arg0: i32) -> (i32, i32, i32) {
    %c0_i32 = arith.constant 0 : i32
    %c0_i32_0 = arith.constant 0 : i32
    %c0_i32_1 = arith.constant 0 : i32
    return %arg0, %c0_i32, %c0_i32_0 : i32, i32, i32
  }
  func.func @transform_1(%arg0: i32) -> (i32, i32, i32) {
    %c0_i32 = arith.constant 0 : i32
    %c0_i32_0 = arith.constant 0 : i32
    %c0_i32_1 = arith.constant 0 : i32
    %c0_i32_2 = arith.constant 0 : i32
    return %c0_i32, %c0_i32_0, %c0_i32_1 : i32, i32, i32
  }
  func.func @transform_2(%arg0: i32) -> (i32, i32, i32) {
    %c0_i32 = arith.constant 0 : i32
    %c0_i32_0 = arith.constant 0 : i32
    %c0_i32_1 = arith.constant 0 : i32
    %c0_i32_2 = arith.constant 0 : i32
    return %c0_i32, %c0_i32_0, %c0_i32_1 : i32, i32, i32
  }
  func.func @transform_3(%arg0: i32) -> (i32, i32, i32) {
    %c0_i32 = arith.constant 0 : i32
    %c0_i32_0 = arith.constant 0 : i32
    %c0_i32_1 = arith.constant 0 : i32
    %c0_i32_2 = arith.constant 0 : i32
    return %c0_i32, %c0_i32_0, %c0_i32_1 : i32, i32, i32
  }
  func.func @transform_4(%arg0: i32) -> (i32, i32, i32) {
    %c0_i32 = arith.constant 0 : i32
    %c0_i32_0 = arith.constant 0 : i32
    %c0_i32_1 = arith.constant 0 : i32
    %c0_i32_2 = arith.constant 0 : i32
    return %c0_i32, %c0_i32_0, %c0_i32_1 : i32, i32, i32
  }
  func.func @transform_5(%arg0: i32) -> (i32, i32, i32) {
    %c0_i32 = arith.constant 0 : i32
    %c0_i32_0 = arith.constant 0 : i32
    %c0_i32_1 = arith.constant 0 : i32
    %c0_i32_2 = arith.constant 0 : i32
    return %c0_i32, %c0_i32_0, %c0_i32_1 : i32, i32, i32
  }
  func.func @transform_6(%arg0: i32) -> (i32, i32, i32) {
    %c0_i32 = arith.constant 0 : i32
    %c0_i32_0 = arith.constant 0 : i32
    %c0_i32_1 = arith.constant 0 : i32
    %c0_i32_2 = arith.constant 0 : i32
    return %c0_i32, %c0_i32_0, %c0_i32_1 : i32, i32, i32
  }
  func.func @transform_7(%arg0: i32) -> (i32, i32, i32) {
    %c0_i32 = arith.constant 0 : i32
    %c0_i32_0 = arith.constant 0 : i32
    %c0_i32_1 = arith.constant 0 : i32
    return %arg0, %c0_i32, %c0_i32_0 : i32, i32, i32
  }
}

</mosaic_0001>

<bundles_post_ra>
// kernel: residual_group_forward.1
= control target key start
LH: loop header
LB: loop body
LE: loop exit
PB: predicated region body
PF: predicated region fallthrough
CT: control target
= control target key end

     0   :  { %s3205_s24 = smov 0   ;;  %s4208_s0 = inlined_call_operand.vmem [shape: f32[2,16,256], index: 0, kind: input, shape index: {}]   ;;  %s4209_s1 = inlined_call_operand.vmem [shape: bf16[5,16,144], index: 1, kind: input, shape index: {}]   ;;  %s4210_s2 = inlined_call_operand.vmem [shape: f32[5,16,1], index: 2, kind: input, shape index: {}]   ;;  %s4211_s3 = inlined_call_operand.vmem [shape: f32[2,16,4], index: 3, kind: input, shape index: {}]   ;;  %s4212_s4 = inlined_call_operand.vmem [shape: f32[2,1,4], index: 4, kind: input, shape index: {}]   ;;  %s4213_s5 = inlined_call_operand.vmem [shape: f32[2,16,4], index: 5, kind: input, shape index: {}]   ;;  %s4214_s6 = inlined_call_operand.vmem [shape: f32[2,16,1], index: 6, kind: input, shape index: {}]   ;;  %s4215_s7 = inlined_call_operand.vmem [shape: f32[2,16,256], index: 7, kind: output, shape index: {}]  }
   0x1 LB: > { %s2815_s25 = sadd.s32 4294967295, %s3154_s24   ;;  %p2819_p0 = scmp.ge.s32.totalorder %s3154_s24, 1  ;;  %s3154_s24 = sphi %s3205_s24, %s17_s24  }
   0x2   : > { %p237_p1 = scmp.lt.s32.totalorder %s3154_s24, 3 }
   0x4   : > { %p238_p2 = pnand %p2819_p0, %p237_p1 }
   0x5   : > { %p269_p3 = scmp.lt.s32.totalorder (!%p238_p2), %s2815_s25, 1  ;;  %s3157_s30 = smov (!%p238_p2), 15  }
   0x6   : > { %241 = sbr.rel (%p238_p2) target bundleno = 2978 (0xba2), region = 48  ;;  %s3158_s8 = smov (!%p238_p2), 127  }
   0x7   : > { %s3159_s9 = smov (!%p238_p2), 1   ;;  %s3160_s10 = smov (!%p238_p2), 113  }
   0x8   : > { %s3161_s11 = smov (!%p238_p2), 111   ;;  %s3162_s12 = smov (!%p238_p2), 17  }
   0x9   : > { %s3163_s13 = smov (!%p238_p2), 112   ;;  %s3164_s14 = smov (!%p238_p2), 16  }
   0xb   : > { %v286_v0 = vlaneseq  ;;  %v3156_v1 = vmov 0   ;;  %s4310_s25 = smov (!%p269_p3, %s2815_s25), 1  ;;  %vm4223_vm7 = vcmask 121856   ;;  %vm4224_vm11 = vcmask 7168  }
   0xc   : > { %282 = vst [vmem:[#allocation2] sm:$0xf] %v3156_v1  ;;  %283 = vst [vmem:[#allocation2 + $0x10] sm:$0xf] %v3156_v1  ;;  %3017 = vset.pattern.permute.xlu0 %v3156_v1  ;;  %3018 = vset.pattern.permute.xlu1 %v3156_v1  ;;  %s2968_s26 = sshll.u32 %s4310_s25, 5  ;;  %vm368_vm13 = vcmask 1043456  }
   0xd   : > { %284 = vst [vmem:[#allocation2 + $0xc] sm:$0xf] %v3156_v1  ;;  %285 = vst [vmem:[#allocation2 + $0x1c] sm:$0xf] %v3156_v1  ;;  %v287_v2 = vand.u32 127, %v286_v0  ;;  %s3230_s29 = scalar_lea.vmem %s4208_s0, %s2968_s26  ;;  %vm4216_vm14 = vcmask 916480   ;;  %s278_s22 = scalar_lea.vmem %s4215_s7, %s2968_s26 }
   0xe   : > { %v3233_v8 = vld [vmem:[%s3230_s29] sm:$0xff]  ;;  %v3236_v9 = vld [vmem:[%s3230_s29 + $0x8] sm:$0xff]  ;;  %v3247_v12 = vld [vmem:[%s3230_s29 + $0x10] sm:$0xff] }
   0xf   : > { %v288_v3 = vadd.s32 128, %v287_v2  ;;  %v293_v4 = vand.u32 15, %v287_v2  ;;  %v3244_v11 = vpack.c.bf16 %v3236_v9, %v3233_v8  ;;  %v3250_v13 = vld [vmem:[%s3230_s29 + $0x18] sm:$0xff] }
  0x10   : > { %v3256_v14 = vpack.c.bf16 %v3250_v13, %v3247_v12 }
  0x11   : > { %v300_v5 = vand.u32 15, %v288_v3  ;;  %vm313_vm0 = vcmp.ge.s32.totalorder %v293_v4, 1  ;;  %vm3216_vm1 = vcmp.lt.s32.totalorder %v293_v4, 15  ;;  %333 = vst [vmem:[#allocation2 + $0x4] sm:$0xff] %v3244_v11 }
  0x12   : > { %334 = vst [vmem:[#allocation2 + $0x14] sm:$0xff] %v3256_v14 }
  0x13   : > { %vm314_vm2 = vcmp.ge.s32.totalorder %v300_v5, 1  ;;  %vm3221_vm3 = vcmp.lt.s32.totalorder %v300_v5, 15 }
  0x14   : > { %vm339_vm4 = vmpackc.low %vm314_vm2, %vm313_vm0  ;;  %v570_v16 = vld [vmem:[#allocation2 + $0xc] sm:$0xf]  ;;  %v572_v17 = vld [vmem:[#allocation2 + $0x1c] sm:$0xf]  ;;  %vm4225_vm0 = vcmask 1039360   ;;  %vm416_vm2 = vcmask 924672  }
  0x15   : > { %v340_v10 = vsel %vm339_vm4, 65537, %v3156_v1  ;;  %vm411_vm5 = vmpackc.low %vm3221_vm3, %vm3216_vm1  ;;  %v2997_v18 = vpack.i.bf16 %v572_v17, %v570_v16  ;;  %v532_v23 = vld [vmem:[#allocation2 + $0xc] sm:$0xf]  ;;  %v534_v24 = vld [vmem:[#allocation2 + $0x1c] sm:$0xf]  ;;  %vm4221_vm4 = vcmask 908288  }
  0x16   : > { %535 = vrot.lane.b32.xlu0 %v340_v10, %s3157_s30  ;;  %453 = vrot.lane.b32.xlu1 %v340_v10, %s3158_s8  ;;  %v412_v15 = vsel %vm411_vm5, 65537, %v3156_v1  ;;  %v494_v29 = vld [vmem:[#allocation2 + $0xc] sm:$0xf]  ;;  %v496_v33 = vld [vmem:[#allocation2 + $0x1c] sm:$0xf] }
  0x18   : > { %v450_v34 = vld [vmem:[#allocation2 + $0x8] sm:$0xf]  ;;  %v378_v3 = vld [vmem:[#allocation2] sm:$0xff] }
  0x19   : > { %v452_v44 = vld [vmem:[#allocation2 + $0x18] sm:$0xf]  ;;  %v408_v49 = vld [vmem:[#allocation2 + $0x8] sm:$0xf] }
  0x1a   : > { %497 = vrot.lane.b32.xlu0 %v412_v15, %s3159_s9  ;;  %413 = vrot.lane.b32.xlu1 %v412_v15, %s3160_s10  ;;  %v410_v16 = vld [vmem:[#allocation2 + $0x18] sm:$0xf] }
  0x1e   : > { %341 = vrot.lane.b32.xlu0 %v340_v10, %s3161_s11  ;;  %602 = vrot.lane.b32.xlu1 %v412_v15, %s3162_s12  ;;  %v380_v15 = vld [vmem:[#allocation2 + $0x10] sm:$0xff] }
  0x22   : > { %577 = vrot.lane.b32.xlu0 %v3244_v11, %s3163_s13  ;;  %2998 = vrot.lane.b32.xlu1 %v2997_v18, %s3163_s13 }
  0x26   : > { %581 = vrot.lane.b32.xlu0 %v3256_v14, %s3163_s13 }
  0x88   : > { %v536_v19 = vpop.permute.xlu0 %535  ;;  %v3269_v20 = vpop.permute.xlu1 %453 }
  0x89   : > { %v537_v21 = vrot.slane %v536_v19, 4  ;;  %v455_v22 = vrot.slane %v3269_v20, 4 }
  0x8b   : > { %vm3272_vm6 = vcmp.ne.s16.totalorder %v537_v21, 0  ;;  %vm3282_vm8 = vcmp.ne.s16.totalorder %v455_v22, 0  ;;  %v3294_v37 = vsel %vm4223_vm7, %v537_v21, %v536_v19  ;;  %v3345_v7 = vsel %vm4225_vm0, %v455_v22, %v3269_v20  ;;  %v379_v20 = vld [vmem:[#allocation2 + $0x8] sm:$0xf] }
  0x8c   : > { %v498_v26 = vpop.permute.xlu0 %497  ;;  %v542_v27 = vsel %vm3272_vm6, %v532_v23, 0  ;;  %v544_v28 = vsel %vm3272_vm6, %v534_v24, 0  ;;  %v3286_v35 = vpop.permute.xlu1 %413  ;;  %v461_v40 = vsel %vm3282_vm8, %v450_v34, 0  ;;  %vm4218_vm10 = vcmp.ne.s16.totalorder %v3294_v37, 0  ;;  %v381_v23 = vld [vmem:[#allocation2 + $0x18] sm:$0xf] }
  0x8d   : > { %v499_v30 = vrot.slane %v498_v26, 4  ;;  %v3002_v32 = vpack.i.bf16 %v544_v28, %v542_v27  ;;  %v415_v43 = vrot.slane %v3286_v35, 4  ;;  %v463_v46 = vsel %vm3282_vm8, %v452_v44, 0  ;;  %v599_v34 = vld [vmem:[#allocation2 + $0xc] sm:$0xf]  ;;  %v2943_v24 = vld [vmem:[%s4210_s2 + $0x40] sm:$0xff] }
  0x8e   : > { %v541_v51 = vsel %vm4218_vm10, %v3244_v11, 0  ;;  %v543_v59 = vsel %vm4218_vm10, %v3256_v14, 0  ;;  %vm4217_vm1 = vcmp.ne.s16.totalorder %v3345_v7, 0  ;;  %vm4222_vm10 = vcmask 138240  }
  0x8f   : > { %vm3288_vm9 = vcmp.ne.s16.totalorder %v499_v30, 0  ;;  %3003 = vrot.lane.b32.xlu0 %v3002_v32, %s3160_s10  ;;  %vm3312_vm12 = vcmp.ne.s16.totalorder %v415_v43, 0  ;;  %v3322_v52 = vsel %vm4224_vm11, %v499_v30, %v498_v26  ;;  %v460_v18 = vsel %vm4217_vm1, %v378_v3, 0  ;;  %v336_v26 = vld [vmem:[#allocation2 + $0x8] sm:$0xf] }
  0x90   : > { %v504_v38 = vsel %vm3288_vm9, %v494_v29, 0  ;;  %v506_v39 = vsel %vm3288_vm9, %v496_v33, 0  ;;  %v3302_v41 = vpop.permute.xlu0 %341  ;;  %v3305_v45 = vpop.permute.xlu1 %602  ;;  %v421_v53 = vsel %vm3312_vm12, %v408_v49, 0  ;;  %vm501_vm15 = vcmp.ne.s16.totalorder %v3322_v52, 0  ;;  %v338_v32 = vld [vmem:[#allocation2 + $0x18] sm:$0xf] }
  0x91   : > { %v3007_v42 = vpack.i.bf16 %v506_v39, %v504_v38  ;;  %v503_v2 = vsel %vm501_vm15, %v3244_v11, 0  ;;  %v505_v10 = vsel %vm501_vm15, %v3256_v14, 0  ;;  %v423_v17 = vsel %vm3312_vm12, %v410_v16, 0  ;;  %v1025_v49 = vld [vmem:[#allocation2 + $0xc] sm:$0xf] }
  0x92   : > { %v3361_v19 = vsel %vm416_vm2, %v415_v43, %v3286_v35  ;;  %v343_v21 = vrot.slane %v3302_v41, 4  ;;  %v462_v22 = vsel %vm4217_vm1, %v380_v15, 0  ;;  %v604_v27 = vrot.slane %v3305_v45, 4  ;;  %v601_v35 = vld [vmem:[#allocation2 + $0x1c] sm:$0xf] }
  0x93   : > { %3008 = vrot.lane.b32.xlu1 %v3007_v42, %s3158_s8  ;;  %470 = vrot.lane.b32.xlu0 %v461_v40, %s3159_s9  ;;  %vm4219_vm3 = vcmp.ne.s16.totalorder %v3361_v19, 0  ;;  %v3111_v33 = vld [vmem:[%s4209_s1 + $0x44] ss:$8 sps:$4 sm:$0xff]  }
  0x94   : > { %v578_v47 = vpop.permute.xlu0 %577  ;;  %v2999_v50 = vpop.permute.xlu1 %2998  ;;  %vm3369_vm5 = vcmp.ne.s16.totalorder %v343_v21, 0  ;;  %v420_v28 = vsel %vm4219_vm3, %v378_v3, 0  ;;  %v3380_v29 = vsel %vm4221_vm4, %v343_v21, %v3302_v41  ;;  %v422_v38 = vsel %vm4219_vm3, %v380_v15, 0 }
  0x95   : > { %v3001_v54 = vunpack.i.h.bf16 %v2999_v50  ;;  %v585_v56 = vrot.slane %v578_v47, 4  ;;  %v3000_v57 = vunpack.i.l.bf16 %v2999_v50  ;;  %v349_v30 = vsel %vm3369_vm5, %v336_v26, 0  ;;  %v1027_v50 = vld [vmem:[#allocation2 + $0x1c] sm:$0xf] }
  0x96   : > { %vm4220_vm1 = vcmp.ne.s16.totalorder %v3380_v29, 0  ;;  %v351_v39 = vsel %vm3369_vm5, %v338_v32, 0  ;;  %v3405_v44 = vsel %vm4222_vm10, %v604_v27, %v3305_v45 }
  0x97   : > { %549 = vrot.lane.b32.xlu1 %v541_v51, %s3160_s10  ;;  %474 = vrot.lane.b32.xlu0 %v463_v46, %s3159_s9  ;;  %v588_v60 = vrot.slane %v3001_v54, 4  ;;  %v586_v61 = vrot.slane %v3000_v57, 4  ;;  %v348_v42 = vsel %vm4220_vm1, %v378_v3, 0  ;;  %v350_v46 = vsel %vm4220_vm1, %v380_v15, 0  ;;  %v963_v54 = vld [vmem:[#allocation2 + $0x1c] sm:$0xf] }
  0x98   : > { %v582_v55 = vpop.permute.xlu0 %581  ;;  %vm606_vm3 = vcmp.ne.s16.totalorder %v3405_v44, 0  ;;  %v3019_v51 = vpack.i.bf16 %v1027_v50, %v1025_v49  ;;  %vm399_vm1 = vcmask 130048  }
  0x99   : > { %v587_v58 = vrot.slane %v582_v55, 4  ;;  %v589_v63 = vsel %vm368_vm13, %v585_v56, %v586_v61  ;;  %v608_v45 = vsel %vm606_vm3, %v3244_v11, 0  ;;  %v610_v56 = vsel %vm606_vm3, %v3256_v14, 0 }
  0x9a   : > { %v591_v4 = vsel %vm4216_vm14, %v578_v47, %v589_v63  ;;  %v656_v47 = vld [vmem:[%s4210_s2] sm:$0xff]  ;;  %v967_v11 = vsel %vm3288_vm9, %v963_v54, 0 }
  0x9b   : > { %553 = vrot.lane.b32.xlu1 %v543_v59, %s3160_s10  ;;  %430 = vrot.lane.b32.xlu0 %v421_v53, %s3157_s30  ;;  %v592_v62 = vsel %vm368_vm13, %v587_v58, %v588_v60  ;;  %v961_v53 = vld [vmem:[#allocation2 + $0xc] sm:$0xf]  ;;  %v995_v59 = vld [vmem:[#allocation2 + $0x1c] sm:$0xf] }
  0x9c   : > { %v593_v1 = vsel %vm4216_vm14, %v582_v55, %v592_v62  ;;  %vm3384_vm14 = vcmp.ne.s16.totalorder %v604_v27, 0  ;;  %v3101_v55 = vld [vmem:[%s4209_s1 + $0x4] ss:$8 sps:$4 sm:$0xff]   ;;  %v965_v57 = vsel %vm3288_vm9, %v961_v53, 0  ;;  %v999_v62 = vsel %vm3272_vm6, %v995_v59, 0 }
  0x9d   : > { %v2843_v5 = vcombine.high %v591_v4, %v593_v1  ;;  %v2842_v6 = vcombine.low %v591_v4, %v593_v1  ;;  %v609_v40 = vsel %vm3384_vm14, %v599_v34, 0  ;;  %v611_v41 = vsel %vm3384_vm14, %v601_v35, 0  ;;  %v993_v58 = vld [vmem:[#allocation2 + $0xc] sm:$0xf]  ;;  %2846 = vmatprep.mubr.msk.bf16.mxu0 %vm399_vm1, %v3101_v55 }
  0x9e   : > { %v3012_v43 = vpack.i.bf16 %v611_v41, %v609_v40  ;;  %v657_v60 = vld [vmem:[%s4210_s2 + $0x8] sm:$0xff]  ;;  %v3029_v14 = vpack.i.bf16 %v967_v11, %v965_v57  ;;  %v997_v61 = vsel %vm3272_vm6, %v993_v58, 0  ;;  %v3138_v57 = vpack.c.bf16 %v3250_v13, %v3236_v9 }
  0x9f   : > { %511 = vrot.lane.b32.xlu0 %v503_v2, %s3158_s8  ;;  %386 = vrot.lane.b32.xlu1 %v378_v3, %s3164_s14  ;;  %v3024_v63 = vpack.i.bf16 %v999_v62, %v997_v61 }
  0xa0   : > { %771 = vmatprep.subr.bf16.mxu0 %v2843_v5 }
  0xa1   : > { %772 = vmatpush1.bf16.msra.mxu0 %v2842_v6 }
  0xa3   : > { %515 = vrot.lane.b32.xlu0 %v505_v10, %s3158_s8  ;;  %390 = vrot.lane.b32.xlu1 %v380_v15, %s3164_s14 }
  0xa7   : > { %434 = vrot.lane.b32.xlu0 %v423_v17, %s3157_s30  ;;  %468 = vrot.lane.b32.xlu1 %v460_v18, %s3159_s9 }
  0xab   : > { %388 = vrot.lane.b32.xlu0 %v379_v20, %s3164_s14  ;;  %472 = vrot.lane.b32.xlu1 %v462_v22, %s3159_s9 }
  0xaf   : > { %392 = vrot.lane.b32.xlu0 %v381_v23, %s3164_s14  ;;  %428 = vrot.lane.b32.xlu1 %v420_v28, %s3157_s30 }
  0xb3   : > { %432 = vrot.lane.b32.xlu1 %v422_v38, %s3157_s30  ;;  %358 = vrot.lane.b32.xlu0 %v349_v30, %s3162_s12 }
  0xb7   : > { %362 = vrot.lane.b32.xlu0 %v351_v39, %s3162_s12  ;;  %356 = vrot.lane.b32.xlu1 %v348_v42, %s3162_s12 }
  0xbb   : > { %3013 = vrot.lane.b32.xlu0 %v3012_v43, %s3161_s11  ;;  %360 = vrot.lane.b32.xlu1 %v350_v46, %s3162_s12 }
  0xbf   : > { %660 = vperm.xlu0 %3017, %v656_v47   ;;  %616 = vrot.lane.b32.xlu1 %v608_v45, %s3161_s11 }
  0xc3   : > { %3020 = vrot.lane.b32.xlu0 %v3019_v51, %s3163_s13  ;;  %620 = vrot.lane.b32.xlu1 %v610_v56, %s3161_s11 }
  0xc7   : > { %3030 = vrot.lane.b32.xlu0 %v3029_v14, %s3158_s8  ;;  %665 = vperm.xlu1 %3018, %v657_v60   ;;  %v3139_v60 = vpack.c.bf16 %v3247_v12, %v3233_v8 }
  0xcb   : > { %3025 = vrot.lane.b32.xlu1 %v3024_v63, %s3160_s10 }
 0x101   : > { %v3004_v1 = vpop.permute.xlu0 %3003 }
 0x102   : > { %v3005_v4 = vunpack.i.l.bf16 %v3004_v1  ;;  %v3006_v10 = vunpack.i.h.bf16 %v3004_v1 }
 0x104   : > { %v558_v16 = vrot.slane %v3005_v4, 4  ;;  %v560_v20 = vrot.slane %v3006_v10, 4 }
 0x105   : > { %v3009_v2 = vpop.permute.xlu1 %3008  ;;  %v471_v3 = vpop.permute.xlu0 %470 }
 0x106   : > { %v3010_v23 = vunpack.i.l.bf16 %v3009_v2  ;;  %v3011_v34 = vunpack.i.h.bf16 %v3009_v2  ;;  %v477_v11 = vrot.slane %v471_v3, 4 }
 0x108   : > { %v520_v40 = vrot.slane %v3010_v23, 4  ;;  %v522_v43 = vrot.slane %v3011_v34, 4 }
 0x109   : > { %v550_v5 = vpop.permute.xlu1 %549  ;;  %v475_v6 = vpop.permute.xlu0 %474 }
 0x10a   : > { %v557_v15 = vrot.slane %v550_v5, 4  ;;  %v479_v14 = vrot.slane %v475_v6, 4 }
 0x10c   : > { %v561_v21 = vsel %vm368_vm13, %v557_v15, %v558_v16 }
 0x10d   : > { %v554_v17 = vpop.permute.xlu1 %553  ;;  %v3441_v18 = vpop.permute.xlu0 %430  ;;  %v562_v27 = vsel %vm416_vm2, %v550_v5, %v561_v21 }
 0x10e   : > { %v559_v22 = vrot.slane %v554_v17, 4  ;;  %v437_v8 = vrot.slane %v3441_v18, 4 }
 0x110   : > { %v563_v26 = vsel %vm368_vm13, %v559_v22, %v560_v20 }
 0x111   : > { %v564_v28 = vsel %vm416_vm2, %v554_v17, %v563_v26  ;;  %v512_v30 = vpop.permute.xlu0 %511  ;;  %v3447_v32 = vpop.permute.xlu1 %386 }
 0x112   : > { %v519_v35 = vrot.slane %v512_v30, 4  ;;  %v2841_v38 = vcombine.high %v562_v27, %v564_v28  ;;  %v2840_v39 = vcombine.low %v562_v27, %v564_v28  ;;  %v394_v15 = vrot.slane %v3447_v32, 4 }
 0x114   : > { %773 = vmatprep.subr.bf16.mxu0 %v2841_v38  ;;  %v523_v46 = vsel %vm368_vm13, %v519_v35, %v520_v40 }
 0x115   : > { %774 = vmatpush1.bf16.msra.mxu0 %v2840_v39  ;;  %v516_v41 = vpop.permute.xlu0 %515  ;;  %v391_v42 = vpop.permute.xlu1 %390  ;;  %v524_v50 = vsel %vm4225_vm0, %v512_v30, %v523_v46 }
 0x116   : > { %v521_v47 = vrot.slane %v516_v41, 4  ;;  %v396_v12 = vrot.slane %v391_v42, 4 }
 0x118   : > { %v525_v49 = vsel %vm368_vm13, %v521_v47, %v522_v43 }
 0x119   : > { %v526_v45 = vsel %vm4225_vm0, %v516_v41, %v525_v49  ;;  %v435_v51 = vpop.permute.xlu0 %434  ;;  %v469_v53 = vpop.permute.xlu1 %468 }
 0x11a   : > { %v476_v54 = vrot.slane %v469_v53, 4  ;;  %v2839_v55 = vcombine.high %v524_v50, %v526_v45  ;;  %v2838_v56 = vcombine.low %v524_v50, %v526_v45  ;;  %v439_v20 = vrot.slane %v435_v51, 4 }
 0x11c   : > { %775 = vmatprep.subr.bf16.mxu0 %v2839_v55  ;;  %v480_v61 = vsel %vm368_vm13, %v476_v54, %v477_v11 }
 0x11d   : > { %776 = vmatpush1.bf16.msra.mxu0 %v2838_v56  ;;  %v389_v58 = vpop.permute.xlu0 %388  ;;  %v473_v59 = vpop.permute.xlu1 %472  ;;  %v482_v1 = vsel %vm4224_vm11, %v469_v53, %v480_v61 }
 0x11e   : > { %v478_v62 = vrot.slane %v473_v59, 4  ;;  %777 = vmatprep.subr.bf16.mxu0 %v3138_v57  ;;  %v395_v6 = vrot.slane %v389_v58, 4 }
 0x120   : > { %v483_v63 = vsel %vm368_vm13, %v478_v62, %v479_v14  ;;  %v398_v26 = vsel %vm368_vm13, %v394_v15, %v395_v6 }
 0x121   : > { %v484_v2 = vsel %vm4224_vm11, %v473_v59, %v483_v63  ;;  %778 = vmatpush1.bf16.msra.mxu0 %v3139_v60  ;;  %v393_v9 = vpop.permute.xlu0 %392  ;;  %v429_v13 = vpop.permute.xlu1 %428  ;;  %v400_v43 = vsel %vm399_vm1, %v3447_v32, %v398_v26 }
 0x122   : > { %v397_v3 = vrot.slane %v393_v9, 4  ;;  %v436_v4 = vrot.slane %v429_v13, 4  ;;  %v2835_v5 = vcombine.high %v482_v1, %v484_v2  ;;  %v2834_v10 = vcombine.low %v482_v1, %v484_v2 }
 0x124   : > { %779 = vmatprep.subr.bf16.mxu0 %v2835_v5  ;;  %v401_v21 = vsel %vm368_vm13, %v396_v12, %v397_v3  ;;  %v440_v22 = vsel %vm368_vm13, %v436_v4, %v437_v8  ;;  %v3099_v4 = vld [vmem:[%s4209_s1] ss:$8 sps:$4 sm:$0xff]  }
 0x125   : > { %780 = vmatpush1.bf16.msra.mxu0 %v2834_v10  ;;  %v433_v16 = vpop.permute.xlu1 %432  ;;  %v359_v17 = vpop.permute.xlu0 %358  ;;  %v442_v18 = vsel %vm4223_vm7, %v429_v13, %v440_v22  ;;  %v402_v35 = vsel %vm399_vm1, %v391_v42, %v401_v21 }
 0x126   : > { %v438_v23 = vrot.slane %v433_v16, 4  ;;  %v365_v38 = vrot.slane %v359_v17, 4  ;;  %v2831_v46 = vcombine.high %v400_v43, %v402_v35  ;;  %v2830_v54 = vcombine.low %v400_v43, %v402_v35 }
 0x128   : > { %v443_v27 = vsel %vm368_vm13, %v438_v23, %v439_v20 }
 0x129   : > { %v444_v28 = vsel %vm4223_vm7, %v433_v16, %v443_v27  ;;  %v363_v30 = vpop.permute.xlu0 %362  ;;  %v357_v34 = vpop.permute.xlu1 %356  ;;  %vm4244_vm7 = vcmp.ne.s16.totalorder %v3361_v19, 0 }
 0x12a   : > { %v364_v39 = vrot.slane %v357_v34, 4  ;;  %v2833_v40 = vcombine.high %v442_v18, %v444_v28  ;;  %v2832_v41 = vcombine.low %v442_v18, %v444_v28  ;;  %v367_v50 = vrot.slane %v363_v30, 4 }
 0x12c   : > { %781 = vmatprep.subr.bf16.mxu0 %v2833_v40  ;;  %v369_v45 = vsel %vm368_vm13, %v364_v39, %v365_v38 }
 0x12d   : > { %782 = vmatpush1.bf16.msra.mxu0 %v2832_v41  ;;  %v361_v47 = vpop.permute.xlu1 %360  ;;  %v3014_v49 = vpop.permute.xlu0 %3013  ;;  %v371_v56 = vsel %vm4222_vm10, %v357_v34, %v369_v45 }
 0x12e   : > { %v366_v51 = vrot.slane %v361_v47, 4  ;;  %783 = vmatprep.subr.bf16.mxu0 %v2831_v46  ;;  %v3015_v53 = vunpack.i.l.bf16 %v3014_v49  ;;  %v3016_v55 = vunpack.i.h.bf16 %v3014_v49 }
 0x130   : > { %v372_v42 = vsel %vm368_vm13, %v366_v51, %v367_v50  ;;  %v625_v11 = vrot.slane %v3015_v53, 4  ;;  %v627_v14 = vrot.slane %v3016_v55, 4 }
 0x131   : > { %v373_v57 = vsel %vm4222_vm10, %v361_v47, %v372_v42  ;;  %784 = vmatpush1.bf16.msra.mxu0 %v2830_v54  ;;  %v617_v32 = vpop.permute.xlu1 %616  ;;  %vm4243_vm10 = vcmp.ne.s16.totalorder %v3345_v7, 0 }
 0x132   : > { %v624_v58 = vrot.slane %v617_v32, 4  ;;  %v2829_v59 = vcombine.high %v371_v56, %v373_v57  ;;  %v2828_v60 = vcombine.low %v371_v56, %v373_v57 }
 0x134   : > { %785 = vmatprep.subr.bf16.mxu0 %v2829_v59  ;;  %v628_v62 = vsel %vm368_vm13, %v624_v58, %v625_v11 }
 0x135   : > { %786 = vmatpush1.bf16.msra.mxu0 %v2828_v60  ;;  %v621_v61 = vpop.permute.xlu1 %620  ;;  %v629_v2 = vsel %vm4221_vm4, %v617_v32, %v628_v62  ;;  %v1055_v62 = vld [vmem:[#allocation2 + $0x1c] sm:$0xf] }
 0x136   : > { %v626_v63 = vrot.slane %v621_v61, 4 }
 0x138   : > { %v630_v1 = vsel %vm368_vm13, %v626_v63, %v627_v14 }
 0x139   : > { %v631_v9 = vsel %vm4221_vm4, %v621_v61, %v630_v1  ;;  %vm4242_vm4 = vcmp.ne.s16.totalorder %v3294_v37, 0  ;;  %v1053_v61 = vld [vmem:[#allocation2 + $0xc] sm:$0xf] }
 0x13a   : > { %v2845_v13 = vcombine.high %v629_v2, %v631_v9  ;;  %v2844_v3 = vcombine.low %v629_v2, %v631_v9  ;;  %v661_v5 = vpop.permute.xlu0 %660  ;;  %v1057_v2 = vsel %vm3384_vm14, %v1053_v61, 0  ;;  %v1059_v9 = vsel %vm3384_vm14, %v1055_v62, 0 }
 0x13c   : > { %801 = vmatprep.subr.bf16.mxu0 %v2845_v13 }
 0x13d   : > { %802 = vmatpush2.bf16.msra.mxu0 %v2844_v3  ;;  %v3034_v3 = vpack.i.bf16 %v1059_v9, %v1057_v2 }
 0x140   : > { %804 = vmatmul.mubr.bf16.vlgmr.msra.gmra.mxu0 %v3099_v4  ;;  %v2851_v4 = vld [vmem:[%s4210_s2 + $0x10] sm:$0xff] }
 0x142   : > { %v666_v15 = vpop.permute.xlu1 %665 }
 0x200   : > { %v805_v10 = vpop.f32.mrf.mxu0 }
 0x201   : > { %v806_v8 = vadd.f32 %v805_v10, %v661_v5  ;;  %v3104_v10 = vld [vmem:[%s4209_s1 + $0x14] ss:$8 sps:$4 sm:$0xff]  }
 0x202   : > { %v807_v12 = vpop.f32.mrf.mxu0  ;;  %2873 = vmatprep.mubr.msk.bf16.mxu1 %vm399_vm1, %v3104_v10 }
 0x203   : > { %v808_v6 = vadd.f32 %v807_v12, %v661_v5  ;;  %v814_v17 = vmax.f32 %v806_v8, 0.0  ;;  %v2852_v8 = vld [vmem:[%s4210_s2 + $0x18] sm:$0xff]  ;;  %v3026_v12 = vpop.permute.xlu1 %3025 }
 0x204   : > { %v809_v16 = vpop.f32.mrf.mxu0 }
 0x205   : > { %v815_v20 = vmax.f32 %v808_v6, 0.0  ;;  %v810_v21 = vadd.f32 %v809_v16, %v666_v15  ;;  %v3021_v6 = vpop.permute.xlu0 %3020 }
 0x206   : > { %v811_v22 = vpop.f32.mrf.mxu0 }
 0x207   : > { %v2972_v23 = vpack.c.bf16 %v815_v20, %v814_v17  ;;  %v812_v26 = vadd.f32 %v811_v22, %v666_v15  ;;  %v816_v27 = vmax.f32 %v810_v21, 0.0  ;;  %v3022_v22 = vunpack.i.l.bf16 %v3021_v6 }
 0x209   : > { %830 = vst [vmem:[#allocation2 + $0x4] sm:$0xff] %v2972_v23  ;;  %v817_v18 = vmax.f32 %v812_v26, 0.0  ;;  %1032 = vrot.lane.b32.xlu1 %v2972_v23, %s3163_s13  ;;  %v964_v30 = vsel %vm501_vm15, %v2972_v23, 0  ;;  %v3489_v35 = vpack.c.bf16 %v816_v27, %v814_v17  ;;  %v996_v43 = vsel %vm4242_vm4, %v2972_v23, 0  ;;  %v3031_v16 = vpop.permute.xlu0 %3030 }
 0x20a   : > { %v1056_v63 = vsel %vm606_vm3, %v2972_v23, 0 }
 0x20b   : > { %v2973_v28 = vpack.c.bf16 %v817_v18, %v816_v27  ;;  %v3487_v34 = vpack.c.bf16 %v817_v18, %v815_v20  ;;  %v3023_v27 = vunpack.i.h.bf16 %v3021_v6  ;;  %v1041_v18 = vrot.slane %v3022_v22, 4 }
 0x20d   : > { %831 = vst [vmem:[#allocation2 + $0x14] sm:$0xff] %v2973_v28  ;;  %972 = vrot.lane.b32.xlu1 %v964_v30, %s3158_s8  ;;  %v998_v45 = vsel %vm4242_vm4, %v2973_v28, 0  ;;  %v966_v51 = vsel %vm501_vm15, %v2973_v28, 0  ;;  %vm4246_vm4 = vcmp.ne.s16.totalorder %v3361_v19, 0  ;;  %v1058_v5 = vsel %vm606_vm3, %v2973_v28, 0 }
 0x210   : > { %v864_v38 = vld [vmem:[#allocation2] sm:$0xff]  ;;  %v925_v39 = vld [vmem:[#allocation2 + $0x8] sm:$0xf] }
 0x211   : > { %872 = vrot.lane.b32.xlu0 %v864_v38, %s3164_s14  ;;  %v929_v40 = vsel %vm3282_vm8, %v925_v39, 0  ;;  %v893_v41 = vld [vmem:[#allocation2 + $0x8] sm:$0xf]  ;;  %v928_v47 = vsel %vm4243_vm10, %v864_v38, 0  ;;  %v896_v49 = vsel %vm4244_vm7, %v864_v38, 0  ;;  %vm4245_vm7 = vcmp.ne.s16.totalorder %v3380_v29, 0 }
 0x212   : > { %938 = vrot.lane.b32.xlu1 %v929_v40, %s3159_s9  ;;  %v897_v46 = vsel %vm3312_vm12, %v893_v41, 0  ;;  %v865_v50 = vld [vmem:[#allocation2 + $0x8] sm:$0xf]  ;;  %v836_v55 = vsel %vm4245_vm7, %v864_v38, 0  ;;  %v1043_v39 = vrot.slane %v3023_v27, 4 }
 0x213   : > { %v833_v58 = vld [vmem:[#allocation2 + $0x8] sm:$0xf] }
 0x214   : > { %v866_v53 = vld [vmem:[#allocation2 + $0x10] sm:$0xff]  ;;  %v867_v54 = vld [vmem:[#allocation2 + $0x18] sm:$0xf]  ;;  %v837_v60 = vsel %vm3369_vm5, %v833_v58, 0 }
 0x215   : > { %1004 = vrot.lane.b32.xlu0 %v996_v43, %s3160_s10  ;;  %v927_v42 = vld [vmem:[#allocation2 + $0x18] sm:$0xf]  ;;  %v930_v32 = vsel %vm4243_vm10, %v866_v53, 0  ;;  %v898_v59 = vsel %vm4246_vm4, %v866_v53, 0  ;;  %v838_v13 = vsel %vm4245_vm7, %v866_v53, 0  ;;  %v3027_v43 = vunpack.i.l.bf16 %v3026_v12 }
 0x216   : > { %906 = vrot.lane.b32.xlu1 %v897_v46, %s3157_s30  ;;  %v931_v56 = vsel %vm3282_vm8, %v927_v42, 0  ;;  %v895_v57 = vld [vmem:[#allocation2 + $0x18] sm:$0xf]  ;;  %v3032_v46 = vunpack.i.l.bf16 %v3031_v16  ;;  %vm4247_vm10 = vcmask 916480   ;;  %v3033_v42 = vunpack.i.h.bf16 %v3031_v16 }
 0x217   : > { %v899_v11 = vsel %vm3312_vm12, %v895_v57, 0  ;;  %v835_v14 = vld [vmem:[#allocation2 + $0x18] sm:$0xf]  ;;  %vm4248_vm4 = vmmov %vm4247_vm10  ;;  %vm4249_vm7 = vcmask 121856  }
 0x218   : > { %v839_v1 = vsel %vm3369_vm5, %v835_v14, 0  ;;  %v983_v62 = vrot.slane %v3033_v42, 4 }
 0x219   : > { %936 = vrot.lane.b32.xlu0 %v928_v47, %s3159_s9 }
 0x21a   : > { %1036 = vrot.lane.b32.xlu1 %v2973_v28, %s3163_s13 }
 0x21d   : > { %904 = vrot.lane.b32.xlu0 %v896_v49, %s3157_s30 }
 0x21e   : > { %874 = vrot.lane.b32.xlu1 %v865_v50, %s3164_s14  ;;  %v3028_v50 = vunpack.i.h.bf16 %v3026_v12 }
 0x221   : > { %1008 = vrot.lane.b32.xlu0 %v998_v45, %s3160_s10 }
 0x222   : > { %976 = vrot.lane.b32.xlu1 %v966_v51, %s3158_s8 }
 0x225   : > { %876 = vrot.lane.b32.xlu0 %v866_v53, %s3164_s14 }
 0x226   : > { %878 = vrot.lane.b32.xlu1 %v867_v54, %s3164_s14 }
 0x229   : > { %844 = vrot.lane.b32.xlu0 %v836_v55, %s3162_s12 }
 0x22a   : > { %942 = vrot.lane.b32.xlu1 %v931_v56, %s3159_s9 }
 0x22d   : > { %940 = vrot.lane.b32.xlu0 %v930_v32, %s3159_s9  ;;  %v1013_v32 = vrot.slane %v3027_v43, 4 }
 0x22e   : > { %910 = vrot.lane.b32.xlu1 %v899_v11, %s3157_s30  ;;  %v981_v11 = vrot.slane %v3032_v46, 4 }
 0x231   : > { %908 = vrot.lane.b32.xlu0 %v898_v59, %s3157_s30  ;;  %v1015_v59 = vrot.slane %v3028_v50, 4 }
 0x232   : > { %846 = vrot.lane.b32.xlu1 %v837_v60, %s3162_s12 }
 0x235   : > { %1064 = vrot.lane.b32.xlu0 %v1056_v63, %s3161_s11 }
 0x236   : > { %850 = vrot.lane.b32.xlu1 %v839_v1, %s3162_s12 }
 0x239   : > { %848 = vrot.lane.b32.xlu0 %v838_v13, %s3162_s12 }
 0x23a   : > { %3035 = vrot.lane.b32.xlu1 %v3034_v3, %s3161_s11 }
 0x23d   : > { %1068 = vrot.lane.b32.xlu0 %v1058_v5, %s3161_s11 }
 0x23e   : > { %1110 = vperm.xlu1 %3018, %v2851_v4  }
 0x241   : > { %1115 = vperm.xlu0 %3017, %v2852_v8  }
 0x27b   : > { %v1033_v15 = vpop.permute.xlu1 %1032 }
 0x27c   : > { %v1040_v28 = vrot.slane %v1033_v15, 4 }
 0x27e   : > { %v1044_v41 = vsel %vm368_vm13, %v1040_v28, %v1041_v18 }
 0x27f   : > { %v973_v17 = vpop.permute.xlu1 %972  ;;  %v1045_v53 = vsel %vm4247_vm10, %v1033_v15, %v1044_v41  ;;  %vm4250_vm10 = vmmov %vm4249_vm7 }
 0x280   : > { %v980_v55 = vrot.slane %v973_v17, 4 }
 0x282   : > { %v984_v63 = vsel %vm368_vm13, %v980_v55, %v981_v11 }
 0x283   : > { %v3562_v20 = vpop.permute.xlu0 %872  ;;  %v985_v5 = vsel %vm4225_vm0, %v973_v17, %v984_v63 }
 0x284   : > { %v3564_v21 = vpop.permute.xlu1 %938  ;;  %v880_v50 = vrot.slane %v3562_v20, 4 }
 0x285   : > { %v945_v18 = vrot.slane %v3564_v21, 4 }
 0x287   : > { %v1005_v23 = vpop.permute.xlu0 %1004 }
 0x288   : > { %v3566_v26 = vpop.permute.xlu1 %906  ;;  %v1012_v45 = vrot.slane %v1005_v23, 4 }
 0x28a   : > { %v1016_v60 = vsel %vm368_vm13, %v1012_v45, %v1013_v32 }
 0x28b   : > { %v3568_v30 = vpop.permute.xlu0 %936  ;;  %v1017_v9 = vsel %vm416_vm2, %v1005_v23, %v1016_v60 }
 0x28c   : > { %v1037_v38 = vpop.permute.xlu1 %1036  ;;  %v944_v22 = vrot.slane %v3568_v30, 4 }
 0x28d   : > { %v1042_v40 = vrot.slane %v1037_v38, 4 }
 0x28f   : > { %v3571_v47 = vpop.permute.xlu0 %904  ;;  %v1046_v49 = vsel %vm368_vm13, %v1042_v40, %v1043_v39  ;;  %v948_v40 = vsel %vm368_vm13, %v944_v22, %v945_v18 }
 0x290   : > { %v3574_v51 = vpop.permute.xlu1 %874  ;;  %v1047_v54 = vsel %vm4248_vm4, %v1037_v38, %v1046_v49  ;;  %v912_v28 = vrot.slane %v3571_v47, 4  ;;  %v913_v49 = vrot.slane %v3566_v26, 4  ;;  %v949_v55 = vsel %vm4224_vm11, %v3568_v30, %v948_v40 }
 0x291   : > { %v2870_v56 = vcombine.high %v1045_v53, %v1047_v54  ;;  %v2869_v57 = vcombine.low %v1045_v53, %v1047_v54  ;;  %v881_v45 = vrot.slane %v3574_v51, 4  ;;  %vm4251_vm4 = vcmask 138240  }
 0x292   : > { %v916_v53 = vsel %vm368_vm13, %v912_v28, %v913_v49 }
 0x293   : > { %v1009_v58 = vpop.permute.xlu0 %1008  ;;  %1220 = vmatprep.subr.bf16.mxu1 %v2870_v56  ;;  %v884_v51 = vsel %vm368_vm13, %v880_v50, %v881_v45 }
 0x294   : > { %v1014_v14 = vrot.slane %v1009_v58, 4  ;;  %1221 = vmatpush1.bf16.msra.mxu1 %v2869_v57  ;;  %v977_v61 = vpop.permute.xlu1 %976 }
 0x295   : > { %v982_v1 = vrot.slane %v977_v61, 4 }
 0x296   : > { %v1018_v2 = vsel %vm368_vm13, %v1014_v14, %v1015_v59 }
 0x297   : > { %v1019_v13 = vsel %vm416_vm2, %v1009_v58, %v1018_v2  ;;  %v877_v3 = vpop.permute.xlu0 %876  ;;  %v986_v4 = vsel %vm368_vm13, %v982_v1, %v983_v62  ;;  %v885_v1 = vsel %vm399_vm1, %v3562_v20, %v884_v51 }
 0x298   : > { %v987_v10 = vsel %vm4225_vm0, %v977_v61, %v986_v4  ;;  %v2868_v8 = vcombine.high %v1017_v9, %v1019_v13  ;;  %v879_v12 = vpop.permute.xlu1 %878  ;;  %v2867_v6 = vcombine.low %v1017_v9, %v1019_v13  ;;  %v882_v17 = vrot.slane %v877_v3, 4 }
 0x299   : > { %v2866_v15 = vcombine.high %v985_v5, %v987_v10  ;;  %v2865_v27 = vcombine.low %v985_v5, %v987_v10  ;;  %v883_v39 = vrot.slane %v879_v12, 4 }
 0x29a   : > { %1222 = vmatprep.subr.bf16.mxu1 %v2868_v8 }
 0x29b   : > { %v3586_v16 = vpop.permute.xlu0 %844  ;;  %1223 = vmatpush1.bf16.msra.mxu1 %v2867_v6  ;;  %v886_v54 = vsel %vm368_vm13, %v882_v17, %v883_v39 }
 0x29c   : > { %1224 = vmatprep.subr.bf16.mxu1 %v2866_v15  ;;  %v943_v23 = vpop.permute.xlu1 %942  ;;  %v887_v30 = vsel %vm399_vm1, %v877_v3, %v886_v54  ;;  %v852_v2 = vrot.slane %v3586_v16, 4 }
 0x29d   : > { %v947_v43 = vrot.slane %v943_v23, 4  ;;  %v2858_v9 = vcombine.high %v885_v1, %v887_v30  ;;  %v2857_v12 = vcombine.low %v885_v1, %v887_v30 }
 0x29f   : > { %v941_v38 = vpop.permute.xlu0 %940  ;;  %1225 = vmatpush1.bf16.msra.mxu1 %v2865_v27 }
 0x2a0   : > { %v946_v41 = vrot.slane %v941_v38, 4  ;;  %1226 = vmatprep.subr.bf16.mxu1 %v3487_v34  ;;  %v911_v46 = vpop.permute.xlu1 %910 }
 0x2a1   : > { %v915_v26 = vrot.slane %v911_v46, 4 }
 0x2a2   : > { %v950_v21 = vsel %vm368_vm13, %v946_v41, %v947_v43 }
 0x2a3   : > { %v909_v42 = vpop.permute.xlu0 %908  ;;  %1227 = vmatpush1.bf16.msra.mxu1 %v3489_v35  ;;  %v951_v34 = vsel %vm4224_vm11, %v941_v38, %v950_v21  ;;  %v917_v35 = vsel %vm4249_vm7, %v3571_v47, %v916_v53  ;;  %vm4252_vm7 = vmmov %vm4251_vm4 }
 0x2a4   : > { %v914_v56 = vrot.slane %v909_v42, 4  ;;  %v2862_v57 = vcombine.high %v949_v55, %v951_v34  ;;  %v847_v32 = vpop.permute.xlu1 %846  ;;  %v2861_v11 = vcombine.low %v949_v55, %v951_v34 }
 0x2a5   : > { %v853_v14 = vrot.slane %v847_v32, 4 }
 0x2a6   : > { %v918_v58 = vsel %vm368_vm13, %v914_v56, %v915_v26  ;;  %1228 = vmatprep.subr.bf16.mxu1 %v2862_v57 }
 0x2a7   : > { %v1065_v59 = vpop.permute.xlu0 %1064  ;;  %1229 = vmatpush1.bf16.msra.mxu1 %v2861_v11  ;;  %v919_v60 = vsel %vm4250_vm10, %v909_v42, %v918_v58  ;;  %v856_v47 = vsel %vm368_vm13, %v852_v2, %v853_v14  ;;  %vm4253_vm10 = vcmask 908288   ;;  %v1272_v58 = vld [vmem:[%s4211_s3] sm:$0xff] }
 0x2a8   : > { %v2860_v61 = vcombine.high %v917_v35, %v919_v60  ;;  %v851_v62 = vpop.permute.xlu1 %850  ;;  %v2859_v63 = vcombine.low %v917_v35, %v919_v60  ;;  %v1072_v6 = vrot.slane %v1065_v59, 4  ;;  %v857_v27 = vsel %vm4251_vm4, %v3586_v16, %v856_v47  ;;  %vm4254_vm11 = vmmov %vm4253_vm10  ;;  %v3102_v16 = vld [vmem:[%s4209_s1 + $0x10] ss:$8 sps:$4 sm:$0xff]  }
 0x2a9   : > { %v855_v5 = vrot.slane %v851_v62, 4  ;;  %v3645_v47 = vshrl.u32 %v286_v0, 7  ;;  %vm4255_vm4 = vcmp.ne.s16.totalorder %v3294_v37, 0 }
 0x2aa   : > { %1230 = vmatprep.subr.bf16.mxu1 %v2860_v61 }
 0x2ab   : > { %v849_v13 = vpop.permute.xlu0 %848  ;;  %1231 = vmatpush1.bf16.msra.mxu1 %v2859_v63 }
 0x2ac   : > { %v854_v4 = vrot.slane %v849_v13, 4  ;;  %1232 = vmatprep.subr.bf16.mxu1 %v2858_v9  ;;  %v3036_v10 = vpop.permute.xlu1 %3035 }
 0x2ad   : > { %v3038_v3 = vunpack.i.h.bf16 %v3036_v10  ;;  %v3037_v8 = vunpack.i.l.bf16 %v3036_v10 }
 0x2ae   : > { %v858_v15 = vsel %vm368_vm13, %v854_v4, %v855_v5  ;;  %v1286_v5 = vld [vmem:[%s4212_s4] sm:$0x1] }
 0x2af   : > { %v1069_v22 = vpop.permute.xlu0 %1068  ;;  %v1075_v20 = vrot.slane %v3038_v3, 4  ;;  %v1073_v23 = vrot.slane %v3037_v8, 4  ;;  %1233 = vmatpush1.bf16.msra.mxu1 %v2857_v12  ;;  %v859_v18 = vsel %vm4252_vm7, %v849_v13, %v858_v15  ;;  %v1293_v8 = vsub.s32 0, %v3645_v47  ;;  %v1289_v15 = vld [vmem:[%s4213_s5] sm:$0xff]  ;;  %vm4256_vm7 = vmmov %vm4255_vm4 }
 0x2b0   : > { %v1074_v28 = vrot.slane %v1069_v22, 4  ;;  %v2856_v17 = vcombine.high %v857_v27, %v859_v18  ;;  %v2855_v38 = vcombine.low %v857_v27, %v859_v18  ;;  %v1304_v18 = vld [vmem:[%s4214_s6 + $0x8] sm:$0xff] }
 0x2b1   : > { %v1076_v39 = vsel %vm368_vm13, %v1072_v6, %v1073_v23  ;;  %v1290_v6 = vld [vmem:[%s4213_s5 + $0x8] sm:$0xff] }
 0x2b2   : > { %1234 = vmatprep.subr.bf16.mxu1 %v2856_v17  ;;  %v1077_v40 = vsel %vm4253_vm10, %v1065_v59, %v1076_v39  ;;  %v1078_v41 = vsel %vm368_vm13, %v1074_v28, %v1075_v20  ;;  %v1273_v59 = vld [vmem:[%s4211_s3 + $0x8] sm:$0xff]  ;;  %v1303_v28 = vld [vmem:[%s4214_s6] sm:$0xff]  ;;  %vm4257_vm10 = vcmp.ne.s16.totalorder %v3345_v7, 0 }
 0x2b3   : > { %1235 = vmatpush1.bf16.msra.mxu1 %v2855_v38  ;;  %v1079_v43 = vsel %vm4254_vm11, %v1069_v22, %v1078_v41  ;;  %vm1276_vm11 = vcmask 31744  }
 0x2b4   : > { %v2872_v46 = vcombine.high %v1077_v40, %v1079_v43  ;;  %v2871_v49 = vcombine.low %v1077_v40, %v1079_v43 }
 0x2b6   : > { %1250 = vmatprep.subr.bf16.mxu1 %v2872_v46 }
 0x2b7   : > { %1251 = vmatpush2.bf16.msra.mxu1 %v2871_v49 }
 0x2b9   : > { %v1111_v45 = vpop.permute.xlu1 %1110 }
 0x2ba   : > { %1253 = vmatmul.mubr.bf16.vlgmr.msra.gmra.mxu1 %v3102_v16 }
 0x2bc   : > { %v1116_v34 = vpop.permute.xlu0 %1115 }
 0x37a   : > { %v1254_v50 = vpop.f32.mrf.mxu1 }
 0x37b   : > { %v3624_v53 = vadd.f32 %v1254_v50, %v1111_v45 }
 0x37c   : > { %v1256_v21 = vpop.f32.mrf.mxu1 }
 0x37d   : > { %v3626_v54 = vadd.f32 %v1256_v21, %v1111_v45  ;;  %v1512_v45 = vld [vmem:[#allocation2 + $0xc] sm:$0xf]  ;;  %v1514_v21 = vld [vmem:[#allocation2 + $0x1c] sm:$0xf] }
 0x37e   : > { %v1258_v42 = vpop.f32.mrf.mxu1 }
 0x37f   : > { %v1263_v55 = vadd.f32 %v3626_v54, %v3624_v53  ;;  %v3630_v26 = vadd.f32 %v1258_v42, %v1116_v34  ;;  %v1544_v42 = vld [vmem:[#allocation2 + $0xc] sm:$0xf] }
 0x380   : > { %v1260_v56 = vpop.f32.mrf.mxu1 }
 0x381   : > { %v3632_v57 = vadd.f32 %v1260_v56, %v1116_v34  ;;  %1264 = vadd.xlane.f32.xlu1 %v1263_v55  ;;  %v1546_v55 = vld [vmem:[#allocation2 + $0x1c] sm:$0xf]  ;;  %v1516_v56 = vsel %vm3272_vm6, %v1512_v45, 0 }
 0x383   : > { %v1266_v32 = vadd.f32 %v3632_v57, %v3630_v26 }
 0x385   : > { %1267 = vadd.xlane.f32.xlu0 %v1266_v32  ;;  %v1518_v32 = vsel %vm3272_vm6, %v1514_v21, 0 }
 0x40a   : > { %v1265_v11 = vpop.xlane.xlu1 %1264 }
 0x40b   : > { %v1270_v51 = vmul.f32 0.00390625, %v1265_v11 }
 0x40d   : > { %v1274_v60 = vmul.f32 %v1272_v58, %v1270_v51  ;;  %v3039_v51 = vpack.i.bf16 %v1546_v55, %v1544_v42  ;;  %v1480_v58 = vld [vmem:[#allocation2 + $0xc] sm:$0xf] }
 0x40e   : > { %v1268_v35 = vpop.xlane.xlu0 %1267 }
 0x40f   : > { %v1271_v30 = vmul.f32 0.00390625, %v1268_v35  ;;  %v1277_v61 = vsel %vm1276_vm11, %v1274_v60, 0.0  ;;  %v3044_v35 = vpack.i.bf16 %v1518_v32, %v1516_v56  ;;  %v1484_v60 = vsel %vm3288_vm9, %v1480_v58, 0 }
 0x411   : > { %v1275_v14 = vmul.f32 %v1273_v59, %v1271_v30  ;;  %v1482_v59 = vld [vmem:[#allocation2 + $0x1c] sm:$0xf] }
 0x412   : > { %v1486_v30 = vsel %vm3288_vm9, %v1482_v59, 0 }
 0x413   : > { %v1278_v62 = vsel %vm1276_vm11, %v1275_v14, 0.0  ;;  %v3049_v14 = vpack.i.bf16 %v1486_v30, %v1484_v60 }
 0x414   : > { %v1279_v63 = vadd.f32 %v1278_v62, %v1277_v61 }
 0x416   : > { %v1280_v1 = vrot.slane %v1279_v63, 4 }
 0x418   : > { %v1281_v2 = vadd.f32 %v1280_v1, %v1279_v63 }
 0x41a   : > { %v1282_v9 = vrot.slane %v1281_v2, 2 }
 0x41c   : > { %v1283_v13 = vadd.f32 %v1282_v9, %v1281_v2 }
 0x41e   : > { %v1284_v4 = vrot.slane %v1283_v13, 1 }
 0x420   : > { %v1285_v10 = vadd.f32 %v1284_v4, %v1283_v13  ;;  %v3130_v13 = vld [vmem:[%s3230_s29 + $0x10] sm:$0xff] }
 0x422   : > { %v1287_v3 = vadd.f32 %v1286_v5, %v1285_v10  ;;  %v3131_v5 = vld [vmem:[%s3230_s29 + $0x18] sm:$0xff] }
 0x424   : > { %v1288_v12 = vmax.f32 %v1287_v3, 0.0  ;;  %v3132_v3 = vld [vmem:[%s3230_s29] sm:$0xff] }
 0x426   : > { %v1294_v0 = vrot.slane %v1288_v12, %v1293_v8 }
 0x428   : > { %v1296_v22 = vmul.f32 %v1294_v0, %v1290_v6  ;;  %v1295_v20 = vmul.f32 %v1294_v0, %v1289_v15  ;;  %v3133_v6 = vld [vmem:[%s3230_s29 + $0x8] sm:$0xff] }
 0x42a   : > { %v1300_v23 = vsel %vm1276_vm11, %v1296_v22, 0.0  ;;  %v1297_v27 = vsel %vm1276_vm11, %v1295_v20, 0.0 }
 0x42b   : > { %1301 = vadd.xlane.f32.xlu1 %v1300_v23  ;;  %1298 = vadd.xlane.f32.xlu0 %v1297_v27 }
 0x4b4   : > { %v1302_v17 = vpop.xlane.xlu1 %1301  ;;  %v1299_v38 = vpop.xlane.xlu0 %1298 }
 0x4b5   : > { %v1306_v39 = vadd.f32 %v1304_v18, %v1302_v17  ;;  %v1305_v40 = vadd.f32 %v1303_v28, %v1299_v38 }
 0x4b7   : > { %v2875_v41 = vmul.f32 -1.442695, %v1306_v39  ;;  %v2874_v43 = vmul.f32 -1.442695, %v1305_v40 }
 0x4b9   : > { %3114 = vpow2.f32 %v2875_v41 }
 0x4ba   : > { %3116 = vpow2.f32 %v2874_v43 }
 0x4c6   : > { %v3115_v46 = vpop.eup %3114 }
 0x4c7   : > { %v3117_v49 = vpop.eup %3116  ;;  %v1314_v16 = vadd.f32 1.0, %v3115_v46 }
 0x4c8   : > { %v1313_v50 = vadd.f32 1.0, %v3117_v49 }
 0x4c9   : > { %3118 = vrcp.f32 %v1314_v16 }
 0x4ca   : > { %3120 = vrcp.f32 %v1313_v50 }
 0x4d6   : > { %v3119_v34 = vpop.eup %3118 }
 0x4d7   : > { %v3121_v11 = vpop.eup %3120  ;;  %1326 = vperm.xlu1 %3018, %v3119_v34  }
 0x4d8   : > { %1321 = vperm.xlu0 %3017, %v3121_v11   ;;  %v1572_v11 = vld [vmem:[#allocation2 + $0xc] sm:$0xf] }
 0x4db   : > { %3045 = vrot.lane.b32.xlu1 %v3044_v35, %s3160_s10  ;;  %v1576_v35 = vsel %vm3384_vm14, %v1572_v11, 0 }
 0x4dc   : > { %3040 = vrot.lane.b32.xlu0 %v3039_v51, %s3163_s13  ;;  %v1574_v51 = vld [vmem:[#allocation2 + $0x1c] sm:$0xf] }
 0x4dd   : > { %v1578_v60 = vsel %vm3384_vm14, %v1574_v51, 0 }
 0x4de   : > { %v3054_v30 = vpack.i.bf16 %v1578_v60, %v1576_v35 }
 0x4e0   : > { %3050 = vrot.lane.b32.xlu0 %v3049_v14, %s3158_s8 }
 0x552   : > { %v1327_v61 = vpop.permute.xlu1 %1326 }
 0x553   : > { %v1331_v62 = vmul.f32 %v1327_v61, %v3630_v26  ;;  %v1332_v63 = vmul.f32 %v1327_v61, %v3632_v57  ;;  %v1322_v1 = vpop.permute.xlu0 %1321  ;;  %v1961_v61 = vld [vmem:[#allocation2 + $0xc] sm:$0xf] }
 0x554   : > { %v1329_v2 = vmul.f32 %v1322_v1, %v3624_v53  ;;  %v1330_v9 = vmul.f32 %v1322_v1, %v3626_v54 }
 0x555   : > { %v3683_v4 = vadd.f32 %v3130_v13, %v1331_v62  ;;  %v3686_v10 = vadd.f32 %v3131_v5, %v1332_v63  ;;  %v1963_v62 = vld [vmem:[#allocation2 + $0x1c] sm:$0xf]  ;;  %v2880_v63 = vld [vmem:[%s4210_s2 + $0x20] sm:$0xff]  ;;  %v2881_v5 = vld [vmem:[%s4210_s2 + $0x28] sm:$0xff] }
 0x556   : > { %v3689_v12 = vadd.f32 %v3132_v3, %v1329_v2  ;;  %v3692_v15 = vadd.f32 %v3133_v6, %v1330_v9  ;;  %v1965_v2 = vsel %vm3272_vm6, %v1961_v61, 0  ;;  %v1967_v9 = vsel %vm3272_vm6, %v1963_v62, 0  ;;  %v3105_v13 = vld [vmem:[%s4209_s1 + $0x24] ss:$8 sps:$4 sm:$0xff]   ;;  %v1995_v6 = vld [vmem:[#allocation2 + $0x1c] sm:$0xf] }
 0x557   : > { %v3696_v26 = vpack.c.bf16 %v3686_v10, %v3683_v4  ;;  %v1993_v3 = vld [vmem:[#allocation2 + $0xc] sm:$0xf]  ;;  %2902 = vmatprep.mubr.msk.bf16.mxu0 %vm399_vm1, %v3105_v13 }
 0x558   : > { %v2974_v53 = vpack.c.bf16 %v3692_v15, %v3689_v12  ;;  %v3142_v54 = vpack.c.bf16 %v3686_v10, %v3692_v15  ;;  %v3143_v57 = vpack.c.bf16 %v3683_v4, %v3689_v12 }
 0x559   : > { %1350 = vst [vmem:[#allocation2 + $0x14] sm:$0xff] %v3696_v26  ;;  %v1517_v28 = vsel %vm4256_vm7, %v3696_v26, 0  ;;  %v1485_v17 = vsel %vm501_vm15, %v3696_v26, 0  ;;  %vm4259_vm7 = vcmp.ne.s16.totalorder %v3361_v19, 0  ;;  %v1577_v1 = vsel %vm606_vm3, %v3696_v26, 0 }
 0x55a   : > { %1349 = vst [vmem:[#allocation2 + $0x4] sm:$0xff] %v2974_v53  ;;  %1551 = vrot.lane.b32.xlu1 %v2974_v53, %s3163_s13  ;;  %v1515_v27 = vsel %vm4255_vm4, %v2974_v53, 0  ;;  %v1483_v18 = vsel %vm501_vm15, %v2974_v53, 0  ;;  %vm4258_vm4 = vmmov %vm4257_vm10  ;;  %v1575_v14 = vsel %vm606_vm3, %v2974_v53, 0  ;;  %v3059_v53 = vpack.i.bf16 %v1995_v6, %v1993_v3 }
 0x55e   : > { %1555 = vrot.lane.b32.xlu1 %v3696_v26, %s3163_s13  ;;  %v3064_v26 = vpack.i.bf16 %v1967_v9, %v1965_v2 }
 0x560   : > { %v1385_v20 = vld [vmem:[#allocation2 + $0x10] sm:$0xff]  ;;  %v1386_v23 = vld [vmem:[#allocation2 + $0x18] sm:$0xf] }
 0x561   : > { %v1383_v0 = vld [vmem:[#allocation2] sm:$0xff]  ;;  %v1384_v22 = vld [vmem:[#allocation2 + $0x8] sm:$0xf]  ;;  %v1446_v41 = vld [vmem:[#allocation2 + $0x18] sm:$0xf]  ;;  %v1449_v43 = vsel %vm4258_vm4, %v1385_v20, 0 }
 0x562   : > { %1391 = vrot.lane.b32.xlu0 %v1383_v0, %s3164_s14  ;;  %1393 = vrot.lane.b32.xlu1 %v1384_v22, %s3164_s14  ;;  %v1444_v38 = vld [vmem:[#allocation2 + $0x8] sm:$0xf]  ;;  %v1447_v39 = vsel %vm4257_vm10, %v1383_v0, 0  ;;  %v1450_v46 = vsel %vm3282_vm8, %v1446_v41, 0  ;;  %v1415_v16 = vsel %vm4259_vm7, %v1383_v0, 0  ;;  %vm4260_vm10 = vmmov %vm4259_vm7  ;;  %vm4261_vm4 = vcmp.ne.s16.totalorder %v3380_v29, 0 }
 0x563   : > { %v1448_v40 = vsel %vm3282_vm8, %v1444_v38, 0  ;;  %v1412_v49 = vld [vmem:[#allocation2 + $0x8] sm:$0xf]  ;;  %v1414_v45 = vld [vmem:[#allocation2 + $0x18] sm:$0xf]  ;;  %v1417_v21 = vsel %vm4260_vm10, %v1385_v20, 0  ;;  %vm4262_vm7 = vmmov %vm4261_vm4 }
 0x564   : > { %v1416_v50 = vsel %vm3312_vm12, %v1412_v49, 0  ;;  %v1418_v42 = vsel %vm3312_vm12, %v1414_v45, 0  ;;  %v1352_v55 = vld [vmem:[#allocation2 + $0x8] sm:$0xf]  ;;  %v1355_v34 = vsel %vm4261_vm4, %v1383_v0, 0  ;;  %v1357_v58 = vsel %vm4262_vm7, %v1385_v20, 0 }
 0x565   : > { %v1356_v56 = vsel %vm3369_vm5, %v1352_v55, 0  ;;  %v1354_v32 = vld [vmem:[#allocation2 + $0x18] sm:$0xf]  ;;  %v1929_v0 = vld [vmem:[#allocation2 + $0xc] sm:$0xf]  ;;  %vm4263_vm10 = vcmask 916480  }
 0x566   : > { %1395 = vrot.lane.b32.xlu0 %v1385_v20, %s3164_s14  ;;  %1397 = vrot.lane.b32.xlu1 %v1386_v23, %s3164_s14  ;;  %v1358_v59 = vsel %vm3369_vm5, %v1354_v32, 0  ;;  %v1931_v22 = vld [vmem:[#allocation2 + $0x1c] sm:$0xf]  ;;  %v1933_v20 = vsel %vm3288_vm9, %v1929_v0, 0  ;;  %vm4264_vm4 = vmmov %vm4263_vm10  ;;  %vm4265_vm7 = vcmask 7168  }
 0x567   : > { %v1935_v23 = vsel %vm3288_vm9, %v1931_v22, 0 }
 0x56a   : > { %1523 = vrot.lane.b32.xlu0 %v1515_v27, %s3160_s10  ;;  %1491 = vrot.lane.b32.xlu1 %v1483_v18, %s3158_s8  ;;  %v3069_v27 = vpack.i.bf16 %v1935_v23, %v1933_v20  ;;  %v3046_v18 = vpop.permute.xlu1 %3045 }
 0x56e   : > { %1527 = vrot.lane.b32.xlu0 %v1517_v28, %s3160_s10  ;;  %1495 = vrot.lane.b32.xlu1 %v1485_v17, %s3158_s8  ;;  %v3041_v28 = vpop.permute.xlu0 %3040 }
 0x56f   : > { %v3042_v17 = vunpack.i.l.bf16 %v3041_v28 }
 0x572   : > { %1455 = vrot.lane.b32.xlu0 %v1447_v39, %s3159_s9  ;;  %1457 = vrot.lane.b32.xlu1 %v1448_v40, %s3159_s9  ;;  %v3043_v39 = vunpack.i.h.bf16 %v3041_v28  ;;  %v1560_v40 = vrot.slane %v3042_v17, 4 }
 0x574   : > { %v1562_v49 = vrot.slane %v3043_v39, 4 }
 0x576   : > { %1459 = vrot.lane.b32.xlu0 %v1449_v43, %s3159_s9  ;;  %1461 = vrot.lane.b32.xlu1 %v1450_v46, %s3159_s9  ;;  %v3051_v43 = vpop.permute.xlu0 %3050 }
 0x577   : > { %v3053_v35 = vunpack.i.h.bf16 %v3051_v43 }
 0x579   : > { %v1502_v2 = vrot.slane %v3053_v35, 4 }
 0x57a   : > { %1423 = vrot.lane.b32.xlu0 %v1415_v16, %s3157_s30  ;;  %1425 = vrot.lane.b32.xlu1 %v1416_v50, %s3157_s30 }
 0x57e   : > { %1427 = vrot.lane.b32.xlu0 %v1417_v21, %s3157_s30  ;;  %1429 = vrot.lane.b32.xlu1 %v1418_v42, %s3157_s30 }
 0x582   : > { %1363 = vrot.lane.b32.xlu0 %v1355_v34, %s3162_s12  ;;  %1365 = vrot.lane.b32.xlu1 %v1356_v56, %s3162_s12 }
 0x586   : > { %1367 = vrot.lane.b32.xlu0 %v1357_v58, %s3162_s12  ;;  %1369 = vrot.lane.b32.xlu1 %v1358_v59, %s3162_s12  ;;  %v3047_v58 = vunpack.i.l.bf16 %v3046_v18  ;;  %v3048_v59 = vunpack.i.h.bf16 %v3046_v18 }
 0x588   : > { %v1532_v62 = vrot.slane %v3047_v58, 4 }
 0x58a   : > { %1583 = vrot.lane.b32.xlu0 %v1575_v14, %s3161_s11  ;;  %3055 = vrot.lane.b32.xlu1 %v3054_v30, %s3161_s11  ;;  %v3052_v14 = vunpack.i.l.bf16 %v3051_v43 }
 0x58e   : > { %1587 = vrot.lane.b32.xlu0 %v1577_v1, %s3161_s11  ;;  %1629 = vperm.xlu1 %3018, %v2880_v63   ;;  %v1534_v1 = vrot.slane %v3048_v59, 4 }
 0x592   : > { %1634 = vperm.xlu0 %3017, %v2881_v5   ;;  %3065 = vrot.lane.b32.xlu1 %v3064_v26, %s3160_s10  ;;  %v1500_v5 = vrot.slane %v3052_v14, 4 }
 0x596   : > { %3060 = vrot.lane.b32.xlu0 %v3059_v53, %s3163_s13 }
 0x59a   : > { %3070 = vrot.lane.b32.xlu0 %v3069_v27, %s3158_s8 }
 0x5cc   : > { %v1552_v38 = vpop.permute.xlu1 %1551 }
 0x5cd   : > { %v1559_v41 = vrot.slane %v1552_v38, 4 }
 0x5cf   : > { %v1563_v16 = vsel %vm368_vm13, %v1559_v41, %v1560_v40 }
 0x5d0   : > { %v1556_v46 = vpop.permute.xlu1 %1555  ;;  %v1564_v21 = vsel %vm4263_vm10, %v1552_v38, %v1563_v16  ;;  %vm4266_vm10 = vmmov %vm4265_vm7 }
 0x5d1   : > { %v1561_v50 = vrot.slane %v1556_v46, 4 }
 0x5d3   : > { %v1565_v45 = vsel %vm368_vm13, %v1561_v50, %v1562_v49 }
 0x5d4   : > { %v3798_v42 = vpop.permute.xlu0 %1391  ;;  %v1566_v55 = vsel %vm4264_vm4, %v1556_v46, %v1565_v45  ;;  %v3801_v34 = vpop.permute.xlu1 %1393  ;;  %vm4267_vm4 = vcmask 121856  }
 0x5d5   : > { %v2898_v56 = vcombine.low %v1564_v21, %v1566_v55  ;;  %v2899_v32 = vcombine.high %v1564_v21, %v1566_v55 }
 0x5d7   : > { %1739 = vmatprep.subr.bf16.mxu0 %v2899_v32 }
 0x5d8   : > { %v3803_v11 = vpop.permute.xlu0 %1395  ;;  %v1398_v51 = vpop.permute.xlu1 %1397  ;;  %1740 = vmatpush1.bf16.msra.mxu0 %v2898_v56 }
 0x5d9   : > { %v1401_v59 = vrot.slane %v3803_v11, 4  ;;  %v1402_v35 = vrot.slane %v1398_v51, 4 }
 0x5db   : > { %v1405_v51 = vsel %vm368_vm13, %v1401_v59, %v1402_v35 }
 0x5dc   : > { %v1524_v60 = vpop.permute.xlu0 %1523  ;;  %v1492_v30 = vpop.permute.xlu1 %1491 }
 0x5dd   : > { %v1531_v61 = vrot.slane %v1524_v60, 4  ;;  %v1499_v63 = vrot.slane %v1492_v30, 4 }
 0x5df   : > { %v1535_v3 = vsel %vm368_vm13, %v1531_v61, %v1532_v62  ;;  %v1503_v0 = vsel %vm368_vm13, %v1499_v63, %v1500_v5  ;;  %v1399_v61 = vrot.slane %v3798_v42, 4  ;;  %v1400_v62 = vrot.slane %v3801_v34, 4 }
 0x5e0   : > { %v1528_v9 = vpop.permute.xlu0 %1527  ;;  %v1496_v13 = vpop.permute.xlu1 %1495  ;;  %v1536_v20 = vsel %vm416_vm2, %v1524_v60, %v1535_v3  ;;  %v1504_v39 = vsel %vm4225_vm0, %v1492_v30, %v1503_v0  ;;  %v1406_v0 = vsel %vm399_vm1, %v3803_v11, %v1405_v51 }
 0x5e1   : > { %v1533_v6 = vrot.slane %v1528_v9, 4  ;;  %v1501_v26 = vrot.slane %v1496_v13, 4  ;;  %v1403_v3 = vsel %vm368_vm13, %v1399_v61, %v1400_v62 }
 0x5e3   : > { %v1537_v53 = vsel %vm368_vm13, %v1533_v6, %v1534_v1  ;;  %v1505_v22 = vsel %vm368_vm13, %v1501_v26, %v1502_v2 }
 0x5e4   : > { %v1538_v23 = vsel %vm416_vm2, %v1528_v9, %v1537_v53  ;;  %v1456_v27 = vpop.permute.xlu0 %1455  ;;  %v1506_v18 = vsel %vm4225_vm0, %v1496_v13, %v1505_v22  ;;  %v1458_v28 = vpop.permute.xlu1 %1457 }
 0x5e5   : > { %v2896_v17 = vcombine.low %v1536_v20, %v1538_v23  ;;  %v2897_v38 = vcombine.high %v1536_v20, %v1538_v23  ;;  %v1463_v40 = vrot.slane %v1456_v27, 4  ;;  %v2895_v41 = vcombine.high %v1504_v39, %v1506_v18 }
 0x5e6   : > { %v1464_v43 = vrot.slane %v1458_v28, 4  ;;  %v2894_v45 = vcombine.low %v1504_v39, %v1506_v18  ;;  %v1404_v18 = vsel %vm399_vm1, %v3798_v42, %v1403_v3 }
 0x5e7   : > { %1741 = vmatprep.subr.bf16.mxu0 %v2897_v38  ;;  %v2887_v28 = vcombine.high %v1404_v18, %v1406_v0 }
 0x5e8   : > { %v1460_v46 = vpop.permute.xlu0 %1459  ;;  %1742 = vmatpush1.bf16.msra.mxu0 %v2896_v17  ;;  %v1462_v49 = vpop.permute.xlu1 %1461  ;;  %v1467_v21 = vsel %vm368_vm13, %v1463_v40, %v1464_v43  ;;  %v2886_v43 = vcombine.low %v1404_v18, %v1406_v0 }
 0x5e9   : > { %v1465_v16 = vrot.slane %v1460_v46, 4  ;;  %1743 = vmatprep.subr.bf16.mxu0 %v2895_v41  ;;  %v1466_v50 = vrot.slane %v1462_v49, 4  ;;  %v1468_v14 = vsel %vm4266_vm10, %v1456_v27, %v1467_v21  ;;  %vm4269_vm10 = vcmask 138240  }
 0x5eb   : > { %v1469_v55 = vsel %vm368_vm13, %v1465_v16, %v1466_v50 }
 0x5ec   : > { %v1424_v56 = vpop.permute.xlu0 %1423  ;;  %1744 = vmatpush1.bf16.msra.mxu0 %v2894_v45  ;;  %v1426_v32 = vpop.permute.xlu1 %1425  ;;  %v1470_v58 = vsel %vm4265_vm7, %v1460_v46, %v1469_v55  ;;  %vm4268_vm7 = vmmov %vm4267_vm4 }
 0x5ed   : > { %v1431_v60 = vrot.slane %v1424_v56, 4  ;;  %1745 = vmatprep.subr.bf16.mxu0 %v3142_v54  ;;  %v1432_v30 = vrot.slane %v1426_v32, 4  ;;  %v2891_v63 = vcombine.high %v1468_v14, %v1470_v58  ;;  %v2890_v5 = vcombine.low %v1468_v14, %v1470_v58 }
 0x5ef   : > { %v1435_v13 = vsel %vm368_vm13, %v1431_v60, %v1432_v30 }
 0x5f0   : > { %v1428_v1 = vpop.permute.xlu0 %1427  ;;  %1746 = vmatpush1.bf16.msra.mxu0 %v3143_v57  ;;  %v1430_v2 = vpop.permute.xlu1 %1429  ;;  %v1436_v53 = vsel %vm4267_vm4, %v1424_v56, %v1435_v13  ;;  %vm4270_vm4 = vmmov %vm4269_vm10 }
 0x5f1   : > { %v1433_v9 = vrot.slane %v1428_v1, 4  ;;  %1747 = vmatprep.subr.bf16.mxu0 %v2891_v63  ;;  %v1434_v54 = vrot.slane %v1430_v2, 4 }
 0x5f3   : > { %v1437_v6 = vsel %vm368_vm13, %v1433_v9, %v1434_v54 }
 0x5f4   : > { %v1364_v34 = vpop.permute.xlu0 %1363  ;;  %1748 = vmatpush1.bf16.msra.mxu0 %v2890_v5  ;;  %v1366_v26 = vpop.permute.xlu1 %1365  ;;  %v1438_v57 = vsel %vm4268_vm7, %v1428_v1, %v1437_v6  ;;  %vm4271_vm7 = vcmask 908288   ;;  %v3107_v1 = vld [vmem:[%s4209_s1 + $0x20] ss:$8 sps:$4 sm:$0xff]  }
 0x5f5   : > { %v1371_v22 = vrot.slane %v1364_v34, 4  ;;  %v1372_v20 = vrot.slane %v1366_v26, 4  ;;  %v2888_v23 = vcombine.low %v1436_v53, %v1438_v57  ;;  %v2889_v27 = vcombine.high %v1436_v53, %v1438_v57 }
 0x5f7   : > { %1749 = vmatprep.subr.bf16.mxu0 %v2889_v27  ;;  %v1375_v40 = vsel %vm368_vm13, %v1371_v22, %v1372_v20 }
 0x5f8   : > { %v1368_v17 = vpop.permute.xlu0 %1367  ;;  %v1370_v38 = vpop.permute.xlu1 %1369  ;;  %1750 = vmatpush1.bf16.msra.mxu0 %v2888_v23  ;;  %v1376_v16 = vsel %vm4269_vm10, %v1364_v34, %v1375_v40  ;;  %vm4272_vm10 = vmmov %vm4271_vm7 }
 0x5f9   : > { %v1373_v39 = vrot.slane %v1368_v17, 4  ;;  %v1374_v41 = vrot.slane %v1370_v38, 4  ;;  %1751 = vmatprep.subr.bf16.mxu0 %v2887_v28 }
 0x5fb   : > { %v1377_v11 = vsel %vm368_vm13, %v1373_v39, %v1374_v41 }
 0x5fc   : > { %v1584_v46 = vpop.permute.xlu0 %1583  ;;  %v3056_v49 = vpop.permute.xlu1 %3055  ;;  %1752 = vmatpush1.bf16.msra.mxu0 %v2886_v43  ;;  %v1378_v42 = vsel %vm4270_vm4, %v1368_v17, %v1377_v11  ;;  %vm4273_vm4 = vcmp.ne.s16.totalorder %v3294_v37, 0 }
 0x5fd   : > { %v3058_v50 = vunpack.i.h.bf16 %v3056_v49  ;;  %v3057_v45 = vunpack.i.l.bf16 %v3056_v49  ;;  %v2884_v21 = vcombine.low %v1376_v16, %v1378_v42  ;;  %v2885_v55 = vcombine.high %v1376_v16, %v1378_v42 }
 0x5fe   : > { %v1591_v56 = vrot.slane %v1584_v46, 4 }
 0x5ff   : > { %v1592_v32 = vrot.slane %v3057_v45, 4  ;;  %1753 = vmatprep.subr.bf16.mxu0 %v2885_v55  ;;  %v1594_v35 = vrot.slane %v3058_v50, 4 }
 0x600   : > { %v1588_v58 = vpop.permute.xlu0 %1587  ;;  %1754 = vmatpush1.bf16.msra.mxu0 %v2884_v21 }
 0x601   : > { %v1593_v59 = vrot.slane %v1588_v58, 4  ;;  %v1595_v60 = vsel %vm368_vm13, %v1591_v56, %v1592_v32 }
 0x602   : > { %v1596_v14 = vsel %vm4271_vm7, %v1584_v46, %v1595_v60  ;;  %vm4274_vm7 = vcmp.ne.s16.totalorder %v3345_v7, 0 }
 0x603   : > { %v1597_v30 = vsel %vm368_vm13, %v1593_v59, %v1594_v35 }
 0x604   : > { %v1598_v61 = vsel %vm4272_vm10, %v1588_v58, %v1597_v30  ;;  %vm4275_vm10 = vcmp.ne.s16.totalorder %v3361_v19, 0 }
 0x605   : > { %v2900_v62 = vcombine.low %v1596_v14, %v1598_v61  ;;  %v2901_v63 = vcombine.high %v1596_v14, %v1598_v61  ;;  %v2021_v61 = vld [vmem:[#allocation2 + $0xc] sm:$0xf] }
 0x607   : > { %1769 = vmatprep.subr.bf16.mxu0 %v2901_v63 }
 0x608   : > { %1770 = vmatpush2.bf16.msra.mxu0 %v2900_v62  ;;  %v2023_v62 = vld [vmem:[#allocation2 + $0x1c] sm:$0xf] }
 0x609   : > { %v1630_v2 = vpop.permute.xlu1 %1629 }
 0x60b   : > { %1772 = vmatmul.mubr.bf16.vlgmr.msra.gmra.mxu0 %v3107_v1 }
 0x60c   : > { %2965 = vmatprep.mubr.msk.bf16.mxu0 %vm399_vm1, %v3111_v33 }
 0x60d   : > { %v1635_v5 = vpop.permute.xlu0 %1634 }
 0x6cb   : > { %v1773_v51 = vpop.f32.mrf.mxu0 }
 0x6cc   : > { %v1774_v9 = vadd.f32 %v1773_v51, %v1630_v2  ;;  %v2027_v51 = vsel %vm3384_vm14, %v2023_v62, 0 }
 0x6cd   : > { %v1775_v13 = vpop.f32.mrf.mxu0 }
 0x6ce   : > { %v1776_v54 = vadd.f32 %v1775_v13, %v1630_v2  ;;  %v1782_v6 = vmax.f32 %v1774_v9, 0.0  ;;  %v2025_v2 = vsel %vm3384_vm14, %v2021_v61, 0 }
 0x6cf   : > { %v1777_v3 = vpop.f32.mrf.mxu0  ;;  %v3074_v13 = vpack.i.bf16 %v2027_v51, %v2025_v2 }
 0x6d0   : > { %v1783_v34 = vmax.f32 %v1776_v54, 0.0  ;;  %v1778_v26 = vadd.f32 %v1777_v3, %v1635_v5  ;;  %v2907_v54 = vld [vmem:[%s4210_s2 + $0x30] sm:$0xff] }
 0x6d1   : > { %v1779_v53 = vpop.f32.mrf.mxu0  ;;  %v3108_v3 = vld [vmem:[%s4209_s1 + $0x34] ss:$8 sps:$4 sm:$0xff]  }
 0x6d2   : > { %v2976_v57 = vpack.c.bf16 %v1783_v34, %v1782_v6  ;;  %v1780_v0 = vadd.f32 %v1779_v53, %v1635_v5  ;;  %v1784_v22 = vmax.f32 %v1778_v26, 0.0  ;;  %2929 = vmatprep.mubr.msk.bf16.mxu1 %vm399_vm1, %v3108_v3  ;;  %v3061_v26 = vpop.permute.xlu0 %3060 }
 0x6d4   : > { %1798 = vst [vmem:[#allocation2 + $0x4] sm:$0xff] %v2976_v57  ;;  %v1785_v20 = vmax.f32 %v1780_v0, 0.0  ;;  %2000 = vrot.lane.b32.xlu1 %v2976_v57, %s3163_s13  ;;  %v1932_v27 = vsel %vm501_vm15, %v2976_v57, 0  ;;  %v3853_v28 = vpack.c.bf16 %v1784_v22, %v1782_v6  ;;  %v1964_v41 = vsel %vm4273_vm4, %v2976_v57, 0  ;;  %v2908_v6 = vld [vmem:[%s4210_s2 + $0x38] sm:$0xff] }
 0x6d5   : > { %v2024_v63 = vsel %vm606_vm3, %v2976_v57, 0 }
 0x6d6   : > { %v2977_v23 = vpack.c.bf16 %v1785_v20, %v1784_v22  ;;  %v3851_v18 = vpack.c.bf16 %v1785_v20, %v1783_v34  ;;  %v3066_v34 = vpop.permute.xlu1 %3065  ;;  %v3071_v57 = vpop.permute.xlu0 %3070 }
 0x6d8   : > { %1799 = vst [vmem:[#allocation2 + $0x14] sm:$0xff] %v2977_v23  ;;  %1940 = vrot.lane.b32.xlu1 %v1932_v27, %s3158_s8  ;;  %v1966_v16 = vsel %vm4273_vm4, %v2977_v23, 0  ;;  %v1934_v42 = vsel %vm501_vm15, %v2977_v23, 0  ;;  %vm4278_vm4 = vcmp.ne.s16.totalorder %v3361_v19, 0  ;;  %v2026_v5 = vsel %vm606_vm3, %v2977_v23, 0 }
 0x6db   : > { %v1832_v17 = vld [vmem:[#allocation2] sm:$0xff]  ;;  %v1893_v38 = vld [vmem:[#allocation2 + $0x8] sm:$0xf] }
 0x6dc   : > { %1840 = vrot.lane.b32.xlu0 %v1832_v17, %s3164_s14  ;;  %v1897_v39 = vsel %vm3282_vm8, %v1893_v38, 0  ;;  %v1861_v40 = vld [vmem:[#allocation2 + $0x8] sm:$0xf]  ;;  %v1896_v11 = vsel %vm4274_vm7, %v1832_v17, 0  ;;  %v1864_v46 = vsel %vm4275_vm10, %v1832_v17, 0  ;;  %vm4276_vm7 = vcmp.ne.s16.totalorder %v3380_v29, 0 }
 0x6dd   : > { %1906 = vrot.lane.b32.xlu1 %v1897_v39, %s3159_s9  ;;  %v1865_v43 = vsel %vm3312_vm12, %v1861_v40, 0  ;;  %v1833_v49 = vld [vmem:[#allocation2 + $0x8] sm:$0xf]  ;;  %v1804_v55 = vsel %vm4276_vm7, %v1832_v17, 0  ;;  %vm4277_vm10 = vcmp.ne.s16.totalorder %v3345_v7, 0  ;;  %v3063_v38 = vunpack.i.h.bf16 %v3061_v26 }
 0x6de   : > { %v1801_v35 = vld [vmem:[#allocation2 + $0x8] sm:$0xf] }
 0x6df   : > { %v1834_v50 = vld [vmem:[#allocation2 + $0x10] sm:$0xff]  ;;  %v1835_v45 = vld [vmem:[#allocation2 + $0x18] sm:$0xf]  ;;  %v1805_v30 = vsel %vm3369_vm5, %v1801_v35, 0 }
 0x6e0   : > { %1972 = vrot.lane.b32.xlu0 %v1964_v41, %s3160_s10  ;;  %v1895_v21 = vld [vmem:[#allocation2 + $0x18] sm:$0xf]  ;;  %v1898_v58 = vsel %vm4277_vm10, %v1834_v50, 0  ;;  %v1866_v60 = vsel %vm4278_vm4, %v1834_v50, 0  ;;  %v1806_v9 = vsel %vm4276_vm7, %v1834_v50, 0  ;;  %vm4279_vm10 = vcmask 916480  }
 0x6e1   : > { %1874 = vrot.lane.b32.xlu1 %v1865_v43, %s3157_s30  ;;  %v1899_v56 = vsel %vm3282_vm8, %v1895_v21, 0  ;;  %v1863_v32 = vld [vmem:[#allocation2 + $0x18] sm:$0xf]  ;;  %v3068_v21 = vunpack.i.h.bf16 %v3066_v34  ;;  %vm4280_vm4 = vmmov %vm4279_vm10  ;;  %vm4281_vm7 = vcmask 7168  }
 0x6e2   : > { %v1867_v59 = vsel %vm3312_vm12, %v1863_v32, 0  ;;  %v1803_v14 = vld [vmem:[#allocation2 + $0x18] sm:$0xf] }
 0x6e3   : > { %v1807_v1 = vsel %vm3369_vm5, %v1803_v14, 0 }
 0x6e4   : > { %1904 = vrot.lane.b32.xlu0 %v1896_v11, %s3159_s9  ;;  %v2011_v11 = vrot.slane %v3063_v38, 4 }
 0x6e5   : > { %2004 = vrot.lane.b32.xlu1 %v2977_v23, %s3163_s13  ;;  %v3062_v23 = vunpack.i.l.bf16 %v3061_v26 }
 0x6e7   : > { %v2009_v39 = vrot.slane %v3062_v23, 4 }
 0x6e8   : > { %1872 = vrot.lane.b32.xlu0 %v1864_v46, %s3157_s30 }
 0x6e9   : > { %1842 = vrot.lane.b32.xlu1 %v1833_v49, %s3164_s14 }
 0x6ec   : > { %1976 = vrot.lane.b32.xlu0 %v1966_v16, %s3160_s10  ;;  %v3067_v16 = vunpack.i.l.bf16 %v3066_v34 }
 0x6ed   : > { %1944 = vrot.lane.b32.xlu1 %v1934_v42, %s3158_s8  ;;  %v3072_v42 = vunpack.i.l.bf16 %v3071_v57 }
 0x6ee   : > { %v1981_v14 = vrot.slane %v3067_v16, 4 }
 0x6ef   : > { %v1949_v61 = vrot.slane %v3072_v42, 4 }
 0x6f0   : > { %1844 = vrot.lane.b32.xlu0 %v1834_v50, %s3164_s14 }
 0x6f1   : > { %1846 = vrot.lane.b32.xlu1 %v1835_v45, %s3164_s14 }
 0x6f4   : > { %1812 = vrot.lane.b32.xlu0 %v1804_v55, %s3162_s12 }
 0x6f5   : > { %1910 = vrot.lane.b32.xlu1 %v1899_v56, %s3159_s9 }
 0x6f8   : > { %1908 = vrot.lane.b32.xlu0 %v1898_v58, %s3159_s9 }
 0x6f9   : > { %1878 = vrot.lane.b32.xlu1 %v1867_v59, %s3157_s30  ;;  %v3073_v59 = vunpack.i.h.bf16 %v3071_v57 }
 0x6fc   : > { %1876 = vrot.lane.b32.xlu0 %v1866_v60, %s3157_s30 }
 0x6fd   : > { %1814 = vrot.lane.b32.xlu1 %v1805_v30, %s3162_s12 }
 0x700   : > { %2032 = vrot.lane.b32.xlu0 %v2024_v63, %s3161_s11  ;;  %v1983_v63 = vrot.slane %v3068_v21, 4 }
 0x701   : > { %1818 = vrot.lane.b32.xlu1 %v1807_v1, %s3162_s12 }
 0x704   : > { %1816 = vrot.lane.b32.xlu0 %v1806_v9, %s3162_s12  ;;  %v1951_v9 = vrot.slane %v3073_v59, 4 }
 0x705   : > { %3075 = vrot.lane.b32.xlu1 %v3074_v13, %s3161_s11 }
 0x708   : > { %2036 = vrot.lane.b32.xlu0 %v2026_v5, %s3161_s11 }
 0x709   : > { %2078 = vperm.xlu1 %3018, %v2907_v54  }
 0x70c   : > { %2083 = vperm.xlu0 %3017, %v2908_v6  }
 0x746   : > { %v2001_v53 = vpop.permute.xlu1 %2000 }
 0x747   : > { %v2008_v40 = vrot.slane %v2001_v53, 4 }
 0x749   : > { %v2012_v46 = vsel %vm368_vm13, %v2008_v40, %v2009_v39 }
 0x74a   : > { %v1941_v0 = vpop.permute.xlu1 %1940  ;;  %v2013_v55 = vsel %vm4279_vm10, %v2001_v53, %v2012_v46  ;;  %vm4282_vm10 = vmmov %vm4281_vm7 }
 0x74b   : > { %v1948_v35 = vrot.slane %v1941_v0, 4 }
 0x74d   : > { %v1952_v13 = vsel %vm368_vm13, %v1948_v35, %v1949_v61 }
 0x74e   : > { %v3926_v22 = vpop.permute.xlu0 %1840  ;;  %v1953_v53 = vsel %vm4225_vm0, %v1941_v0, %v1952_v13 }
 0x74f   : > { %v3928_v20 = vpop.permute.xlu1 %1906  ;;  %v1848_v35 = vrot.slane %v3926_v22, 4 }
 0x752   : > { %v1973_v27 = vpop.permute.xlu0 %1972 }
 0x753   : > { %v3930_v17 = vpop.permute.xlu1 %1874  ;;  %v1980_v56 = vrot.slane %v1973_v27, 4 }
 0x754   : > { %v1881_v59 = vrot.slane %v3930_v17, 4 }
 0x755   : > { %v1984_v1 = vsel %vm368_vm13, %v1980_v56, %v1981_v14 }
 0x756   : > { %v3932_v41 = vpop.permute.xlu0 %1904  ;;  %v1985_v3 = vsel %vm416_vm2, %v1973_v27, %v1984_v1 }
 0x757   : > { %v2005_v43 = vpop.permute.xlu1 %2004 }
 0x758   : > { %v2010_v49 = vrot.slane %v2005_v43, 4 }
 0x75a   : > { %v3935_v50 = vpop.permute.xlu0 %1872  ;;  %v2014_v45 = vsel %vm368_vm13, %v2010_v49, %v2011_v11  ;;  %v1912_v11 = vrot.slane %v3932_v41, 4  ;;  %v1913_v49 = vrot.slane %v3928_v20, 4 }
 0x75b   : > { %v2015_v32 = vsel %vm4280_vm4, %v2005_v43, %v2014_v45  ;;  %v3940_v58 = vpop.permute.xlu1 %1842  ;;  %v1880_v16 = vrot.slane %v3935_v50, 4  ;;  %vm4283_vm4 = vcmask 121856  }
 0x75c   : > { %v2925_v60 = vcombine.low %v2013_v55, %v2015_v32  ;;  %v2926_v30 = vcombine.high %v2013_v55, %v2015_v32  ;;  %v1916_v21 = vsel %vm368_vm13, %v1912_v11, %v1913_v49 }
 0x75d   : > { %v1884_v14 = vsel %vm368_vm13, %v1880_v16, %v1881_v59 }
 0x75e   : > { %v1977_v62 = vpop.permute.xlu0 %1976  ;;  %2188 = vmatprep.subr.bf16.mxu1 %v2926_v30  ;;  %v1917_v30 = vsel %vm4281_vm7, %v3932_v41, %v1916_v21  ;;  %v1885_v41 = vsel %vm4283_vm4, %v3935_v50, %v1884_v14  ;;  %vm4284_vm7 = vmmov %vm4283_vm4 }
 0x75f   : > { %v1982_v2 = vrot.slane %v1977_v62, 4  ;;  %2189 = vmatpush1.bf16.msra.mxu1 %v2925_v60  ;;  %v1945_v51 = vpop.permute.xlu1 %1944  ;;  %v1849_v60 = vrot.slane %v3940_v58, 4 }
 0x760   : > { %v1950_v54 = vrot.slane %v1945_v51, 4 }
 0x761   : > { %v1986_v5 = vsel %vm368_vm13, %v1982_v2, %v1983_v63  ;;  %v1852_v58 = vsel %vm368_vm13, %v1848_v35, %v1849_v60 }
 0x762   : > { %v1987_v6 = vsel %vm416_vm2, %v1977_v62, %v1986_v5  ;;  %v1845_v34 = vpop.permute.xlu0 %1844  ;;  %v1954_v26 = vsel %vm368_vm13, %v1950_v54, %v1951_v9 }
 0x763   : > { %v2923_v57 = vcombine.low %v1985_v3, %v1987_v6  ;;  %v2924_v23 = vcombine.high %v1985_v3, %v1987_v6  ;;  %v1955_v38 = vsel %vm4225_vm0, %v1945_v51, %v1954_v26  ;;  %v1847_v39 = vpop.permute.xlu1 %1846  ;;  %v1850_v0 = vrot.slane %v1845_v34, 4 }
 0x764   : > { %v2922_v40 = vcombine.high %v1953_v53, %v1955_v38  ;;  %v2921_v46 = vcombine.low %v1953_v53, %v1955_v38  ;;  %v1851_v42 = vrot.slane %v1847_v39, 4  ;;  %v1853_v53 = vsel %vm399_vm1, %v3926_v22, %v1852_v58 }
 0x765   : > { %2190 = vmatprep.subr.bf16.mxu1 %v2924_v23 }
 0x766   : > { %v3950_v43 = vpop.permute.xlu0 %1812  ;;  %2191 = vmatpush1.bf16.msra.mxu1 %v2923_v57  ;;  %v1854_v61 = vsel %vm368_vm13, %v1850_v0, %v1851_v42 }
 0x767   : > { %2192 = vmatprep.subr.bf16.mxu1 %v2922_v40  ;;  %v1911_v27 = vpop.permute.xlu1 %1910  ;;  %v1820_v57 = vrot.slane %v3950_v43, 4 }
 0x768   : > { %v1915_v56 = vrot.slane %v1911_v27, 4 }
 0x76a   : > { %v1909_v45 = vpop.permute.xlu0 %1908  ;;  %2193 = vmatpush1.bf16.msra.mxu1 %v2921_v46 }
 0x76b   : > { %v1914_v55 = vrot.slane %v1909_v45, 4  ;;  %2194 = vmatprep.subr.bf16.mxu1 %v3851_v18  ;;  %v1879_v32 = vpop.permute.xlu1 %1878 }
 0x76c   : > { %v1883_v17 = vrot.slane %v1879_v32, 4 }
 0x76d   : > { %v1918_v20 = vsel %vm368_vm13, %v1914_v55, %v1915_v56 }
 0x76e   : > { %v1877_v62 = vpop.permute.xlu0 %1876  ;;  %2195 = vmatpush1.bf16.msra.mxu1 %v3853_v28  ;;  %v1919_v18 = vsel %vm4282_vm10, %v1909_v45, %v1918_v20  ;;  %v1855_v28 = vsel %vm399_vm1, %v1845_v34, %v1854_v61  ;;  %vm4285_vm10 = vcmask 138240  }
 0x76f   : > { %v1882_v63 = vrot.slane %v1877_v62, 4  ;;  %v2917_v1 = vcombine.low %v1917_v30, %v1919_v18  ;;  %v2918_v2 = vcombine.high %v1917_v30, %v1919_v18  ;;  %v1815_v51 = vpop.permute.xlu1 %1814  ;;  %v2914_v23 = vcombine.high %v1853_v53, %v1855_v28  ;;  %vm4286_vm4 = vmmov %vm4285_vm10 }
 0x770   : > { %v1821_v5 = vrot.slane %v1815_v51, 4  ;;  %v2913_v34 = vcombine.low %v1853_v53, %v1855_v28 }
 0x771   : > { %v1886_v9 = vsel %vm368_vm13, %v1882_v63, %v1883_v17  ;;  %2196 = vmatprep.subr.bf16.mxu1 %v2918_v2 }
 0x772   : > { %v2033_v13 = vpop.permute.xlu0 %2032  ;;  %2197 = vmatpush1.bf16.msra.mxu1 %v2917_v1  ;;  %v1887_v54 = vsel %vm4284_vm7, %v1877_v62, %v1886_v9  ;;  %v1824_v50 = vsel %vm368_vm13, %v1820_v57, %v1821_v5  ;;  %vm4287_vm7 = vcmask 908288   ;;  %v2930_v5 = vld [vmem:[%s4211_s3 + $0x10] sm:$0xff] }
 0x773   : > { %v2915_v3 = vcombine.low %v1885_v41, %v1887_v54  ;;  %v2916_v6 = vcombine.high %v1885_v41, %v1887_v54  ;;  %v1819_v26 = vpop.permute.xlu1 %1818  ;;  %v2040_v49 = vrot.slane %v2033_v13, 4  ;;  %v1825_v45 = vsel %vm4285_vm10, %v3950_v43, %v1824_v50  ;;  %vm4288_vm0 = vmmov %vm4287_vm7  ;;  %v3110_v43 = vld [vmem:[%s4209_s1 + $0x30] ss:$8 sps:$4 sm:$0xff]  }
 0x774   : > { %v1823_v40 = vrot.slane %v1819_v26, 4 }
 0x775   : > { %2198 = vmatprep.subr.bf16.mxu1 %v2916_v6 }
 0x776   : > { %v1817_v38 = vpop.permute.xlu0 %1816  ;;  %2199 = vmatpush1.bf16.msra.mxu1 %v2915_v3  ;;  %v2931_v3 = vld [vmem:[%s4211_s3 + $0x18] sm:$0xff] }
 0x777   : > { %v1822_v39 = vrot.slane %v1817_v38, 4  ;;  %2200 = vmatprep.subr.bf16.mxu1 %v2914_v23  ;;  %v3076_v11 = vpop.permute.xlu1 %3075 }
 0x778   : > { %v3078_v27 = vunpack.i.h.bf16 %v3076_v11  ;;  %v3077_v46 = vunpack.i.l.bf16 %v3076_v11 }
 0x779   : > { %v1826_v16 = vsel %vm368_vm13, %v1822_v39, %v1823_v40 }
 0x77a   : > { %v2037_v0 = vpop.permute.xlu0 %2036  ;;  %v2043_v22 = vrot.slane %v3078_v27, 4  ;;  %v2041_v42 = vrot.slane %v3077_v46, 4  ;;  %2201 = vmatpush1.bf16.msra.mxu1 %v2913_v34  ;;  %v1827_v21 = vsel %vm4286_vm4, %v1817_v38, %v1826_v16  ;;  %v2932_v46 = vld [vmem:[%s4212_s4 + $0x1] sm:$0x1] }
 0x77b   : > { %v2042_v55 = vrot.slane %v2037_v0, 4  ;;  %v2911_v56 = vcombine.low %v1825_v45, %v1827_v21  ;;  %v2912_v32 = vcombine.high %v1825_v45, %v1827_v21 }
 0x77c   : > { %v2044_v59 = vsel %vm368_vm13, %v2040_v49, %v2041_v42  ;;  %v2933_v42 = vld [vmem:[%s4213_s5 + $0x10] sm:$0xff] }
 0x77d   : > { %v2046_v35 = vsel %vm368_vm13, %v2042_v55, %v2043_v22  ;;  %2202 = vmatprep.subr.bf16.mxu1 %v2912_v32  ;;  %v2045_v60 = vsel %vm4287_vm7, %v2033_v13, %v2044_v59  ;;  %v2934_v22 = vld [vmem:[%s4213_s5 + $0x18] sm:$0xff] }
 0x77e   : > { %2203 = vmatpush1.bf16.msra.mxu1 %v2911_v56  ;;  %v2047_v20 = vsel %vm4288_vm0, %v2037_v0, %v2046_v35  ;;  %v2936_v59 = vld [vmem:[%s4214_s6 + $0x18] sm:$0xff]  ;;  %v2935_v35 = vld [vmem:[%s4214_s6 + $0x10] sm:$0xff]  ;;  %vm4291_vm0 = vcmp.ne.s16.totalorder %v3345_v7, 0 }
 0x77f   : > { %v2927_v30 = vcombine.low %v2045_v60, %v2047_v20  ;;  %v2928_v14 = vcombine.high %v2045_v60, %v2047_v20 }
 0x781   : > { %2218 = vmatprep.subr.bf16.mxu1 %v2928_v14 }
 0x782   : > { %2219 = vmatpush2.bf16.msra.mxu1 %v2927_v30 }
 0x784   : > { %v2079_v62 = vpop.permute.xlu1 %2078 }
 0x785   : > { %2221 = vmatmul.mubr.bf16.vlgmr.msra.gmra.mxu1 %v3110_v43 }
 0x787   : > { %v2084_v51 = vpop.permute.xlu0 %2083 }
 0x845   : > { %v2222_v61 = vpop.f32.mrf.mxu1 }
 0x846   : > { %v3988_v63 = vadd.f32 %v2222_v61, %v2079_v62 }
 0x847   : > { %v2224_v18 = vpop.f32.mrf.mxu1 }
 0x848   : > { %v3990_v17 = vadd.f32 %v2224_v18, %v2079_v62 }
 0x849   : > { %v2226_v1 = vpop.f32.mrf.mxu1 }
 0x84a   : > { %v2231_v2 = vadd.f32 %v3990_v17, %v3988_v63  ;;  %v3994_v9 = vadd.f32 %v2226_v1, %v2084_v51  ;;  %v2482_v1 = vld [vmem:[#allocation2 + $0xc] sm:$0xf] }
 0x84b   : > { %v2228_v58 = vpop.f32.mrf.mxu1 }
 0x84c   : > { %v3996_v41 = vadd.f32 %v2228_v58, %v2084_v51  ;;  %2232 = vadd.xlane.f32.xlu1 %v2231_v2  ;;  %v2484_v2 = vld [vmem:[#allocation2 + $0x1c] sm:$0xf]  ;;  %v2514_v51 = vld [vmem:[#allocation2 + $0xc] sm:$0xf] }
 0x84d   : > { %v2516_v58 = vld [vmem:[#allocation2 + $0x1c] sm:$0xf] }
 0x84e   : > { %v2234_v13 = vadd.f32 %v3996_v41, %v3994_v9 }
 0x850   : > { %2235 = vadd.xlane.f32.xlu0 %v2234_v13 }
 0x8d5   : > { %v2233_v54 = vpop.xlane.xlu1 %2232 }
 0x8d6   : > { %v2237_v28 = vmul.f32 0.00390625, %v2233_v54  ;;  %v2486_v54 = vsel %vm3272_vm6, %v2482_v1, 0 }
 0x8d8   : > { %v2242_v26 = vmul.f32 %v2930_v5, %v2237_v28  ;;  %v2488_v28 = vsel %vm3272_vm6, %v2484_v2, 0  ;;  %vm4289_vm6 = vcmp.ne.s16.totalorder %v3294_v37, 0  ;;  %v2944_v2 = vld [vmem:[%s4210_s2 + $0x48] sm:$0xff] }
 0x8d9   : > { %v2236_v6 = vpop.xlane.xlu0 %2235 }
 0x8da   : > { %v2238_v53 = vmul.f32 0.00390625, %v2236_v6  ;;  %v2244_v23 = vsel %vm1276_vm11, %v2242_v26, 0.0  ;;  %v2450_v6 = vld [vmem:[#allocation2 + $0xc] sm:$0xf]  ;;  %v2452_v26 = vld [vmem:[#allocation2 + $0x1c] sm:$0xf] }
 0x8dc   : > { %v2243_v57 = vmul.f32 %v2931_v3, %v2238_v53  ;;  %v3079_v3 = vpack.i.bf16 %v2516_v58, %v2514_v51  ;;  %v3084_v53 = vpack.i.bf16 %v2488_v28, %v2486_v54 }
 0x8de   : > { %v2245_v38 = vsel %vm1276_vm11, %v2243_v57, 0.0  ;;  %v2454_v57 = vsel %vm3288_vm9, %v2450_v6, 0 }
 0x8df   : > { %v2246_v50 = vadd.f32 %v2245_v38, %v2244_v23  ;;  %v2456_v23 = vsel %vm3288_vm9, %v2452_v26, 0  ;;  %vm4290_vm9 = vmmov %vm4289_vm6 }
 0x8e0   : > { %v3089_v38 = vpack.i.bf16 %v2456_v23, %v2454_v57 }
 0x8e1   : > { %v2247_v39 = vrot.slane %v2246_v50, 4 }
 0x8e3   : > { %v2248_v40 = vadd.f32 %v2247_v39, %v2246_v50 }
 0x8e5   : > { %v2249_v11 = vrot.slane %v2248_v40, 2 }
 0x8e7   : > { %v2250_v34 = vadd.f32 %v2249_v11, %v2248_v40 }
 0x8e9   : > { %v2251_v27 = vrot.slane %v2250_v34, 1 }
 0x8eb   : > { %v2252_v49 = vadd.f32 %v2251_v27, %v2250_v34 }
 0x8ed   : > { %v2255_v16 = vadd.f32 %v2932_v46, %v2252_v49 }
 0x8ef   : > { %v2256_v0 = vmax.f32 %v2255_v16, 0.0 }
 0x8f1   : > { %v2263_v45 = vrot.slane %v2256_v0, %v1293_v8 }
 0x8f3   : > { %v2265_v21 = vmul.f32 %v2934_v22, %v2263_v45  ;;  %v2264_v55 = vmul.f32 %v2933_v42, %v2263_v45 }
 0x8f5   : > { %v2269_v56 = vsel %vm1276_vm11, %v2265_v21, 0.0  ;;  %v2266_v32 = vsel %vm1276_vm11, %v2264_v55, 0.0  ;;  %vm4292_vm11 = vmmov %vm4291_vm0 }
 0x8f6   : > { %2270 = vadd.xlane.f32.xlu1 %v2269_v56  ;;  %2267 = vadd.xlane.f32.xlu0 %v2266_v32 }
 0x97f   : > { %v2271_v60 = vpop.xlane.xlu1 %2270  ;;  %v2268_v20 = vpop.xlane.xlu0 %2267 }
 0x980   : > { %v2276_v47 = vadd.f32 %v2936_v59, %v2271_v60  ;;  %v2275_v8 = vadd.f32 %v2935_v35, %v2268_v20 }
 0x982   : > { %v2938_v30 = vmul.f32 -1.442695, %v2276_v47  ;;  %v2937_v14 = vmul.f32 -1.442695, %v2275_v8 }
 0x984   : > { %3122 = vpow2.f32 %v2938_v30  ;;  %v2542_v30 = vld [vmem:[#allocation2 + $0xc] sm:$0xf] }
 0x985   : > { %3124 = vpow2.f32 %v2937_v14  ;;  %v2544_v14 = vld [vmem:[#allocation2 + $0x1c] sm:$0xf] }
 0x991   : > { %v3123_v43 = vpop.eup %3122 }
 0x992   : > { %v3125_v61 = vpop.eup %3124  ;;  %v2284_v62 = vadd.f32 1.0, %v3123_v43 }
 0x993   : > { %v2283_v18 = vadd.f32 1.0, %v3125_v61  ;;  %v2546_v61 = vsel %vm3384_vm14, %v2542_v30, 0 }
 0x994   : > { %3126 = vrcp.f32 %v2284_v62  ;;  %v2548_v62 = vsel %vm3384_vm14, %v2544_v14, 0  ;;  %vm4297_vm14 = vcmask 916480  }
 0x995   : > { %3128 = vrcp.f32 %v2283_v18  ;;  %v3094_v18 = vpack.i.bf16 %v2548_v62, %v2546_v61 }
 0x9a1   : > { %v3127_v13 = vpop.eup %3126 }
 0x9a2   : > { %v3129_v5 = vpop.eup %3128  ;;  %2296 = vperm.xlu1 %3018, %v3127_v13  }
 0x9a3   : > { %2291 = vperm.xlu0 %3017, %v3129_v5  }
 0x9a6   : > { %3085 = vrot.lane.b32.xlu1 %v3084_v53, %s3160_s10 }
 0x9a7   : > { %3080 = vrot.lane.b32.xlu0 %v3079_v3, %s3163_s13 }
 0x9ab   : > { %3090 = vrot.lane.b32.xlu0 %v3089_v38, %s3158_s8 }
 0xa1d   : > { %v2297_v25 = vpop.permute.xlu1 %2296 }
 0xa1e   : > { %v2301_v50 = vmul.f32 %v2297_v25, %v3994_v9  ;;  %v2302_v39 = vmul.f32 %v2297_v25, %v3996_v41  ;;  %v2292_v40 = vpop.permute.xlu0 %2291 }
 0xa1f   : > { %v2299_v11 = vmul.f32 %v2292_v40, %v3988_v63  ;;  %v2300_v34 = vmul.f32 %v2292_v40, %v3990_v17 }
 0xa20   : > { %v4043_v27 = vadd.f32 %v2301_v50, %v3683_v4  ;;  %v4046_v36 = vadd.f32 %v2302_v39, %v3686_v10 }
 0xa21   : > { %v4049_v46 = vadd.f32 %v2299_v11, %v3689_v12  ;;  %v4052_v49 = vadd.f32 %v2300_v34, %v3692_v15  ;;  %v3086_v51 = vpop.permute.xlu1 %3085 }
 0xa22   : > { %v4056_v9 = vpack.c.bf16 %v4046_v36, %v4043_v27  ;;  %v3081_v58 = vpop.permute.xlu0 %3080 }
 0xa23   : > { %v2978_v63 = vpack.c.bf16 %v4052_v49, %v4049_v46  ;;  %v3146_v4 = vpack.c.bf16 %v4043_v27, %v4049_v46  ;;  %v3147_v10 = vpack.c.bf16 %v4046_v36, %v4052_v49  ;;  %v3082_v13 = vunpack.i.l.bf16 %v3081_v58 }
 0xa24   : > { %2320 = vst [vmem:[#allocation2 + $0x14] sm:$0xff] %v4056_v9  ;;  %v2487_v22 = vsel %vm4290_vm9, %v4056_v9, 0  ;;  %v2455_v42 = vsel %vm501_vm15, %v4056_v9, 0  ;;  %v3083_v44 = vunpack.i.h.bf16 %v3081_v58 }
 0xa25   : > { %2319 = vst [vmem:[#allocation2 + $0x4] sm:$0xff] %v2978_v63  ;;  %2521 = vrot.lane.b32.xlu1 %v2978_v63, %s3163_s13  ;;  %v2485_v16 = vsel %vm4289_vm6, %v2978_v63, 0  ;;  %v2453_v0 = vsel %vm501_vm15, %v2978_v63, 0  ;;  %vm4293_vm15 = vcmp.ne.s16.totalorder %v3361_v19, 0  ;;  %v2545_v1 = vsel %vm606_vm3, %v2978_v63, 0 }
 0xa26   : > { %vm4294_vm10 = vmmov %vm4293_vm15  ;;  %v2530_v28 = vrot.slane %v3082_v13, 4  ;;  %v3091_v3 = vpop.permute.xlu0 %3090  ;;  %v2532_v26 = vrot.slane %v3083_v44, 4  ;;  %v3087_v63 = vunpack.i.l.bf16 %v3086_v51  ;;  %vm4303_vm6 = vcmask 121856  }
 0xa27   : > { %vm4304_vm9 = vmmov %vm4303_vm6 }
 0xa29   : > { %2525 = vrot.lane.b32.xlu1 %v4056_v9, %s3163_s13 }
 0xa2b   : > { %v2355_v17 = vld [vmem:[#allocation2 + $0x10] sm:$0xff]  ;;  %v2356_v41 = vld [vmem:[#allocation2 + $0x18] sm:$0xf] }
 0xa2c   : > { %v2353_v12 = vld [vmem:[#allocation2] sm:$0xff]  ;;  %v2354_v15 = vld [vmem:[#allocation2 + $0x8] sm:$0xf]  ;;  %v2416_v37 = vld [vmem:[#allocation2 + $0x18] sm:$0xf]  ;;  %v2419_v52 = vsel %vm4292_vm11, %v2355_v17, 0 }
 0xa2d   : > { %2361 = vrot.lane.b32.xlu0 %v2353_v12, %s3164_s14  ;;  %2363 = vrot.lane.b32.xlu1 %v2354_v15, %s3164_s14  ;;  %v2414_v45 = vld [vmem:[#allocation2 + $0x8] sm:$0xf]  ;;  %v2417_v21 = vsel %vm4291_vm0, %v2353_v12, 0  ;;  %v2420_v56 = vsel %vm3282_vm8, %v2416_v37, 0  ;;  %v2385_v59 = vsel %vm4293_vm15, %v2353_v12, 0  ;;  %v2387_v31 = vsel %vm4294_vm10, %v2355_v17, 0 }
 0xa2e   : > { %v2418_v55 = vsel %vm3282_vm8, %v2414_v45, 0  ;;  %v2382_v32 = vld [vmem:[#allocation2 + $0x8] sm:$0xf]  ;;  %v2384_v7 = vld [vmem:[#allocation2 + $0x18] sm:$0xf]  ;;  %vm4295_vm8 = vcmp.ne.s16.totalorder %v3380_v29, 0  ;;  %v3093_v15 = vunpack.i.h.bf16 %v3091_v3 }
 0xa2f   : > { %v2386_v35 = vsel %vm3312_vm12, %v2382_v32, 0  ;;  %v2388_v60 = vsel %vm3312_vm12, %v2384_v7, 0  ;;  %v2322_v20 = vld [vmem:[#allocation2 + $0x8] sm:$0xf]  ;;  %v2325_v47 = vsel %vm4295_vm8, %v2353_v12, 0  ;;  %vm4296_vm12 = vmmov %vm4295_vm8  ;;  %v2547_v29 = vsel %vm606_vm3, %v4056_v9, 0 }
 0xa30   : > { %v2326_v8 = vsel %vm3369_vm5, %v2322_v20, 0  ;;  %v2324_v19 = vld [vmem:[#allocation2 + $0x18] sm:$0xf]  ;;  %v2327_v48 = vsel %vm4296_vm12, %v2355_v17, 0  ;;  %vm4298_vm3 = vmmov %vm4297_vm14  ;;  %v3088_v12 = vunpack.i.h.bf16 %v3086_v51  ;;  %vm4305_vm0 = vcmask 138240  }
 0xa31   : > { %2365 = vrot.lane.b32.xlu0 %v2355_v17, %s3164_s14  ;;  %2367 = vrot.lane.b32.xlu1 %v2356_v41, %s3164_s14  ;;  %v2328_v43 = vsel %vm3369_vm5, %v2324_v19, 0  ;;  %vm4299_vm5 = vcmask 1039360   ;;  %vm4306_vm11 = vmmov %vm4305_vm0 }
 0xa32   : > { %v2504_v45 = vrot.slane %v3088_v12, 4  ;;  %vm4300_vm4 = vmmov %vm4299_vm5 }
 0xa35   : > { %2493 = vrot.lane.b32.xlu0 %v2485_v16, %s3160_s10  ;;  %2461 = vrot.lane.b32.xlu1 %v2453_v0, %s3158_s8  ;;  %v3092_v16 = vunpack.i.l.bf16 %v3091_v3 }
 0xa39   : > { %2497 = vrot.lane.b32.xlu0 %v2487_v22, %s3160_s10  ;;  %2465 = vrot.lane.b32.xlu1 %v2455_v42, %s3158_s8  ;;  %v2502_v22 = vrot.slane %v3087_v63, 4 }
 0xa3d   : > { %2425 = vrot.lane.b32.xlu0 %v2417_v21, %s3159_s9  ;;  %2427 = vrot.lane.b32.xlu1 %v2418_v55, %s3159_s9  ;;  %v2472_v21 = vrot.slane %v3093_v15, 4 }
 0xa41   : > { %2429 = vrot.lane.b32.xlu0 %v2419_v52, %s3159_s9  ;;  %2431 = vrot.lane.b32.xlu1 %v2420_v56, %s3159_s9  ;;  %v2470_v52 = vrot.slane %v3092_v16, 4 }
 0xa45   : > { %2393 = vrot.lane.b32.xlu0 %v2385_v59, %s3157_s30  ;;  %2395 = vrot.lane.b32.xlu1 %v2386_v35, %s3157_s30 }
 0xa49   : > { %2397 = vrot.lane.b32.xlu0 %v2387_v31, %s3157_s30  ;;  %2399 = vrot.lane.b32.xlu1 %v2388_v60, %s3157_s30 }
 0xa4d   : > { %2333 = vrot.lane.b32.xlu0 %v2325_v47, %s3162_s12  ;;  %2335 = vrot.lane.b32.xlu1 %v2326_v8, %s3162_s12 }
 0xa51   : > { %2337 = vrot.lane.b32.xlu0 %v2327_v48, %s3162_s12  ;;  %2339 = vrot.lane.b32.xlu1 %v2328_v43, %s3162_s12 }
 0xa55   : > { %2553 = vrot.lane.b32.xlu0 %v2545_v1, %s3161_s11  ;;  %3095 = vrot.lane.b32.xlu1 %v3094_v18, %s3161_s11 }
 0xa59   : > { %2557 = vrot.lane.b32.xlu0 %v2547_v29, %s3161_s11  ;;  %2599 = vperm.xlu1 %3018, %v2943_v24  }
 0xa5d   : > { %2604 = vperm.xlu0 %3017, %v2944_v2  }
 0xa97   : > { %v2522_v54 = vpop.permute.xlu1 %2521 }
 0xa98   : > { %v2529_v5 = vrot.slane %v2522_v54, 4 }
 0xa9a   : > { %v2533_v53 = vsel %vm368_vm13, %v2529_v5, %v2530_v28 }
 0xa9b   : > { %v2526_v6 = vpop.permute.xlu1 %2525  ;;  %v2534_v38 = vsel %vm4297_vm14, %v2522_v54, %v2533_v53 }
 0xa9c   : > { %v2531_v57 = vrot.slane %v2526_v6, 4 }
 0xa9e   : > { %v2535_v23 = vsel %vm368_vm13, %v2531_v57, %v2532_v26 }
 0xa9f   : > { %v4147_v25 = vpop.permute.xlu0 %2361  ;;  %v2536_v50 = vsel %vm4298_vm3, %v2526_v6, %v2535_v23  ;;  %v4150_v39 = vpop.permute.xlu1 %2363 }
 0xaa0   : > { %v2961_v40 = vcombine.low %v2534_v38, %v2536_v50  ;;  %v2962_v11 = vcombine.high %v2534_v38, %v2536_v50  ;;  %v2369_v26 = vrot.slane %v4147_v25, 4  ;;  %v2370_v53 = vrot.slane %v4150_v39, 4 }
 0xaa2   : > { %2709 = vmatprep.subr.bf16.mxu0 %v2962_v11  ;;  %v2373_v11 = vsel %vm368_vm13, %v2369_v26, %v2370_v53 }
 0xaa3   : > { %v4152_v34 = vpop.permute.xlu0 %2365  ;;  %v2368_v9 = vpop.permute.xlu1 %2367  ;;  %2710 = vmatpush1.bf16.msra.mxu0 %v2961_v40  ;;  %v2374_v16 = vsel %vm399_vm1, %v4147_v25, %v2373_v11 }
 0xaa4   : > { %v2371_v44 = vrot.slane %v4152_v34, 4  ;;  %v2372_v28 = vrot.slane %v2368_v9, 4 }
 0xaa6   : > { %v2375_v50 = vsel %vm368_vm13, %v2371_v44, %v2372_v28  ;;  %v3135_v44 = vld [vmem:[%s3230_s29 + $0x8] sm:$0xff] }
 0xaa7   : > { %v2494_v17 = vpop.permute.xlu0 %2493  ;;  %v2462_v41 = vpop.permute.xlu1 %2461  ;;  %v2376_v46 = vsel %vm399_vm1, %v4152_v34, %v2375_v50  ;;  %vm4307_vm1 = vcmask 908288  }
 0xaa8   : > { %v2501_v0 = vrot.slane %v2494_v17, 4  ;;  %v2469_v42 = vrot.slane %v2462_v41, 4  ;;  %vm4308_vm15 = vmmov %vm4307_vm1 }
 0xaaa   : > { %v2505_v56 = vsel %vm368_vm13, %v2501_v0, %v2502_v22  ;;  %v2473_v7 = vsel %vm368_vm13, %v2469_v42, %v2470_v52  ;;  %v2950_v0 = vcombine.high %v2374_v16, %v2376_v46 }
 0xaab   : > { %v2498_v55 = vpop.permute.xlu0 %2497  ;;  %v2466_v37 = vpop.permute.xlu1 %2465  ;;  %v2506_v60 = vsel %vm416_vm2, %v2494_v17, %v2505_v56  ;;  %v2474_v48 = vsel %vm4300_vm4, %v2462_v41, %v2473_v7 }
 0xaac   : > { %v2503_v32 = vrot.slane %v2498_v55, 4  ;;  %v2471_v59 = vrot.slane %v2466_v37, 4 }
 0xaae   : > { %v2507_v35 = vsel %vm368_vm13, %v2503_v32, %v2504_v45  ;;  %v2475_v31 = vsel %vm368_vm13, %v2471_v59, %v2472_v21 }
 0xaaf   : > { %v2508_v20 = vsel %vm416_vm2, %v2498_v55, %v2507_v35  ;;  %v2426_v47 = vpop.permute.xlu0 %2425  ;;  %v2476_v8 = vsel %vm4299_vm5, %v2466_v37, %v2475_v31  ;;  %v2428_v19 = vpop.permute.xlu1 %2427  ;;  %vm4301_vm2 = vcmask 7168   ;;  %v2949_v37 = vcombine.low %v2374_v16, %v2376_v46 }
 0xab0   : > { %v2959_v30 = vcombine.low %v2506_v60, %v2508_v20  ;;  %v2960_v14 = vcombine.high %v2506_v60, %v2508_v20  ;;  %v2433_v43 = vrot.slane %v2426_v47, 4  ;;  %v2958_v61 = vcombine.high %v2474_v48, %v2476_v8  ;;  %vm4302_vm7 = vmmov %vm4301_vm2 }
 0xab1   : > { %v2434_v62 = vrot.slane %v2428_v19, 4  ;;  %v2957_v33 = vcombine.low %v2474_v48, %v2476_v8 }
 0xab2   : > { %2711 = vmatprep.subr.bf16.mxu0 %v2960_v14 }
 0xab3   : > { %v2430_v18 = vpop.permute.xlu0 %2429  ;;  %2712 = vmatpush1.bf16.msra.mxu0 %v2959_v30  ;;  %v2432_v1 = vpop.permute.xlu1 %2431  ;;  %v2437_v2 = vsel %vm368_vm13, %v2433_v43, %v2434_v62 }
 0xab4   : > { %v2435_v24 = vrot.slane %v2430_v18, 4  ;;  %2713 = vmatprep.subr.bf16.mxu0 %v2958_v61  ;;  %v2436_v29 = vrot.slane %v2432_v1, 4  ;;  %v2438_v6 = vsel %vm4302_vm7, %v2426_v47, %v2437_v2  ;;  %v3134_v2 = vld [vmem:[%s3230_s29] sm:$0xff] }
 0xab6   : > { %v2439_v51 = vsel %vm368_vm13, %v2435_v24, %v2436_v29 }
 0xab7   : > { %v2394_v58 = vpop.permute.xlu0 %2393  ;;  %2714 = vmatpush1.bf16.msra.mxu0 %v2957_v33  ;;  %v2396_v13 = vpop.permute.xlu1 %2395  ;;  %v2440_v54 = vsel %vm4301_vm2, %v2430_v18, %v2439_v51  ;;  %v3113_v18 = vld [vmem:[%s4209_s1 + $0x40] ss:$8 sps:$4 sm:$0xff]  }
 0xab8   : > { %v2401_v5 = vrot.slane %v2394_v58, 4  ;;  %2715 = vmatprep.subr.bf16.mxu0 %v3147_v10  ;;  %v2402_v3 = vrot.slane %v2396_v13, 4  ;;  %v2954_v57 = vcombine.high %v2438_v6, %v2440_v54  ;;  %v2953_v10 = vcombine.low %v2438_v6, %v2440_v54  ;;  %v3136_v6 = vld [vmem:[%s3230_s29 + $0x10] sm:$0xff] }
 0xaba   : > { %v2405_v36 = vsel %vm368_vm13, %v2401_v5, %v2402_v3 }
 0xabb   : > { %v2398_v23 = vpop.permute.xlu0 %2397  ;;  %2716 = vmatpush1.bf16.msra.mxu0 %v3146_v4  ;;  %v2400_v38 = vpop.permute.xlu1 %2399  ;;  %v2406_v12 = vsel %vm4303_vm6, %v2394_v58, %v2405_v36 }
 0xabc   : > { %v2403_v40 = vrot.slane %v2398_v23, 4  ;;  %2717 = vmatprep.subr.bf16.mxu0 %v2954_v57  ;;  %v2404_v49 = vrot.slane %v2400_v38, 4  ;;  %v3137_v57 = vld [vmem:[%s3230_s29 + $0x18] sm:$0xff] }
 0xabe   : > { %v2407_v9 = vsel %vm368_vm13, %v2403_v40, %v2404_v49 }
 0xabf   : > { %v2334_v39 = vpop.permute.xlu0 %2333  ;;  %2718 = vmatpush1.bf16.msra.mxu0 %v2953_v10  ;;  %v2336_v63 = vpop.permute.xlu1 %2335  ;;  %v2408_v27 = vsel %vm4304_vm9, %v2398_v23, %v2407_v9 }
 0xac0   : > { %v2341_v4 = vrot.slane %v2334_v39, 4  ;;  %v2342_v15 = vrot.slane %v2336_v63, 4  ;;  %v2951_v17 = vcombine.low %v2406_v12, %v2408_v27  ;;  %v2952_v41 = vcombine.high %v2406_v12, %v2408_v27 }
 0xac2   : > { %2719 = vmatprep.subr.bf16.mxu0 %v2952_v41  ;;  %v2345_v21 = vsel %vm368_vm13, %v2341_v4, %v2342_v15 }
 0xac3   : > { %v2338_v22 = vpop.permute.xlu0 %2337  ;;  %v2340_v42 = vpop.permute.xlu1 %2339  ;;  %2720 = vmatpush1.bf16.msra.mxu0 %v2951_v17  ;;  %v2346_v32 = vsel %vm4305_vm0, %v2334_v39, %v2345_v21 }
 0xac4   : > { %v2343_v45 = vrot.slane %v2338_v22, 4  ;;  %v2344_v55 = vrot.slane %v2340_v42, 4  ;;  %2721 = vmatprep.subr.bf16.mxu0 %v2950_v0 }
 0xac6   : > { %v2347_v34 = vsel %vm368_vm13, %v2343_v45, %v2344_v55 }
 0xac7   : > { %v2554_v52 = vpop.permute.xlu0 %2553  ;;  %v3096_v56 = vpop.permute.xlu1 %3095  ;;  %2722 = vmatpush1.bf16.msra.mxu0 %v2949_v37  ;;  %v2348_v25 = vsel %vm4306_vm11, %v2338_v22, %v2347_v34 }
 0xac8   : > { %v3098_v59 = vunpack.i.h.bf16 %v3096_v56  ;;  %v3097_v35 = vunpack.i.l.bf16 %v3096_v56  ;;  %v2947_v7 = vcombine.low %v2346_v32, %v2348_v25  ;;  %v2948_v31 = vcombine.high %v2346_v32, %v2348_v25 }
 0xac9   : > { %v2561_v60 = vrot.slane %v2554_v52, 4 }
 0xaca   : > { %v2562_v20 = vrot.slane %v3097_v35, 4  ;;  %2723 = vmatprep.subr.bf16.mxu0 %v2948_v31  ;;  %v2564_v19 = vrot.slane %v3098_v59, 4 }
 0xacb   : > { %v2558_v47 = vpop.permute.xlu0 %2557  ;;  %2724 = vmatpush1.bf16.msra.mxu0 %v2947_v7 }
 0xacc   : > { %v2563_v8 = vrot.slane %v2558_v47, 4  ;;  %v2565_v30 = vsel %vm368_vm13, %v2561_v60, %v2562_v20 }
 0xacd   : > { %v2566_v48 = vsel %vm4307_vm1, %v2554_v52, %v2565_v30 }
 0xace   : > { %v2567_v14 = vsel %vm368_vm13, %v2563_v8, %v2564_v19 }
 0xacf   : > { %v2568_v43 = vsel %vm4308_vm15, %v2558_v47, %v2567_v14 }
 0xad0   : > { %v2963_v61 = vcombine.low %v2566_v48, %v2568_v43  ;;  %v2964_v62 = vcombine.high %v2566_v48, %v2568_v43 }
 0xad2   : > { %2739 = vmatprep.subr.bf16.mxu0 %v2964_v62 }
 0xad3   : > { %2740 = vmatpush2.bf16.msra.mxu0 %v2963_v61 }
 0xad4   : > { %v2600_v1 = vpop.permute.xlu1 %2599 }
 0xad6   : > { %2742 = vmatmul.mubr.bf16.vlgmr.msra.gmra.mxu0 %v3113_v18 }
 0xad8   : > { %v2605_v13 = vpop.permute.xlu0 %2604 }
 0xb96   : > { %v2743_v24 = vpop.f32.mrf.mxu0 }
 0xb97   : > { %v2744_v29 = vadd.f32 %v2743_v24, %v2600_v1 }
 0xb98   : > { %v2745_v33 = vpop.f32.mrf.mxu0 }
 0xb99   : > { %v2752_v51 = vadd.f32 %v3134_v2, %v2744_v29  ;;  %v2746_v58 = vadd.f32 %v2745_v33, %v2600_v1 }
 0xb9a   : > { %v2747_v54 = vpop.f32.mrf.mxu0 }
 0xb9b   : > { %2756 = vst [vmem:[%s278_s22] sm:$0xff] %v2752_v51  ;;  %v2753_v28 = vadd.f32 %v3135_v44, %v2746_v58  ;;  %v2748_v5 = vadd.f32 %v2747_v54, %v2605_v13 }
 0xb9c   : > { %v2749_v3 = vpop.f32.mrf.mxu0 }
 0xb9d   : > { %2757 = vst [vmem:[%s278_s22 + $0x8] sm:$0xff] %v2753_v28  ;;  %v2754_v26 = vadd.f32 %v3136_v6, %v2748_v5  ;;  %v2750_v53 = vadd.f32 %v2749_v3, %v2605_v13 }
 0xb9f   : > { %2758 = vst [vmem:[%s278_s22 + $0x10] sm:$0xff] %v2754_v26  ;;  %v2755_v23 = vadd.f32 %v3137_v57, %v2750_v53 }
 0xba1   : > { %2759 = vst [vmem:[%s278_s22 + $0x18] sm:$0xff] %v2755_v23 }
 0xba2 PF: > { %s17_s24 = sadd.s32 1, %s3154_s24  }
 0xba3   : > { %p14_p4 = scmp.ge.s32.totalorder %s17_s24, 4  }
 0xba5   :  { %16 = sbr.rel (!%p14_p4) target bundleno = 1 (0x1), region = 90 }

</bundles_post_ra>
